<compile_context>
chip_gen: v7x
topology: tpu7x:2x2x1
jax: 0.10.0
libtpu: 0.0.40
codegen_flags: <defaults>
</compile_context>

<pallas_src>
import functools

import jax
import jax.numpy as jnp
from jax.experimental import pallas as pl
from jax.experimental.pallas import tpu as pltpu

C_IN, C1, C2, C3 = 24 + 4, 32, 48, 64  # matches nn.Conv1d channel sizes


def global_pointnet_kernel(x_ref, w1_ref, b1_ref, w2_ref, b2_ref,
                           w3_ref, b3_ref, wa_ref, ba_ref,
                           vec_ref, attn_ref, *, block_b, n_pts):
    # One grid step == BB batch elements, flattened: x_ref is (BB*N, C_IN).
    x = x_ref[...]
    h = jnp.maximum(
        jnp.dot(x, w1_ref[...], preferred_element_type=jnp.float32) + b1_ref[...], 0.0)
    h = jnp.maximum(
        jnp.dot(h, w2_ref[...], preferred_element_type=jnp.float32) + b2_ref[...], 0.0)
    h = jnp.maximum(
        jnp.dot(h, w3_ref[...], preferred_element_type=jnp.float32) + b3_ref[...], 0.0)
    # h: (BB*N, 64).  Split the leading axis only (N is a multiple of 8 so this
    # does not cross an (8,128) tile boundary -> no VMEM copy).
    h3 = h.reshape(block_b, n_pts, C3)                       # (BB, N, 64)

    # attention: Linear(64 -> 1) as a lane-axis (channel) reduction on the XLU,
    # giving logits directly in the per-batch (BB, N) layout (N on lanes).
    wa = wa_ref[...]                                         # (1, 64)
    logits = jnp.sum(h3 * wa[None, :, :], axis=-1) + ba_ref[...]   # (BB, N)

    # softmax over the point axis (torch dim=1), per batch row.
    m = jnp.max(logits, axis=-1, keepdims=True)              # (BB, 1)
    e = jnp.exp(logits - m)                                  # EUP
    s = jnp.sum(e, axis=-1, keepdims=True)                   # (BB, 1)
    inv = pl.reciprocal(s, approx=True)                      # EUP vrcp
    attn = e * inv                                           # (BB, N)

    attn_ref[...] = attn                                     # lane-dense store
    vec_ref[...] = jnp.sum(h3 * attn[:, :, None], axis=1)    # (BB, 64)


def _round_up(a, m):
    return ((a + m - 1) // m) * m


def global_pointnet(x, params, block_b=64):
    """x: (B, N, C_IN) channels-last.  Returns (attn_vec (B,64), attn_w (B,N,1))."""
    B, N, C = x.shape
    assert C == C_IN
    (w1, b1, w2, b2, w3, b3, wa, ba) = params

    # Batch block: multiple of 8 for sublane-dense output tiles; pad B up.
    BB = min(_round_up(block_b, 8), _round_up(B, 8))
    Bp = _round_up(B, BB)
    n_blocks = Bp // BB
    if Bp != B:
        x = jnp.concatenate(
            [x, jnp.zeros((Bp - B, N, C), x.dtype)], axis=0)
    x2d = x.reshape(Bp * N, C)   # flatten so the kernel sees a 2-D slab

    kernel = functools.partial(global_pointnet_kernel, block_b=BB, n_pts=N)

    # Weights use constant index_maps -> same block every step, fetched once
    # and kept resident by the pipeline.
    in_specs = [
        pl.BlockSpec((BB * N, C_IN), lambda i: (i, 0)),   # x rows for this block
        pl.BlockSpec((C_IN, C1), lambda i: (0, 0)),
        pl.BlockSpec((1, C1), lambda i: (0, 0)),
        pl.BlockSpec((C1, C2), lambda i: (0, 0)),
        pl.BlockSpec((1, C2), lambda i: (0, 0)),
        pl.BlockSpec((C2, C3), lambda i: (0, 0)),
        pl.BlockSpec((1, C3), lambda i: (0, 0)),
        pl.BlockSpec((1, C3), lambda i: (0, 0)),          # wa as a (1, 64) row
        pl.BlockSpec((1, 1), lambda i: (0, 0)),
    ]
    out_specs = [
        pl.BlockSpec((BB, C3), lambda i: (i, 0)),         # attn_vec  (Bp, 64)
        pl.BlockSpec((BB, N), lambda i: (i, 0)),          # attn_w    (Bp, N), lane-dense
    ]
    out_shape = [
        jax.ShapeDtypeStruct((Bp, C3), jnp.float32),
        jax.ShapeDtypeStruct((Bp, N), jnp.float32),
    ]

    vec, attn = pl.pallas_call(
        kernel,
        out_shape=out_shape,
        grid=(n_blocks,),
        in_specs=in_specs,
        out_specs=out_specs,
        compiler_params=pltpu.CompilerParams(
            dimension_semantics=("parallel",)),           # lets v7x use both TCs
    )(x2d, w1, b1, w2, b2, w3, b3, wa, ba)

    # Strip batch padding; restore the module's (B, N, 1) attention shape.
    return vec[:B], attn[:B].reshape(B, N, 1)


def fuse_bn(w, b, gamma, beta, mean, var, eps=1e-5):
    """Fold inference-mode BatchNorm1d into the preceding 1x1 conv (w: (Cin, Cout))."""
    g = gamma / jnp.sqrt(var + eps)
    return w * g[None, :], (b - mean) * g + beta


if __name__ == "__main__":
    B, N = 24, 64          # 24 frames, 64 radar points, 28 features per point
    BLOCK_B = 8            # 8 batch elems per grid step -> M = 512 rows per matmul
    key = jax.random.PRNGKey(0)
    ks = jax.random.split(key, 12)

    x = jax.random.normal(ks[0], (B, N, C_IN), jnp.float32)

    def init_linear(k, cin, cout):
        kw, kb = jax.random.split(k)
        lim = 1.0 / jnp.sqrt(cin)
        w = jax.random.uniform(kw, (cin, cout), jnp.float32, -lim, lim)
        b = jax.random.uniform(kb, (cout,), jnp.float32, -lim, lim)
        return w, b

    def init_bn(k, c):
        k1, k2, k3, k4 = jax.random.split(k, 4)
        gamma = 1.0 + 0.1 * jax.random.normal(k1, (c,), jnp.float32)
        beta = 0.1 * jax.random.normal(k2, (c,), jnp.float32)
        mean = 0.1 * jax.random.normal(k3, (c,), jnp.float32)
        var = jnp.abs(jax.random.normal(k4, (c,), jnp.float32)) + 0.5
        return gamma, beta, mean, var

    w1, b1 = init_linear(ks[1], C_IN, C1)
    w2, b2 = init_linear(ks[2], C1, C2)
    w3, b3 = init_linear(ks[3], C2, C3)
    wa, ba = init_linear(ks[4], C3, 1)
    bn1 = init_bn(ks[5], C1)
    bn2 = init_bn(ks[6], C2)
    bn3 = init_bn(ks[7], C3)

    # Fuse eval-mode BN into conv weights (glue, outside the kernel).
    w1f, b1f = fuse_bn(w1, b1, *bn1)
    w2f, b2f = fuse_bn(w2, b2, *bn2)
    w3f, b3f = fuse_bn(w3, b3, *bn3)

    params = (w1f, b1f.reshape(1, C1),
              w2f, b2f.reshape(1, C2),
              w3f, b3f.reshape(1, C3),
              wa.T,                     # (1, 64) row for the lane reduction
              ba.reshape(1, 1))

    vec, attn = jax.jit(
        lambda xx: global_pointnet(xx, params, block_b=BLOCK_B))(x)
    jax.block_until_ready((vec, attn))

    # Pure-JAX reference for sanity.
    def ref(xx):
        h = jnp.maximum(xx @ w1f + b1f, 0.0)
        h = jnp.maximum(h @ w2f + b2f, 0.0)
        h = jnp.maximum(h @ w3f + b3f, 0.0)
        logits = h @ wa + ba
        aw = jax.nn.softmax(logits, axis=1)
        return jnp.sum(h * aw, axis=1), aw

    rvec, rattn = ref(x)
    assert vec.shape == (B, C3) and attn.shape == (B, N, 1)
    # approx reciprocal on the softmax denominator -> slightly looser tolerance
    assert jnp.allclose(vec, rvec, atol=1e-3, rtol=1e-3)
    assert jnp.allclose(attn, rattn, atol=1e-3, rtol=1e-3)
    print("KERNEL_OK")
</pallas_src>

<mosaic_0001>
module attributes {stable_mosaic.version = 11 : i64} {
  func.func @global_pointnet_kernel(%arg0: i32, %arg1: memref<512x28xf32, #tpu.memory_space<vmem>>, %arg2: memref<28x32xf32, #tpu.memory_space<vmem>>, %arg3: memref<1x32xf32, #tpu.memory_space<vmem>>, %arg4: memref<32x48xf32, #tpu.memory_space<vmem>>, %arg5: memref<1x48xf32, #tpu.memory_space<vmem>>, %arg6: memref<48x64xf32, #tpu.memory_space<vmem>>, %arg7: memref<1x64xf32, #tpu.memory_space<vmem>>, %arg8: memref<1x64xf32, #tpu.memory_space<vmem>>, %arg9: memref<1x1xf32, #tpu.memory_space<vmem>>, %arg10: memref<8x64xf32, #tpu.memory_space<vmem>>, %arg11: memref<8x64xf32, #tpu.memory_space<vmem>>) attributes {dimension_semantics = [#tpu.dimension_semantics<parallel>], iteration_bounds = array<i64: 3>, scalar_prefetch = 0 : i64, scratch_operands = 0 : i64, tpu.core_type = #tpu.core_type<tc>, window_params = [{transform_indices = @transform_0, window_bounds = array<i64: 512, 28>}, {pipeline_mode = #tpu.pipeline_mode<synchronous>, transform_indices = @transform_1, window_bounds = array<i64: 28, 32>}, {pipeline_mode = #tpu.pipeline_mode<synchronous>, transform_indices = @transform_2, window_bounds = array<i64: 1, 32>}, {pipeline_mode = #tpu.pipeline_mode<synchronous>, transform_indices = @transform_3, window_bounds = array<i64: 32, 48>}, {pipeline_mode = #tpu.pipeline_mode<synchronous>, transform_indices = @transform_4, window_bounds = array<i64: 1, 48>}, {pipeline_mode = #tpu.pipeline_mode<synchronous>, transform_indices = @transform_5, window_bounds = array<i64: 48, 64>}, {pipeline_mode = #tpu.pipeline_mode<synchronous>, transform_indices = @transform_6, window_bounds = array<i64: 1, 64>}, {pipeline_mode = #tpu.pipeline_mode<synchronous>, transform_indices = @transform_7, window_bounds = array<i64: 1, 64>}, {pipeline_mode = #tpu.pipeline_mode<synchronous>, transform_indices = @transform_8, window_bounds = array<i64: 1, 1>}, {transform_indices = @transform_9, window_bounds = array<i64: 8, 64>}, {transform_indices = @transform_10, window_bounds = array<i64: 8, 64>}]} {
    %c0 = arith.constant 0 : index
    %c0_0 = arith.constant 0 : index
    %0 = vector.load %arg1[%c0, %c0_0] : memref<512x28xf32, #tpu.memory_space<vmem>>, vector<512x28xf32>
    %c0_1 = arith.constant 0 : index
    %c0_2 = arith.constant 0 : index
    %1 = vector.load %arg2[%c0_1, %c0_2] : memref<28x32xf32, #tpu.memory_space<vmem>>, vector<28x32xf32>
    %cst = arith.constant dense<0.000000e+00> : vector<512x32xf32>
    %2 = tpu.matmul %0, %1, %cst {dimension_numbers = #tpu.dot_dimension_numbers<[1], [0], [0], [1], [0, 0, 1, 1], [], []>} : vector<512x28xf32>, vector<28x32xf32>, vector<512x32xf32> -> vector<512x32xf32>
    %c0_3 = arith.constant 0 : index
    %c0_4 = arith.constant 0 : index
    %3 = vector.load %arg3[%c0_3, %c0_4] : memref<1x32xf32, #tpu.memory_space<vmem>>, vector<1x32xf32>
    %4 = vector.broadcast %3 : vector<1x32xf32> to vector<512x32xf32>
    %5 = arith.addf %2, %4 : vector<512x32xf32>
    %cst_5 = arith.constant 0.000000e+00 : f32
    %6 = vector.broadcast %cst_5 : f32 to vector<512x32xf32>
    %7 = arith.maximumf %5, %6 : vector<512x32xf32>
    %c0_6 = arith.constant 0 : index
    %c0_7 = arith.constant 0 : index
    %8 = vector.load %arg4[%c0_6, %c0_7] : memref<32x48xf32, #tpu.memory_space<vmem>>, vector<32x48xf32>
    %cst_8 = arith.constant dense<0.000000e+00> : vector<512x48xf32>
    %9 = tpu.matmul %7, %8, %cst_8 {dimension_numbers = #tpu.dot_dimension_numbers<[1], [0], [0], [1], [0, 0, 1, 1], [], []>} : vector<512x32xf32>, vector<32x48xf32>, vector<512x48xf32> -> vector<512x48xf32>
    %c0_9 = arith.constant 0 : index
    %c0_10 = arith.constant 0 : index
    %10 = vector.load %arg5[%c0_9, %c0_10] : memref<1x48xf32, #tpu.memory_space<vmem>>, vector<1x48xf32>
    %11 = vector.broadcast %10 : vector<1x48xf32> to vector<512x48xf32>
    %12 = arith.addf %9, %11 : vector<512x48xf32>
    %cst_11 = arith.constant 0.000000e+00 : f32
    %13 = vector.broadcast %cst_11 : f32 to vector<512x48xf32>
    %14 = arith.maximumf %12, %13 : vector<512x48xf32>
    %c0_12 = arith.constant 0 : index
    %c0_13 = arith.constant 0 : index
    %15 = vector.load %arg6[%c0_12, %c0_13] : memref<48x64xf32, #tpu.memory_space<vmem>>, vector<48x64xf32>
    %cst_14 = arith.constant dense<0.000000e+00> : vector<512x64xf32>
    %16 = tpu.matmul %14, %15, %cst_14 {dimension_numbers = #tpu.dot_dimension_numbers<[1], [0], [0], [1], [0, 0, 1, 1], [], []>} : vector<512x48xf32>, vector<48x64xf32>, vector<512x64xf32> -> vector<512x64xf32>
    %c0_15 = arith.constant 0 : index
    %c0_16 = arith.constant 0 : index
    %17 = vector.load %arg7[%c0_15, %c0_16] : memref<1x64xf32, #tpu.memory_space<vmem>>, vector<1x64xf32>
    %18 = vector.broadcast %17 : vector<1x64xf32> to vector<512x64xf32>
    %19 = arith.addf %16, %18 : vector<512x64xf32>
    %cst_17 = arith.constant 0.000000e+00 : f32
    %20 = vector.broadcast %cst_17 : f32 to vector<512x64xf32>
    %21 = arith.maximumf %19, %20 : vector<512x64xf32>
    %22 = vector.shape_cast %21 : vector<512x64xf32> to vector<8x64x64xf32>
    %c0_18 = arith.constant 0 : index
    %c0_19 = arith.constant 0 : index
    %23 = vector.load %arg8[%c0_18, %c0_19] : memref<1x64xf32, #tpu.memory_space<vmem>>, vector<1x64xf32>
    %24 = vector.shape_cast %23 : vector<1x64xf32> to vector<1x1x64xf32>
    %25 = vector.broadcast %24 : vector<1x1x64xf32> to vector<8x64x64xf32>
    %26 = arith.mulf %22, %25 : vector<8x64x64xf32>
    %cst_20 = arith.constant dense<0.000000e+00> : vector<8x64xf32>
    %27 = vector.multi_reduction <add>, %26, %cst_20 [2] : vector<8x64x64xf32> to vector<8x64xf32>
    %c0_21 = arith.constant 0 : index
    %c0_22 = arith.constant 0 : index
    %28 = vector.load %arg9[%c0_21, %c0_22] : memref<1x1xf32, #tpu.memory_space<vmem>>, vector<1x1xf32>
    %29 = vector.broadcast %28 : vector<1x1xf32> to vector<8x64xf32>
    %30 = arith.addf %27, %29 : vector<8x64xf32>
    %cst_23 = arith.constant dense<0xFF800000> : vector<8xf32>
    %31 = vector.multi_reduction <maximumf>, %30, %cst_23 [1] : vector<8x64xf32> to vector<8xf32>
    %32 = vector.shape_cast %31 : vector<8xf32> to vector<8x1xf32>
    %33 = vector.broadcast %32 : vector<8x1xf32> to vector<8x64xf32>
    %34 = arith.subf %30, %33 : vector<8x64xf32>
    %35 = math.exp %34 : vector<8x64xf32>
    %cst_24 = arith.constant dense<0.000000e+00> : vector<8xf32>
    %36 = vector.multi_reduction <add>, %35, %cst_24 [1] : vector<8x64xf32> to vector<8xf32>
    %37 = vector.shape_cast %36 : vector<8xf32> to vector<8x1xf32>
    %38 = tpu.reciprocal %37 {approx = true} : vector<8x1xf32> -> vector<8x1xf32>
    %39 = vector.broadcast %38 : vector<8x1xf32> to vector<8x64xf32>
    %40 = arith.mulf %35, %39 : vector<8x64xf32>
    %c0_25 = arith.constant 0 : index
    %c0_26 = arith.constant 0 : index
    %41 = vector.load %arg11[%c0_25, %c0_26] : memref<8x64xf32, #tpu.memory_space<vmem>>, vector<8x64xf32>
    tpu.vector_store %arg11[%c0_25, %c0_26], %40 {strides = array<i32>} : memref<8x64xf32, #tpu.memory_space<vmem>>, vector<8x64xf32>,
    %42 = vector.shape_cast %40 : vector<8x64xf32> to vector<8x64x1xf32>
    %43 = vector.broadcast %42 : vector<8x64x1xf32> to vector<8x64x64xf32>
    %44 = arith.mulf %22, %43 : vector<8x64x64xf32>
    %cst_27 = arith.constant dense<0.000000e+00> : vector<8x64xf32>
    %45 = vector.multi_reduction <add>, %44, %cst_27 [1] : vector<8x64x64xf32> to vector<8x64xf32>
    %c0_28 = arith.constant 0 : index
    %c0_29 = arith.constant 0 : index
    %46 = vector.load %arg10[%c0_28, %c0_29] : memref<8x64xf32, #tpu.memory_space<vmem>>, vector<8x64xf32>
    tpu.vector_store %arg10[%c0_28, %c0_29], %45 {strides = array<i32>} : memref<8x64xf32, #tpu.memory_space<vmem>>, vector<8x64xf32>,
    return
  }
  func.func @transform_0(%arg0: i32) -> (i32, i32) {
    %c0_i32 = arith.constant 0 : i32
    %c0_i32_0 = arith.constant 0 : i32
    return %arg0, %c0_i32 : i32, i32
  }
  func.func @transform_1(%arg0: i32) -> (i32, i32) {
    %c0_i32 = arith.constant 0 : i32
    %c0_i32_0 = arith.constant 0 : i32
    %c0_i32_1 = arith.constant 0 : i32
    return %c0_i32, %c0_i32_0 : i32, i32
  }
  func.func @transform_2(%arg0: i32) -> (i32, i32) {
    %c0_i32 = arith.constant 0 : i32
    %c0_i32_0 = arith.constant 0 : i32
    %c0_i32_1 = arith.constant 0 : i32
    return %c0_i32, %c0_i32_0 : i32, i32
  }
  func.func @transform_3(%arg0: i32) -> (i32, i32) {
    %c0_i32 = arith.constant 0 : i32
    %c0_i32_0 = arith.constant 0 : i32
    %c0_i32_1 = arith.constant 0 : i32
    return %c0_i32, %c0_i32_0 : i32, i32
  }
  func.func @transform_4(%arg0: i32) -> (i32, i32) {
    %c0_i32 = arith.constant 0 : i32
    %c0_i32_0 = arith.constant 0 : i32
    %c0_i32_1 = arith.constant 0 : i32
    return %c0_i32, %c0_i32_0 : i32, i32
  }
  func.func @transform_5(%arg0: i32) -> (i32, i32) {
    %c0_i32 = arith.constant 0 : i32
    %c0_i32_0 = arith.constant 0 : i32
    %c0_i32_1 = arith.constant 0 : i32
    return %c0_i32, %c0_i32_0 : i32, i32
  }
  func.func @transform_6(%arg0: i32) -> (i32, i32) {
    %c0_i32 = arith.constant 0 : i32
    %c0_i32_0 = arith.constant 0 : i32
    %c0_i32_1 = arith.constant 0 : i32
    return %c0_i32, %c0_i32_0 : i32, i32
  }
  func.func @transform_7(%arg0: i32) -> (i32, i32) {
    %c0_i32 = arith.constant 0 : i32
    %c0_i32_0 = arith.constant 0 : i32
    %c0_i32_1 = arith.constant 0 : i32
    return %c0_i32, %c0_i32_0 : i32, i32
  }
  func.func @transform_8(%arg0: i32) -> (i32, i32) {
    %c0_i32 = arith.constant 0 : i32
    %c0_i32_0 = arith.constant 0 : i32
    %c0_i32_1 = arith.constant 0 : i32
    return %c0_i32, %c0_i32_0 : i32, i32
  }
  func.func @transform_9(%arg0: i32) -> (i32, i32) {
    %c0_i32 = arith.constant 0 : i32
    %c0_i32_0 = arith.constant 0 : i32
    return %arg0, %c0_i32 : i32, i32
  }
  func.func @transform_10(%arg0: i32) -> (i32, i32) {
    %c0_i32 = arith.constant 0 : i32
    %c0_i32_0 = arith.constant 0 : i32
    return %arg0, %c0_i32 : i32, i32
  }
}

</mosaic_0001>

<bundles_post_ra>
// kernel: _lambda_.1
= control target key start
LH: loop header
LB: loop body
LE: loop exit
PB: predicated region body
PF: predicated region fallthrough
CT: control target
= control target key end

     0   :  { %s9246_s0 = inlined_call_operand.vmem [shape: f32[1536,28], index: 0, kind: input, shape index: {}]   ;;  %s9247_s1 = inlined_call_operand.vmem [shape: f32[28,32], index: 1, kind: input, shape index: {}]   ;;  %s9248_s2 = inlined_call_operand.vmem [shape: f32[1,32], index: 2, kind: input, shape index: {}]   ;;  %s9249_s3 = inlined_call_operand.vmem [shape: f32[32,48], index: 3, kind: input, shape index: {}]   ;;  %s9250_s4 = inlined_call_operand.vmem [shape: f32[1,48], index: 4, kind: input, shape index: {}]   ;;  %s9251_s5 = inlined_call_operand.vmem [shape: f32[48,64], index: 5, kind: input, shape index: {}]   ;;  %s9252_s6 = inlined_call_operand.vmem [shape: f32[1,64], index: 6, kind: input, shape index: {}]   ;;  %s9253_s7 = inlined_call_operand.vmem [shape: f32[1,64], index: 7, kind: input, shape index: {}]   ;;  %s9254_s8 = inlined_call_operand.<no memory space> [shape: f32[1,1], index: 8, kind: input, shape index: {}]   ;;  %s9255_s9 = inlined_call_operand.hbm [shape: f32[24,64], index: 9, kind: output, shape index: {0}]   ;;  %s9256_s10 = inlined_call_operand.hbm [shape: f32[24,64], index: 10, kind: output, shape index: {1}]  }
   0x1   :  { %v16_v0 = vstv %s9254_s8 }
   0x2   :  { %17 = vst [vmem:[#allocation2] sm:$0x1] %v16_v0 }
   0x3   :  { %18 = vsyncpa [#allocation4], 0 }
   0x4   :  { %20 = vsyncpa [#allocation4 + $0x1], 0 }
   0x5   :  { %21 = vsyncpa [#allocation6], 0 }
   0x6   :  { %23 = vsyncpa [#allocation6 + $0x1], 0  ;;  %s6185_s15 = smov 0   ;;  %s6187_s16 = smov 0  }
   0x7   :  { %s6189_s17 = smov 0   ;;  %s6191_s18 = smov 0  }
   0x8 LB: > { %s6206_s8 = sadd.s32 4294967295, %s6121_s18   ;;  %s5081_s19 = sadd.s32 4294967294, %s6121_s18   ;;  %s6121_s18 = sphi %s6191_s18, %s9903_s18   ;;  %s6117_s17 = sphi %s6189_s17, %s9902_s17   ;;  %s6113_s16 = sphi %s6187_s16, %s9901_s16   ;;  %s6109_s15 = sphi %s6185_s15, %s9900_s15  }
   0x9   : > { %s6210_s20 = sadd.s32 1, %s6121_s18   ;;  %s230_s21 = sadd.s32 1, %s6117_s17 }
   0xa   : > { %s227_s22 = ssub.s32 %s6121_s18, %s6210_s20  ;;  %p240_p0 = scmp.ne.s32.totalorder %s6117_s17, %s6113_s16 }
   0xb   : > { %p228_p1 = scmp.eq.s32.totalorder %s227_s22, 0  ;;  %p241_p2 = scmp.eq.s32.totalorder %s6206_s8, 2 }
   0xc   : > { %p246_p3 = scmp.ne.s32.totalorder %s6113_s16, %s6109_s15  ;;  %p247_p4 = scmp.eq.s32.totalorder %s5081_s19, 2 }
   0xd   : > { %s6221_s23 = scalar_select %p228_p1, %s6117_s17, %s230_s21  }
   0xe   : > { %p6223_p5 = por %p241_p2, %p240_p0  ;;  %p6227_p6 = por %p247_p4, %p246_p3 }
   0xf   : > { %p5084_p7 = scmp.ge.s32.totalorder %s6121_s18, 1  ;;  %p324_p8 = scmp.lt.s32.totalorder %s6121_s18, 4 }
  0x11   : > { %p325_p9 = pnand %p5084_p7, %p324_p8 }
  0x13   : > { %328 = sbr.rel (%p325_p9) target bundleno = 1929 (0x789), region = 56 }
  0x1a   : > { %v437_v1 = vld [vmem:[%s9247_s1] sm:$0xff]  ;;  %v438_v2 = vld [vmem:[%s9247_s1 + $0x8] sm:$0xff]  ;;  %v439_v3 = vld [vmem:[%s9247_s1 + $0x10] sm:$0xff]  ;;  %vm641_vm0 = vcmask 1043456   ;;  %s5087_s12 = sshll.u32 %s6206_s8, 6  ;;  %vm6123_vm1 = vmmov 1  }
  0x1b   : > { %v5815_v4 = vpack.c.bf16 %v438_v2, %v437_v1  ;;  %v440_v5 = vld [vmem:[%s9247_s1 + $0x18] sm:$0xf]  ;;  %p368_p10 = scmp.lt.s32.totalorder %s5087_s12, 191  ;;  %vm6246_vm2 = vmpackc.low %vm641_vm0, %vm6123_vm1  ;;  %v1094_v8 = vld [vmem:[%s9249_s3] sm:$0xff]  ;;  %vm448_vm3 = vcmask 228352   ;;  %vm1105_vm4 = vcmask 261120  }
  0x1c   : > { %v5819_v6 = vpack.c.bf16 %v440_v5, %v439_v3  ;;  %v1095_v9 = vld [vmem:[%s9249_s3 + $0x8] sm:$0xff]  ;;  %v1096_v16 = vld [vmem:[%s9249_s3 + $0x10] sm:$0xff]  ;;  %v1097_v17 = vld [vmem:[%s9249_s3 + $0x18] sm:$0xff]  ;;  %vm1760_vm5 = vcmask 392192   ;;  %vm2473_vm6 = vcmask 523264   ;;  %vm2815_vm7 = vcmask 130112  }
  0x1d   : > { %5816 = vmatprep.subr.bf16.mxu0 %v5815_v4  ;;  %s9905_s12 = smov (!%p368_p10, %s5087_s12), 191  ;;  %5845 = vmatprep.subr.bf16.mxu1 %v5815_v4  ;;  %v5825_v10 = vpack.c.bf16 %v1095_v9, %v1094_v8  ;;  %v5829_v23 = vpack.c.bf16 %v1097_v17, %v1096_v16  ;;  %vm2822_vm8 = vcmask 195712   ;;  %vm2829_vm9 = vcmask 261312   ;;  %s9096_s11 = sand.u32 1, %s6113_s16  }
  0x1e   : > { %5818 = vmatpush3.bf16.msra.mxu0 %v5815_v4  ;;  %5847 = vmatpush3.bf16.msra.mxu1 %v5815_v4  ;;  %s5088_s27 = sshll.u32 %s9905_s12, 3  ;;  %vm2836_vm10 = vcmask 326912   ;;  %vm2843_vm11 = vcmask 392512   ;;  %vm2850_vm12 = vcmask 458112   ;;  %vm2857_vm13 = vcmask 523712   ;;  %s9476_s12 = sshll.u32 %s9096_s11, 3 }
  0x1f   : > { %5821 = vmatprep.subr.msk.bf16.mxu0 %vm6246_vm2, %v5819_v6  ;;  %5846 = vmatprep.subr.msk.bf16.mxu1 %vm6246_vm2, %v5819_v6  ;;  %s6263_s30 = scalar_lea.vmem %s9246_s0, %s5088_s27  ;;  %vm3132_vm14 = vcmask 1041409   ;;  %vm3134_vm15 = vcmask 1042434   ;;  %vm3136_vm0 = vcmask 1043459   ;;  %vm3138_vm1 = vcmask 1044484   ;;  %s9475_s13 = sshll.u32 %s6206_s8, 7 }
  0x20   : > { %v373_v11 = vld [vmem:[%s6263_s30] sm:$0xff]  ;;  %v374_v12 = vld [vmem:[%s6263_s30 + $0x8] sm:$0xff]  ;;  %v375_v13 = vld [vmem:[%s6263_s30 + $0x10] sm:$0xff]  ;;  %s366_s14 = scalar_lea.vmem [#allocation5], %s9476_s12  ;;  %s9159_s26 = scalar_lea.hbm %s9256_s10, %s9475_s13 }
  0x21   : > { %5507 = vmatprep.mubr.msk.f32.mxu0 %vm448_vm3, %v373_v11  ;;  %v376_v14 = vld [vmem:[%s6263_s30 + $0x18] sm:$0xff]  ;;  %v377_v15 = vld [vmem:[%s6263_s30 + $0x20] sm:$0xff]  ;;  %v378_v18 = vld [vmem:[%s6263_s30 + $0x28] sm:$0xff]  ;;  %s4990_s19 = sshll.u32 %s366_s14, 4  ;;  %s4964_s27 = scalar_lea.sflag [#allocation6], %s9096_s11  ;;  %s9161_s19 = int_to_ptr.vmem [resolvable:$true] %s4990_s19 }
  0x22   : > { %5824 = vmatpush3.bf16.msk.msra.mxu0 %vm6246_vm2, %v5819_v6  ;;  %5848 = vmatpush3.bf16.msk.msra.mxu1 %vm6246_vm2, %v5819_v6  ;;  %v379_v19 = vld [vmem:[%s6263_s30 + $0x30] sm:$0xff]  ;;  %v405_v20 = vld [vmem:[%s6263_s30 + $0x100] sm:$0xff]  ;;  %v406_v21 = vld [vmem:[%s6263_s30 + $0x108] sm:$0xff]  ;;  %vm3140_vm2 = vcmask 1045509   ;;  %s6027_s28 = scalar_lea.vmem %s9161_s19, 128  ;;  %s6125_s29 = smov [#allocation5]  }
  0x23   : > { %5826 = vmatprep.subr.bf16.mxu1 %v5825_v10  ;;  %5555 = vmatprep.mubr.msk.f32.mxu1 %vm448_vm3, %v405_v20  ;;  %v407_v22 = vld [vmem:[%s6263_s30 + $0x110] sm:$0xff]  ;;  %v380_v24 = vld [vmem:[%s6263_s30 + $0x38] sm:$0xff]  ;;  %v381_v26 = vld [vmem:[%s6263_s30 + $0x40] sm:$0xff]  ;;  %p6028_p11 = scmp.ne.s32.totalorder %s9161_s19, %s6027_s28 }
  0x24   : > { %v408_v25 = vld [vmem:[%s6263_s30 + $0x118] sm:$0xff]  ;;  %v409_v27 = vld [vmem:[%s6263_s30 + $0x120] sm:$0xff]  ;;  %v382_v28 = vld [vmem:[%s6263_s30 + $0x48] sm:$0xff] }
  0x25   : > { %5508 = vmatmul.mubr.msk.f32.vlgmr.msra.gmra.mrb[0].mxu0 %vm448_vm3, %v374_v12  ;;  %5556 = vmatmul.mubr.msk.f32.vlgmr.msra.gmra.mrb[0].mxu1 %vm448_vm3, %v406_v21  ;;  %v410_v29 = vld [vmem:[%s6263_s30 + $0x128] sm:$0xff]  ;;  %v383_v30 = vld [vmem:[%s6263_s30 + $0x50] sm:$0xff]  ;;  %v384_v32 = vld [vmem:[%s6263_s30 + $0x58] sm:$0xff]  ;;  %p6029_p12 = pnand %p6028_p11, %p6223_p5 }
  0x26   : > { %5510 = vmatprep.mubr.msk.f32.mxu0 %vm448_vm3, %v375_v13  ;;  %5558 = vmatprep.mubr.msk.f32.mxu1 %vm448_vm3, %v407_v22  ;;  %v411_v31 = vld [vmem:[%s6263_s30 + $0x130] sm:$0xff]  ;;  %v412_v33 = vld [vmem:[%s6263_s30 + $0x138] sm:$0xff]  ;;  %v385_v34 = vld [vmem:[%s6263_s30 + $0x60] sm:$0xff] }
  0x27   : > { %5828 = vmatpush3.bf16.msra.mxu1 %v5825_v10  ;;  %v413_v35 = vld [vmem:[%s6263_s30 + $0x140] sm:$0xff]  ;;  %v386_v36 = vld [vmem:[%s6263_s30 + $0x68] sm:$0xff]  ;;  %v387_v38 = vld [vmem:[%s6263_s30 + $0x70] sm:$0xff]  ;;  %p6030_p13 = pneg %p6029_p12 }
  0x28   : > { %5830 = vmatprep.subr.bf16.mxu1 %v5829_v23  ;;  %v414_v37 = vld [vmem:[%s6263_s30 + $0x148] sm:$0xff]  ;;  %v415_v39 = vld [vmem:[%s6263_s30 + $0x150] sm:$0xff]  ;;  %v388_v40 = vld [vmem:[%s6263_s30 + $0x78] sm:$0xff] }
  0x29   : > { %5511 = vmatmul.mubr.msk.f32.gmra.mrb[2].mxu0 %vm448_vm3, %v376_v14  ;;  %5559 = vmatmul.mubr.msk.f32.gmra.mrb[2].mxu1 %vm448_vm3, %v408_v25  ;;  %v416_v41 = vld [vmem:[%s6263_s30 + $0x158] sm:$0xff]  ;;  %v389_v42 = vld [vmem:[%s6263_s30 + $0x80] sm:$0xff]  ;;  %v390_v44 = vld [vmem:[%s6263_s30 + $0x88] sm:$0xff] }
  0x2a   : > { %5513 = vmatprep.mubr.msk.f32.mxu0 %vm448_vm3, %v377_v15  ;;  %5561 = vmatprep.mubr.msk.f32.mxu1 %vm448_vm3, %v409_v27  ;;  %v417_v43 = vld [vmem:[%s6263_s30 + $0x160] sm:$0xff]  ;;  %v418_v45 = vld [vmem:[%s6263_s30 + $0x168] sm:$0xff]  ;;  %v391_v46 = vld [vmem:[%s6263_s30 + $0x90] sm:$0xff] }
  0x2b   : > { %5832 = vmatpush3.bf16.msra.mxu1 %v5829_v23  ;;  %v419_v47 = vld [vmem:[%s6263_s30 + $0x170] sm:$0xff]  ;;  %v392_v48 = vld [vmem:[%s6263_s30 + $0x98] sm:$0xff]  ;;  %v393_v50 = vld [vmem:[%s6263_s30 + $0xa0] sm:$0xff] }
  0x2c   : > { %v420_v49 = vld [vmem:[%s6263_s30 + $0x178] sm:$0xff]  ;;  %v421_v51 = vld [vmem:[%s6263_s30 + $0x180] sm:$0xff]  ;;  %v394_v52 = vld [vmem:[%s6263_s30 + $0xa8] sm:$0xff] }
  0x2d   : > { %5514 = vmatmul.mubr.msk.f32.gmra.mrb[4].mxu0 %vm448_vm3, %v378_v18  ;;  %5562 = vmatmul.mubr.msk.f32.gmra.mrb[4].mxu1 %vm448_vm3, %v410_v29  ;;  %v422_v53 = vld [vmem:[%s6263_s30 + $0x188] sm:$0xff]  ;;  %v395_v54 = vld [vmem:[%s6263_s30 + $0xb0] sm:$0xff]  ;;  %v396_v56 = vld [vmem:[%s6263_s30 + $0xb8] sm:$0xff] }
  0x2e   : > { %5516 = vmatprep.mubr.msk.f32.mxu0 %vm448_vm3, %v379_v19  ;;  %5564 = vmatprep.mubr.msk.f32.mxu1 %vm448_vm3, %v411_v31  ;;  %v423_v55 = vld [vmem:[%s6263_s30 + $0x190] sm:$0xff]  ;;  %v424_v57 = vld [vmem:[%s6263_s30 + $0x198] sm:$0xff]  ;;  %v397_v58 = vld [vmem:[%s6263_s30 + $0xc0] sm:$0xff] }
  0x2f   : > { %v425_v59 = vld [vmem:[%s6263_s30 + $0x1a0] sm:$0xff]  ;;  %v398_v60 = vld [vmem:[%s6263_s30 + $0xc8] sm:$0xff]  ;;  %v399_v62 = vld [vmem:[%s6263_s30 + $0xd0] sm:$0xff] }
  0x30   : > { %v426_v61 = vld [vmem:[%s6263_s30 + $0x1a8] sm:$0xff]  ;;  %v427_v63 = vld [vmem:[%s6263_s30 + $0x1b0] sm:$0xff]  ;;  %v400_v0 = vld [vmem:[%s6263_s30 + $0xd8] sm:$0xff] }
  0x31   : > { %5517 = vmatmul.mubr.msk.f32.gmra.mrb[6].mxu0 %vm448_vm3, %v380_v24  ;;  %5565 = vmatmul.mubr.msk.f32.gmra.mrb[6].mxu1 %vm448_vm3, %v412_v33  ;;  %v428_v1 = vld [vmem:[%s6263_s30 + $0x1b8] sm:$0xff]  ;;  %v401_v2 = vld [vmem:[%s6263_s30 + $0xe0] sm:$0xff]  ;;  %v402_v4 = vld [vmem:[%s6263_s30 + $0xe8] sm:$0xff] }
  0x32   : > { %5519 = vmatprep.mubr.msk.f32.mxu0 %vm448_vm3, %v381_v26  ;;  %5567 = vmatprep.mubr.msk.f32.mxu1 %vm448_vm3, %v413_v35  ;;  %v429_v3 = vld [vmem:[%s6263_s30 + $0x1c0] sm:$0xff]  ;;  %v430_v5 = vld [vmem:[%s6263_s30 + $0x1c8] sm:$0xff]  ;;  %v403_v6 = vld [vmem:[%s6263_s30 + $0xf0] sm:$0xff] }
  0x33   : > { %v431_v7 = vld [vmem:[%s6263_s30 + $0x1d0] sm:$0xff]  ;;  %v404_v8 = vld [vmem:[%s6263_s30 + $0xf8] sm:$0xff]  ;;  %v433_v10 = vld [vmem:[%s6263_s30 + $0x1e0] sm:$0xff] }
  0x34   : > { %v432_v9 = vld [vmem:[%s6263_s30 + $0x1d8] sm:$0xff]  ;;  %v434_v11 = vld [vmem:[%s6263_s30 + $0x1e8] sm:$0xff]  ;;  %v435_v12 = vld [vmem:[%s6263_s30 + $0x1f0] sm:$0xff] }
  0x35   : > { %5520 = vmatmul.mubr.msk.f32.gmra.mrb[8].mxu0 %vm448_vm3, %v382_v28  ;;  %5568 = vmatmul.mubr.msk.f32.gmra.mrb[8].mxu1 %vm448_vm3, %v414_v37  ;;  %v436_v13 = vld [vmem:[%s6263_s30 + $0x1f8] sm:$0xff]  ;;  %v6406_v14 = vld [vmem:[%s9248_s2] ss:$0 sm:$0xff]  ;;  %v1748_v20 = vld [vmem:[%s9251_s5 + $0x8] sm:$0xff]  ;;  %s6031_s30 = sshll.u32 %s6125_s29, 4  ;;  %s6032_s30 = int_to_ptr.vmem [resolvable:$false] %s6031_s30 }
  0x36   : > { %5522 = vmatprep.mubr.msk.f32.mxu0 %vm448_vm3, %v383_v30  ;;  %5570 = vmatprep.mubr.msk.f32.mxu1 %vm448_vm3, %v415_v39  ;;  %v1747_v19 = vld [vmem:[%s9251_s5] sm:$0xff]  ;;  %v1749_v21 = vld [vmem:[%s9251_s5 + $0x10] sm:$0xff]  ;;  %v1750_v25 = vld [vmem:[%s9251_s5 + $0x18] sm:$0xff]  ;;  %s6033_s21 = scalar_lea.vmem %s6032_s30, 256  ;;  %p6034_p0 = scmp.lt.s32.totalorder %s9161_s19, %s6032_s30 }
  0x37   : > { %v5833_v24 = vpack.c.bf16 %v1748_v20, %v1747_v19  ;;  %v5837_v29 = vpack.c.bf16 %v1750_v25, %v1749_v21  ;;  %v1751_v30 = vld [vmem:[%s9251_s5 + $0x20] sm:$0xff]  ;;  %v1752_v31 = vld [vmem:[%s9251_s5 + $0x28] sm:$0xff]  ;;  %p6035_p1 = scmp.lt.s32.totalorder %s6033_s21, %s6027_s28 }
  0x39   : > { %5523 = vmatmul.mubr.msk.f32.gmra.mrb[10].mxu0 %vm448_vm3, %v384_v32  ;;  %5571 = vmatmul.mubr.msk.f32.gmra.mrb[10].mxu1 %vm448_vm3, %v416_v41  ;;  %p6036_p2 = por %p6035_p1, %p6034_p0 }
  0x3a   : > { %5525 = vmatprep.mubr.msk.f32.mxu0 %vm448_vm3, %v385_v34  ;;  %5573 = vmatprep.mubr.msk.f32.mxu1 %vm448_vm3, %v417_v43 }
  0x3b   : > { %5834 = vmatprep.subr.bf16.mxu0 %v5833_v24  ;;  %p6037_p3 = pnand %p6036_p2, %p6030_p13 }
  0x3c   : > { %5836 = vmatpush3.bf16.msra.mxu0 %v5833_v24 }
  0x3d   : > { %5526 = vmatmul.mubr.msk.f32.gmra.mrb[12].mxu0 %vm448_vm3, %v386_v36  ;;  %5574 = vmatmul.mubr.msk.f32.gmra.mrb[12].mxu1 %vm448_vm3, %v418_v45  ;;  %v5841_v36 = vpack.c.bf16 %v1752_v31, %v1751_v30 }
  0x3e   : > { %5528 = vmatprep.mubr.msk.f32.mxu0 %vm448_vm3, %v387_v38  ;;  %5576 = vmatprep.mubr.msk.f32.mxu1 %vm448_vm3, %v419_v47 }
  0x3f   : > { %5838 = vmatprep.subr.bf16.mxu0 %v5837_v29 }
  0x40   : > { %5840 = vmatpush3.bf16.msra.mxu0 %v5837_v29 }
  0x41   : > { %5529 = vmatmul.mubr.msk.f32.gmra.mrb[14].mxu0 %vm448_vm3, %v388_v40  ;;  %5577 = vmatmul.mubr.msk.f32.gmra.mrb[14].mxu1 %vm448_vm3, %v420_v49 }
  0x42   : > { %5531 = vmatprep.mubr.msk.f32.mxu0 %vm448_vm3, %v389_v42  ;;  %5579 = vmatprep.mubr.msk.f32.mxu1 %vm448_vm3, %v421_v51 }
  0x43   : > { %5842 = vmatprep.subr.bf16.mxu0 %v5841_v36 }
  0x44   : > { %5844 = vmatpush3.bf16.msra.mxu0 %v5841_v36 }
  0x45   : > { %5532 = vmatmul.mubr.msk.f32.gmra.mrb[16].mxu0 %vm448_vm3, %v390_v44  ;;  %5580 = vmatmul.mubr.msk.f32.gmra.mrb[16].mxu1 %vm448_vm3, %v422_v53 }
  0x46   : > { %5534 = vmatprep.mubr.msk.f32.mxu0 %vm448_vm3, %v391_v46  ;;  %5582 = vmatprep.mubr.msk.f32.mxu1 %vm448_vm3, %v423_v55 }
  0x49   : > { %5535 = vmatmul.mubr.msk.f32.gmra.mrb[18].mxu0 %vm448_vm3, %v392_v48  ;;  %5583 = vmatmul.mubr.msk.f32.gmra.mrb[18].mxu1 %vm448_vm3, %v424_v57 }
  0x4a   : > { %5537 = vmatprep.mubr.msk.f32.mxu0 %vm448_vm3, %v393_v50  ;;  %5585 = vmatprep.mubr.msk.f32.mxu1 %vm448_vm3, %v425_v59 }
  0x4d   : > { %5538 = vmatmul.mubr.msk.f32.gmra.mrb[20].mxu0 %vm448_vm3, %v394_v52  ;;  %5586 = vmatmul.mubr.msk.f32.gmra.mrb[20].mxu1 %vm448_vm3, %v426_v61 }
  0x4e   : > { %5540 = vmatprep.mubr.msk.f32.mxu0 %vm448_vm3, %v395_v54  ;;  %5588 = vmatprep.mubr.msk.f32.mxu1 %vm448_vm3, %v427_v63 }
  0x51   : > { %5541 = vmatmul.mubr.msk.f32.gmra.mrb[22].mxu0 %vm448_vm3, %v396_v56  ;;  %5589 = vmatmul.mubr.msk.f32.gmra.mrb[22].mxu1 %vm448_vm3, %v428_v1 }
  0x52   : > { %5543 = vmatprep.mubr.msk.f32.mxu0 %vm448_vm3, %v397_v58  ;;  %5591 = vmatprep.mubr.msk.f32.mxu1 %vm448_vm3, %v429_v3 }
  0x55   : > { %5544 = vmatmul.mubr.msk.f32.gmra.mrb[24].mxu0 %vm448_vm3, %v398_v60  ;;  %5592 = vmatmul.mubr.msk.f32.gmra.mrb[24].mxu1 %vm448_vm3, %v430_v5 }
  0x56   : > { %5546 = vmatprep.mubr.msk.f32.mxu0 %vm448_vm3, %v399_v62  ;;  %5594 = vmatprep.mubr.msk.f32.mxu1 %vm448_vm3, %v431_v7 }
  0x59   : > { %5547 = vmatmul.mubr.msk.f32.gmra.mrb[26].mxu0 %vm448_vm3, %v400_v0  ;;  %5595 = vmatmul.mubr.msk.f32.gmra.mrb[26].mxu1 %vm448_vm3, %v432_v9 }
  0x5a   : > { %5549 = vmatprep.mubr.msk.f32.mxu0 %vm448_vm3, %v401_v2  ;;  %5597 = vmatprep.mubr.msk.f32.mxu1 %vm448_vm3, %v433_v10 }
  0x5d   : > { %5550 = vmatmul.mubr.msk.f32.gmra.mrb[28].mxu0 %vm448_vm3, %v402_v4  ;;  %5598 = vmatmul.mubr.msk.f32.gmra.mrb[28].mxu1 %vm448_vm3, %v434_v11 }
  0x5e   : > { %5552 = vmatprep.mubr.msk.f32.mxu0 %vm448_vm3, %v403_v6  ;;  %5600 = vmatprep.mubr.msk.f32.mxu1 %vm448_vm3, %v435_v12 }
  0x61   : > { %5553 = vmatmul.mubr.msk.f32.gmra.mrb[30].mxu0 %vm448_vm3, %v404_v8  ;;  %5601 = vmatmul.mubr.msk.f32.gmra.mrb[30].mxu1 %vm448_vm3, %v436_v13  ;;  %vm3142_vm3 = vcmask 1046534  }
  0xf8   : > { %v5509_v15 = vpop.f32.mrb[0].mxu0  ;;  %v6432_v35 = vpop.f32.mrb[0].mxu1 }
  0xf9   : > { %v717_v16 = vadd.f32 %v5509_v15, %v6406_v14  ;;  %v711_v17 = vpop.f32.mrb[1].mxu0  ;;  %v6435_v40 = vpop.f32.mrb[1].mxu1 }
  0xfa   : > { %v712_v18 = vadd.f32 %v6406_v14, %v711_v17 }
  0xfb   : > { %v1031_v26 = vmax.f32 %v717_v16, 0.0 }
  0xfc   : > { %v1030_v22 = vmax.f32 %v712_v18, 0.0  ;;  %v5512_v23 = vpop.f32.mrb[2].mxu0  ;;  %v6440_v44 = vpop.f32.mrb[2].mxu1 }
  0xfd   : > { %v727_v27 = vadd.f32 %v5512_v23, %v6406_v14  ;;  %v721_v28 = vpop.f32.mrb[3].mxu0  ;;  %v6443_v48 = vpop.f32.mrb[3].mxu1 }
  0xfe   : > { %v722_v32 = vadd.f32 %v6406_v14, %v721_v28  ;;  %5611 = vmatprep.mubr.msk.f32.mxu1 %vm1105_vm4, %v1030_v22 }
  0xff   : > { %5612 = vmatmul.mubr.msk.f32.vlgmr.msra.gmra.mrb[32].mxu1 %vm1105_vm4, %v1031_v26  ;;  %v1033_v37 = vmax.f32 %v727_v27, 0.0 }
 0x100   : > { %v1032_v33 = vmax.f32 %v722_v32, 0.0  ;;  %v5515_v34 = vpop.f32.mrb[4].mxu0  ;;  %v6448_v52 = vpop.f32.mrb[4].mxu1 }
 0x101   : > { %v737_v38 = vadd.f32 %v5515_v34, %v6406_v14  ;;  %v731_v39 = vpop.f32.mrb[5].mxu0  ;;  %v6451_v56 = vpop.f32.mrb[5].mxu1 }
 0x102   : > { %v732_v41 = vadd.f32 %v6406_v14, %v731_v39  ;;  %5614 = vmatprep.mubr.msk.f32.mxu1 %vm1105_vm4, %v1032_v33 }
 0x103   : > { %5615 = vmatmul.mubr.msk.f32.gmra.mrb[34].mxu1 %vm1105_vm4, %v1033_v37  ;;  %v1035_v45 = vmax.f32 %v737_v38, 0.0 }
 0x104   : > { %v1034_v42 = vmax.f32 %v732_v41, 0.0  ;;  %v5518_v43 = vpop.f32.mrb[6].mxu0  ;;  %v6456_v60 = vpop.f32.mrb[6].mxu1 }
 0x105   : > { %v747_v46 = vadd.f32 %v5518_v43, %v6406_v14  ;;  %v741_v47 = vpop.f32.mrb[7].mxu0  ;;  %v6459_v0 = vpop.f32.mrb[7].mxu1 }
 0x106   : > { %v742_v49 = vadd.f32 %v6406_v14, %v741_v47  ;;  %5617 = vmatprep.mubr.msk.f32.mxu1 %vm1105_vm4, %v1034_v42 }
 0x107   : > { %5618 = vmatmul.mubr.msk.f32.gmra.mrb[36].mxu1 %vm1105_vm4, %v1035_v45  ;;  %v1037_v53 = vmax.f32 %v747_v46, 0.0 }
 0x108   : > { %v1036_v50 = vmax.f32 %v742_v49, 0.0  ;;  %v5521_v51 = vpop.f32.mrb[8].mxu0  ;;  %v6464_v4 = vpop.f32.mrb[8].mxu1 }
 0x109   : > { %v757_v54 = vadd.f32 %v5521_v51, %v6406_v14  ;;  %v751_v55 = vpop.f32.mrb[9].mxu0  ;;  %v6467_v8 = vpop.f32.mrb[9].mxu1 }
 0x10a   : > { %v752_v57 = vadd.f32 %v6406_v14, %v751_v55  ;;  %5620 = vmatprep.mubr.msk.f32.mxu1 %vm1105_vm4, %v1036_v50 }
 0x10b   : > { %5621 = vmatmul.mubr.msk.f32.gmra.mrb[38].mxu1 %vm1105_vm4, %v1037_v53  ;;  %v1039_v61 = vmax.f32 %v757_v54, 0.0 }
 0x10c   : > { %v1038_v58 = vmax.f32 %v752_v57, 0.0  ;;  %v5524_v59 = vpop.f32.mrb[10].mxu0  ;;  %v6472_v12 = vpop.f32.mrb[10].mxu1 }
 0x10d   : > { %v767_v62 = vadd.f32 %v5524_v59, %v6406_v14  ;;  %v761_v63 = vpop.f32.mrb[11].mxu0  ;;  %v6475_v17 = vpop.f32.mrb[11].mxu1 }
 0x10e   : > { %v762_v1 = vadd.f32 %v6406_v14, %v761_v63  ;;  %5623 = vmatprep.mubr.msk.f32.mxu1 %vm1105_vm4, %v1038_v58 }
 0x10f   : > { %5624 = vmatmul.mubr.msk.f32.gmra.mrb[40].mxu1 %vm1105_vm4, %v1039_v61  ;;  %v1041_v5 = vmax.f32 %v767_v62, 0.0 }
 0x110   : > { %v1040_v2 = vmax.f32 %v762_v1, 0.0  ;;  %v5527_v3 = vpop.f32.mrb[12].mxu0  ;;  %v6480_v21 = vpop.f32.mrb[12].mxu1 }
 0x111   : > { %v777_v6 = vadd.f32 %v5527_v3, %v6406_v14  ;;  %v771_v7 = vpop.f32.mrb[13].mxu0  ;;  %v6483_v25 = vpop.f32.mrb[13].mxu1 }
 0x112   : > { %v772_v9 = vadd.f32 %v6406_v14, %v771_v7  ;;  %5626 = vmatprep.mubr.msk.f32.mxu1 %vm1105_vm4, %v1040_v2 }
 0x113   : > { %5627 = vmatmul.mubr.msk.f32.gmra.mrb[42].mxu1 %vm1105_vm4, %v1041_v5  ;;  %v1043_v13 = vmax.f32 %v777_v6, 0.0 }
 0x114   : > { %v1042_v10 = vmax.f32 %v772_v9, 0.0  ;;  %v5530_v11 = vpop.f32.mrb[14].mxu0  ;;  %v6488_v29 = vpop.f32.mrb[14].mxu1 }
 0x115   : > { %v787_v15 = vadd.f32 %v5530_v11, %v6406_v14  ;;  %v781_v16 = vpop.f32.mrb[15].mxu0  ;;  %v6491_v33 = vpop.f32.mrb[15].mxu1 }
 0x116   : > { %v782_v18 = vadd.f32 %v6406_v14, %v781_v16  ;;  %5629 = vmatprep.mubr.msk.f32.mxu1 %vm1105_vm4, %v1042_v10 }
 0x117   : > { %5630 = vmatmul.mubr.msk.f32.gmra.mrb[44].mxu1 %vm1105_vm4, %v1043_v13  ;;  %v1045_v22 = vmax.f32 %v787_v15, 0.0 }
 0x118   : > { %v1044_v19 = vmax.f32 %v782_v18, 0.0  ;;  %v5533_v20 = vpop.f32.mrb[16].mxu0  ;;  %v6496_v38 = vpop.f32.mrb[16].mxu1 }
 0x119   : > { %v797_v23 = vadd.f32 %v5533_v20, %v6406_v14  ;;  %v791_v24 = vpop.f32.mrb[17].mxu0  ;;  %v6499_v43 = vpop.f32.mrb[17].mxu1 }
 0x11a   : > { %v792_v26 = vadd.f32 %v6406_v14, %v791_v24  ;;  %5632 = vmatprep.mubr.msk.f32.mxu1 %vm1105_vm4, %v1044_v19 }
 0x11b   : > { %5633 = vmatmul.mubr.msk.f32.gmra.mrb[46].mxu1 %vm1105_vm4, %v1045_v22  ;;  %v1047_v30 = vmax.f32 %v797_v23, 0.0 }
 0x11c   : > { %v1046_v27 = vmax.f32 %v792_v26, 0.0  ;;  %v5536_v28 = vpop.f32.mrb[18].mxu0  ;;  %v6504_v49 = vpop.f32.mrb[18].mxu1 }
 0x11d   : > { %v807_v31 = vadd.f32 %v5536_v28, %v6406_v14  ;;  %v801_v32 = vpop.f32.mrb[19].mxu0  ;;  %v6507_v54 = vpop.f32.mrb[19].mxu1  ;;  %v872_v28 = vadd.f32 %v6406_v14, %v6435_v40 }
 0x11e   : > { %v802_v34 = vadd.f32 %v6406_v14, %v801_v32  ;;  %5635 = vmatprep.mubr.msk.f32.mxu1 %vm1105_vm4, %v1046_v27 }
 0x11f   : > { %5636 = vmatmul.mubr.msk.f32.gmra.mrb[48].mxu1 %vm1105_vm4, %v1047_v30  ;;  %v1049_v39 = vmax.f32 %v807_v31, 0.0 }
 0x120   : > { %v1048_v36 = vmax.f32 %v802_v34, 0.0  ;;  %v5539_v37 = vpop.f32.mrb[20].mxu0  ;;  %v6512_v59 = vpop.f32.mrb[20].mxu1 }
 0x121   : > { %v817_v41 = vadd.f32 %v5539_v37, %v6406_v14  ;;  %v811_v42 = vpop.f32.mrb[21].mxu0  ;;  %v6515_v1 = vpop.f32.mrb[21].mxu1 }
 0x122   : > { %v812_v45 = vadd.f32 %v6406_v14, %v811_v42  ;;  %5638 = vmatprep.mubr.msk.f32.mxu1 %vm1105_vm4, %v1048_v36  ;;  %v882_v42 = vadd.f32 %v6406_v14, %v6443_v48 }
 0x123   : > { %5639 = vmatmul.mubr.msk.f32.gmra.mrb[50].mxu1 %vm1105_vm4, %v1049_v39  ;;  %v1051_v50 = vmax.f32 %v817_v41, 0.0  ;;  %v1062_v41 = vmax.f32 %v872_v28, 0.0 }
 0x124   : > { %v1050_v46 = vmax.f32 %v812_v45, 0.0  ;;  %v5542_v47 = vpop.f32.mrb[22].mxu0  ;;  %v6520_v6 = vpop.f32.mrb[22].mxu1 }
 0x125   : > { %v827_v51 = vadd.f32 %v5542_v47, %v6406_v14  ;;  %v821_v53 = vpop.f32.mrb[23].mxu0  ;;  %v6523_v11 = vpop.f32.mrb[23].mxu1 }
 0x126   : > { %v822_v55 = vadd.f32 %v6406_v14, %v821_v53  ;;  %5641 = vmatprep.mubr.msk.f32.mxu1 %vm1105_vm4, %v1050_v46  ;;  %v877_v46 = vadd.f32 %v6432_v35, %v6406_v14 }
 0x127   : > { %5642 = vmatmul.mubr.msk.f32.gmra.mrb[52].mxu1 %vm1105_vm4, %v1051_v50  ;;  %v1053_v61 = vmax.f32 %v827_v51, 0.0  ;;  %v1064_v50 = vmax.f32 %v882_v42, 0.0  ;;  %v892_v51 = vadd.f32 %v6406_v14, %v6451_v56  ;;  %v897_v56 = vadd.f32 %v6448_v52, %v6406_v14 }
 0x128   : > { %v1052_v57 = vmax.f32 %v822_v55, 0.0  ;;  %v5545_v58 = vpop.f32.mrb[24].mxu0  ;;  %v6528_v18 = vpop.f32.mrb[24].mxu1  ;;  %v1063_v48 = vmax.f32 %v877_v46, 0.0  ;;  %v887_v55 = vadd.f32 %v6440_v44, %v6406_v14  ;;  %v912_v44 = vadd.f32 %v6406_v14, %v6467_v8 }
 0x129   : > { %v837_v62 = vadd.f32 %v5545_v58, %v6406_v14  ;;  %v831_v63 = vpop.f32.mrb[25].mxu0  ;;  %v6531_v23 = vpop.f32.mrb[25].mxu1  ;;  %v1066_v35 = vmax.f32 %v892_v51, 0.0  ;;  %v902_v58 = vadd.f32 %v6406_v14, %v6459_v0  ;;  %v922_v52 = vadd.f32 %v6406_v14, %v6475_v17 }
 0x12a   : > { %v832_v2 = vadd.f32 %v6406_v14, %v831_v63  ;;  %5644 = vmatprep.mubr.msk.f32.mxu1 %vm1105_vm4, %v1052_v57  ;;  %v1067_v63 = vmax.f32 %v897_v56, 0.0 }
 0x12b   : > { %5645 = vmatmul.mubr.msk.f32.gmra.mrb[54].mxu1 %vm1105_vm4, %v1053_v61  ;;  %v1055_v7 = vmax.f32 %v837_v62, 0.0  ;;  %v1065_v61 = vmax.f32 %v887_v55, 0.0  ;;  %v1068_v62 = vmax.f32 %v902_v58, 0.0 }
 0x12c   : > { %v1054_v3 = vmax.f32 %v832_v2, 0.0  ;;  %v5548_v5 = vpop.f32.mrb[26].mxu0  ;;  %v6538_v30 = vpop.f32.mrb[26].mxu1  ;;  %v907_v2 = vadd.f32 %v6456_v60, %v6406_v14  ;;  %v932_v60 = vadd.f32 %v6406_v14, %v6483_v25 }
 0x12d   : > { %v847_v9 = vadd.f32 %v5548_v5, %v6406_v14  ;;  %v841_v10 = vpop.f32.mrb[27].mxu0  ;;  %v6541_v36 = vpop.f32.mrb[27].mxu1  ;;  %v917_v5 = vadd.f32 %v6464_v4, %v6406_v14  ;;  %v942_v4 = vadd.f32 %v6406_v14, %v6491_v33 }
 0x12e   : > { %v842_v13 = vadd.f32 %v6406_v14, %v841_v10  ;;  %5647 = vmatprep.mubr.msk.f32.mxu1 %vm1105_vm4, %v1054_v3  ;;  %v1070_v3 = vmax.f32 %v912_v44, 0.0  ;;  %v1069_v0 = vmax.f32 %v907_v2, 0.0  ;;  %v1074_v10 = vmax.f32 %v932_v60, 0.0 }
 0x12f   : > { %5648 = vmatmul.mubr.msk.f32.gmra.mrb[56].mxu1 %vm1105_vm4, %v1055_v7  ;;  %v1057_v19 = vmax.f32 %v847_v9, 0.0  ;;  %v1072_v7 = vmax.f32 %v922_v52, 0.0  ;;  %v1071_v8 = vmax.f32 %v917_v5, 0.0  ;;  %v927_v9 = vadd.f32 %v6472_v12, %v6406_v14 }
 0x130   : > { %v1056_v15 = vmax.f32 %v842_v13, 0.0  ;;  %v5551_v16 = vpop.f32.mrb[28].mxu0  ;;  %v6548_v40 = vpop.f32.mrb[28].mxu1  ;;  %v937_v13 = vadd.f32 %v6480_v21, %v6406_v14  ;;  %v952_v12 = vadd.f32 %v6406_v14, %v6499_v43  ;;  %v962_v21 = vadd.f32 %v6406_v14, %v6507_v54 }
 0x131   : > { %v857_v20 = vadd.f32 %v5551_v16, %v6406_v14  ;;  %v851_v22 = vpop.f32.mrb[29].mxu0  ;;  %v6552_v47 = vpop.f32.mrb[29].mxu1  ;;  %v1073_v17 = vmax.f32 %v927_v9, 0.0  ;;  %v947_v16 = vadd.f32 %v6488_v29, %v6406_v14  ;;  %v972_v29 = vadd.f32 %v6406_v14, %v6515_v1 }
 0x132   : > { %v852_v24 = vadd.f32 %v6406_v14, %v851_v22  ;;  %5650 = vmatprep.mubr.msk.f32.mxu1 %vm1105_vm4, %v1056_v15  ;;  %v1076_v15 = vmax.f32 %v942_v4, 0.0  ;;  %v1075_v25 = vmax.f32 %v937_v13, 0.0  ;;  %v1080_v22 = vmax.f32 %v962_v21, 0.0 }
 0x133   : > { %5651 = vmatmul.mubr.msk.f32.gmra.mrb[58].mxu1 %vm1105_vm4, %v1057_v19  ;;  %v1059_v31 = vmax.f32 %v857_v20, 0.0  ;;  %v1078_v19 = vmax.f32 %v952_v12, 0.0  ;;  %v1077_v33 = vmax.f32 %v947_v16, 0.0  ;;  %v957_v20 = vadd.f32 %v6496_v38, %v6406_v14 }
 0x134   : > { %v1058_v26 = vmax.f32 %v852_v24, 0.0  ;;  %v5554_v27 = vpop.f32.mrb[30].mxu0  ;;  %v6559_v53 = vpop.f32.mrb[30].mxu1  ;;  %v967_v24 = vadd.f32 %v6504_v49, %v6406_v14  ;;  %v982_v38 = vadd.f32 %v6406_v14, %v6523_v11  ;;  %v992_v49 = vadd.f32 %v6406_v14, %v6531_v23 }
 0x135   : > { %v867_v32 = vadd.f32 %v5554_v27, %v6406_v14  ;;  %v861_v34 = vpop.f32.mrb[31].mxu0  ;;  %v6563_v57 = vpop.f32.mrb[31].mxu1  ;;  %v1079_v43 = vmax.f32 %v957_v20, 0.0  ;;  %v977_v27 = vadd.f32 %v6512_v59, %v6406_v14  ;;  %v1002_v59 = vadd.f32 %v6406_v14, %v6541_v36 }
 0x136   : > { %v862_v37 = vadd.f32 %v6406_v14, %v861_v34  ;;  %5653 = vmatprep.mubr.msk.f32.mxu1 %vm1105_vm4, %v1058_v26  ;;  %v1082_v26 = vmax.f32 %v972_v29, 0.0  ;;  %v1081_v54 = vmax.f32 %v967_v24, 0.0  ;;  %v1084_v28 = vmax.f32 %v982_v38, 0.0 }
 0x137   : > { %5654 = vmatmul.mubr.msk.f32.gmra.mrb[60].mxu1 %vm1105_vm4, %v1059_v31  ;;  %v1061_v45 = vmax.f32 %v867_v32, 0.0  ;;  %v1083_v1 = vmax.f32 %v977_v27, 0.0  ;;  %v987_v31 = vadd.f32 %v6520_v6, %v6406_v14  ;;  %v1086_v32 = vmax.f32 %v992_v49, 0.0 }
 0x138   : > { %v1060_v39 = vmax.f32 %v862_v37, 0.0  ;;  %v997_v34 = vadd.f32 %v6528_v18, %v6406_v14  ;;  %v1088_v37 = vmax.f32 %v1002_v59, 0.0  ;;  %v1012_v6 = vadd.f32 %v6406_v14, %v6552_v47 }
 0x139   : > { %v1085_v11 = vmax.f32 %v987_v31, 0.0  ;;  %v1022_v18 = vadd.f32 %v6406_v14, %v6563_v57  ;;  %v1017_v42 = vadd.f32 %v6548_v40, %v6406_v14  ;;  %v6653_v40 = vld [vmem:[%s9250_s4] ss:$0 sm:$0xff] }
 0x13a   : > { %5656 = vmatprep.mubr.msk.f32.mxu1 %vm1105_vm4, %v1060_v39  ;;  %v1087_v23 = vmax.f32 %v997_v34, 0.0  ;;  %v1007_v39 = vadd.f32 %v6538_v30, %v6406_v14  ;;  %v1027_v30 = vadd.f32 %v6559_v53, %v6406_v14 }
 0x13b   : > { %5657 = vmatmul.mubr.msk.f32.gmra.mrb[62].mxu1 %vm1105_vm4, %v1061_v45  ;;  %v1092_v45 = vmax.f32 %v1022_v18, 0.0  ;;  %v1091_v46 = vmax.f32 %v1017_v42, 0.0 }
 0x13c   : > { %5659 = vmatprep.mubr.msk.f32.mxu1 %vm1105_vm4, %v1062_v41  ;;  %v1090_v41 = vmax.f32 %v1012_v6, 0.0  ;;  %v1089_v36 = vmax.f32 %v1007_v39, 0.0  ;;  %v1093_v47 = vmax.f32 %v1027_v30, 0.0 }
 0x13f   : > { %5660 = vmatmul.mubr.msk.f32.gmra.mrb[64].mxu1 %vm1105_vm4, %v1063_v48 }
 0x140   : > { %5662 = vmatprep.mubr.msk.f32.mxu1 %vm1105_vm4, %v1064_v50 }
 0x143   : > { %5663 = vmatmul.mubr.msk.f32.gmra.mrb[66].mxu1 %vm1105_vm4, %v1065_v61 }
 0x144   : > { %5665 = vmatprep.mubr.msk.f32.mxu1 %vm1105_vm4, %v1066_v35 }
 0x147   : > { %5666 = vmatmul.mubr.msk.f32.gmra.mrb[68].mxu1 %vm1105_vm4, %v1067_v63 }
 0x148   : > { %5668 = vmatprep.mubr.msk.f32.mxu1 %vm1105_vm4, %v1068_v62 }
 0x14b   : > { %5669 = vmatmul.mubr.msk.f32.gmra.mrb[70].mxu1 %vm1105_vm4, %v1069_v0 }
 0x14c   : > { %5671 = vmatprep.mubr.msk.f32.mxu1 %vm1105_vm4, %v1070_v3 }
 0x14f   : > { %5672 = vmatmul.mubr.msk.f32.gmra.mrb[72].mxu1 %vm1105_vm4, %v1071_v8 }
 0x150   : > { %5674 = vmatprep.mubr.msk.f32.mxu1 %vm1105_vm4, %v1072_v7 }
 0x153   : > { %5675 = vmatmul.mubr.msk.f32.gmra.mrb[74].mxu1 %vm1105_vm4, %v1073_v17 }
 0x154   : > { %5677 = vmatprep.mubr.msk.f32.mxu1 %vm1105_vm4, %v1074_v10 }
 0x157   : > { %5678 = vmatmul.mubr.msk.f32.gmra.mrb[76].mxu1 %vm1105_vm4, %v1075_v25 }
 0x158   : > { %5680 = vmatprep.mubr.msk.f32.mxu1 %vm1105_vm4, %v1076_v15 }
 0x15b   : > { %5681 = vmatmul.mubr.msk.f32.gmra.mrb[78].mxu1 %vm1105_vm4, %v1077_v33 }
 0x15c   : > { %5683 = vmatprep.mubr.msk.f32.mxu1 %vm1105_vm4, %v1078_v19 }
 0x15f   : > { %5684 = vmatmul.mubr.msk.f32.gmra.mrb[80].mxu1 %vm1105_vm4, %v1079_v43 }
 0x160   : > { %5686 = vmatprep.mubr.msk.f32.mxu1 %vm1105_vm4, %v1080_v22 }
 0x163   : > { %5687 = vmatmul.mubr.msk.f32.gmra.mrb[82].mxu1 %vm1105_vm4, %v1081_v54 }
 0x164   : > { %5689 = vmatprep.mubr.msk.f32.mxu1 %vm1105_vm4, %v1082_v26 }
 0x167   : > { %5690 = vmatmul.mubr.msk.f32.gmra.mrb[84].mxu1 %vm1105_vm4, %v1083_v1 }
 0x168   : > { %5692 = vmatprep.mubr.msk.f32.mxu1 %vm1105_vm4, %v1084_v28 }
 0x16b   : > { %5693 = vmatmul.mubr.msk.f32.gmra.mrb[86].mxu1 %vm1105_vm4, %v1085_v11 }
 0x16c   : > { %5695 = vmatprep.mubr.msk.f32.mxu1 %vm1105_vm4, %v1086_v32 }
 0x16f   : > { %5696 = vmatmul.mubr.msk.f32.gmra.mrb[88].mxu1 %vm1105_vm4, %v1087_v23 }
 0x170   : > { %5698 = vmatprep.mubr.msk.f32.mxu1 %vm1105_vm4, %v1088_v37 }
 0x173   : > { %5699 = vmatmul.mubr.msk.f32.gmra.mrb[90].mxu1 %vm1105_vm4, %v1089_v36 }
 0x174   : > { %5701 = vmatprep.mubr.msk.f32.mxu1 %vm1105_vm4, %v1090_v41 }
 0x177   : > { %5702 = vmatmul.mubr.msk.f32.gmra.mrb[92].mxu1 %vm1105_vm4, %v1091_v46 }
 0x178   : > { %5704 = vmatprep.mubr.msk.f32.mxu1 %vm1105_vm4, %v1092_v45 }
 0x17b   : > { %5705 = vmatmul.mubr.msk.f32.gmra.mrb[94].mxu1 %vm1105_vm4, %v1093_v47  ;;  %vm3144_vm4 = vcmask 1047559  }
 0x1d2   : > { %v5613_v50 = vpop.f32.mrb[32].mxu1 }
 0x1d3   : > { %v1370_v51 = vadd.f32 %v5613_v50, %v6653_v40  ;;  %v1364_v48 = vpop.f32.mrb[33].mxu1 }
 0x1d4   : > { %v1365_v55 = vadd.f32 %v6653_v40, %v1364_v48 }
 0x1d5   : > { %v1684_v57 = vmax.f32 %v1370_v51, 0.0 }
 0x1d6   : > { %v1683_v14 = vmax.f32 %v1365_v55, 0.0  ;;  %v5616_v53 = vpop.f32.mrb[34].mxu1 }
 0x1d7   : > { %v1380_v35 = vadd.f32 %v5616_v53, %v6653_v40  ;;  %v1374_v58 = vpop.f32.mrb[35].mxu1 }
 0x1d8   : > { %v1375_v61 = vadd.f32 %v6653_v40, %v1374_v58  ;;  %5719 = vmatprep.mubr.msk.f32.mxu0 %vm1760_vm5, %v1683_v14 }
 0x1d9   : > { %5720 = vmatmul.mubr.msk.f32.vlgmr.msra.gmra.mrb[32].mxu0 %vm1760_vm5, %v1684_v57  ;;  %v1686_v44 = vmax.f32 %v1380_v35, 0.0 }
 0x1da   : > { %v1685_v56 = vmax.f32 %v1375_v61, 0.0  ;;  %v5619_v62 = vpop.f32.mrb[36].mxu1 }
 0x1db   : > { %v1390_v63 = vadd.f32 %v5619_v62, %v6653_v40  ;;  %v1384_v2 = vpop.f32.mrb[37].mxu1 }
 0x1dc   : > { %v1385_v3 = vadd.f32 %v6653_v40, %v1384_v2  ;;  %5722 = vmatprep.mubr.msk.f32.mxu0 %vm1760_vm5, %v1685_v56 }
 0x1dd   : > { %5723 = vmatmul.mubr.msk.f32.gmra.mrb[34].mxu0 %vm1760_vm5, %v1686_v44  ;;  %v1688_v5 = vmax.f32 %v1390_v63, 0.0 }
 0x1de   : > { %v1687_v52 = vmax.f32 %v1385_v3, 0.0  ;;  %v5622_v0 = vpop.f32.mrb[38].mxu1 }
 0x1df   : > { %v1400_v7 = vadd.f32 %v5622_v0, %v6653_v40  ;;  %v1394_v60 = vpop.f32.mrb[39].mxu1 }
 0x1e0   : > { %v1395_v8 = vadd.f32 %v6653_v40, %v1394_v60  ;;  %5725 = vmatprep.mubr.msk.f32.mxu0 %vm1760_vm5, %v1687_v52 }
 0x1e1   : > { %5726 = vmatmul.mubr.msk.f32.gmra.mrb[36].mxu0 %vm1760_vm5, %v1688_v5  ;;  %v1690_v4 = vmax.f32 %v1400_v7, 0.0 }
 0x1e2   : > { %v1689_v9 = vmax.f32 %v1395_v8, 0.0  ;;  %v5625_v10 = vpop.f32.mrb[40].mxu1 }
 0x1e3   : > { %v1410_v17 = vadd.f32 %v5625_v10, %v6653_v40  ;;  %v1404_v13 = vpop.f32.mrb[41].mxu1 }
 0x1e4   : > { %v1405_v15 = vadd.f32 %v6653_v40, %v1404_v13  ;;  %5728 = vmatprep.mubr.msk.f32.mxu0 %vm1760_vm5, %v1689_v9 }
 0x1e5   : > { %5729 = vmatmul.mubr.msk.f32.gmra.mrb[38].mxu0 %vm1760_vm5, %v1690_v4  ;;  %v1692_v16 = vmax.f32 %v1410_v17, 0.0 }
 0x1e6   : > { %v1691_v12 = vmax.f32 %v1405_v15, 0.0  ;;  %v5628_v25 = vpop.f32.mrb[42].mxu1 }
 0x1e7   : > { %v1420_v19 = vadd.f32 %v5628_v25, %v6653_v40  ;;  %v1414_v21 = vpop.f32.mrb[43].mxu1 }
 0x1e8   : > { %v1415_v33 = vadd.f32 %v6653_v40, %v1414_v21  ;;  %5731 = vmatprep.mubr.msk.f32.mxu0 %vm1760_vm5, %v1691_v12 }
 0x1e9   : > { %5732 = vmatmul.mubr.msk.f32.gmra.mrb[40].mxu0 %vm1760_vm5, %v1692_v16  ;;  %v1694_v29 = vmax.f32 %v1420_v19, 0.0 }
 0x1ea   : > { %v1693_v20 = vmax.f32 %v1415_v33, 0.0  ;;  %v5631_v22 = vpop.f32.mrb[44].mxu1 }
 0x1eb   : > { %v1430_v43 = vadd.f32 %v5631_v22, %v6653_v40  ;;  %v1424_v24 = vpop.f32.mrb[45].mxu1 }
 0x1ec   : > { %v1425_v26 = vadd.f32 %v6653_v40, %v1424_v24  ;;  %5734 = vmatprep.mubr.msk.f32.mxu0 %vm1760_vm5, %v1693_v20 }
 0x1ed   : > { %5735 = vmatmul.mubr.msk.f32.gmra.mrb[42].mxu0 %vm1760_vm5, %v1694_v29  ;;  %v1696_v27 = vmax.f32 %v1430_v43, 0.0 }
 0x1ee   : > { %v1695_v38 = vmax.f32 %v1425_v26, 0.0  ;;  %v5634_v54 = vpop.f32.mrb[46].mxu1 }
 0x1ef   : > { %v1440_v28 = vadd.f32 %v5634_v54, %v6653_v40  ;;  %v1434_v49 = vpop.f32.mrb[47].mxu1 }
 0x1f0   : > { %v1435_v1 = vadd.f32 %v6653_v40, %v1434_v49  ;;  %5737 = vmatprep.mubr.msk.f32.mxu0 %vm1760_vm5, %v1695_v38 }
 0x1f1   : > { %5738 = vmatmul.mubr.msk.f32.gmra.mrb[44].mxu0 %vm1760_vm5, %v1696_v27  ;;  %v1698_v59 = vmax.f32 %v1440_v28, 0.0 }
 0x1f2   : > { %v1697_v31 = vmax.f32 %v1435_v1, 0.0  ;;  %v5637_v32 = vpop.f32.mrb[48].mxu1 }
 0x1f3   : > { %v1450_v11 = vadd.f32 %v5637_v32, %v6653_v40  ;;  %v1444_v34 = vpop.f32.mrb[49].mxu1 }
 0x1f4   : > { %v1445_v37 = vadd.f32 %v6653_v40, %v1444_v34  ;;  %5740 = vmatprep.mubr.msk.f32.mxu0 %vm1760_vm5, %v1697_v31 }
 0x1f5   : > { %5741 = vmatmul.mubr.msk.f32.gmra.mrb[46].mxu0 %vm1760_vm5, %v1698_v59  ;;  %v1700_v39 = vmax.f32 %v1450_v11, 0.0 }
 0x1f6   : > { %v1699_v6 = vmax.f32 %v1445_v37, 0.0  ;;  %v5640_v23 = vpop.f32.mrb[50].mxu1 }
 0x1f7   : > { %v1460_v41 = vadd.f32 %v5640_v23, %v6653_v40  ;;  %v1454_v18 = vpop.f32.mrb[51].mxu1 }
 0x1f8   : > { %v1455_v36 = vadd.f32 %v6653_v40, %v1454_v18  ;;  %5743 = vmatprep.mubr.msk.f32.mxu0 %vm1760_vm5, %v1699_v6 }
 0x1f9   : > { %5744 = vmatmul.mubr.msk.f32.gmra.mrb[48].mxu0 %vm1760_vm5, %v1700_v39  ;;  %v1702_v46 = vmax.f32 %v1460_v41, 0.0 }
 0x1fa   : > { %v1701_v42 = vmax.f32 %v1455_v36, 0.0  ;;  %v5643_v45 = vpop.f32.mrb[52].mxu1 }
 0x1fb   : > { %v1470_v30 = vadd.f32 %v5643_v45, %v6653_v40  ;;  %v1464_v47 = vpop.f32.mrb[53].mxu1 }
 0x1fc   : > { %v1465_v50 = vadd.f32 %v6653_v40, %v1464_v47  ;;  %5746 = vmatprep.mubr.msk.f32.mxu0 %vm1760_vm5, %v1701_v42 }
 0x1fd   : > { %5747 = vmatmul.mubr.msk.f32.gmra.mrb[50].mxu0 %vm1760_vm5, %v1702_v46  ;;  %v1704_v55 = vmax.f32 %v1470_v30, 0.0 }
 0x1fe   : > { %v1703_v51 = vmax.f32 %v1465_v50, 0.0  ;;  %v5646_v48 = vpop.f32.mrb[54].mxu1 }
 0x1ff   : > { %v1480_v14 = vadd.f32 %v5646_v48, %v6653_v40  ;;  %v1474_v53 = vpop.f32.mrb[55].mxu1 }
 0x200   : > { %v1475_v57 = vadd.f32 %v6653_v40, %v1474_v53  ;;  %5749 = vmatprep.mubr.msk.f32.mxu0 %vm1760_vm5, %v1703_v51 }
 0x201   : > { %5750 = vmatmul.mubr.msk.f32.gmra.mrb[52].mxu0 %vm1760_vm5, %v1704_v55  ;;  %v1706_v61 = vmax.f32 %v1480_v14, 0.0 }
 0x202   : > { %v1705_v35 = vmax.f32 %v1475_v57, 0.0  ;;  %v5649_v58 = vpop.f32.mrb[56].mxu1 }
 0x203   : > { %v1490_v56 = vadd.f32 %v5649_v58, %v6653_v40  ;;  %v1484_v62 = vpop.f32.mrb[57].mxu1 }
 0x204   : > { %v1485_v44 = vadd.f32 %v6653_v40, %v1484_v62  ;;  %5752 = vmatprep.mubr.msk.f32.mxu0 %vm1760_vm5, %v1705_v35 }
 0x205   : > { %5753 = vmatmul.mubr.msk.f32.gmra.mrb[54].mxu0 %vm1760_vm5, %v1706_v61  ;;  %v1708_v3 = vmax.f32 %v1490_v56, 0.0 }
 0x206   : > { %v1707_v63 = vmax.f32 %v1485_v44, 0.0  ;;  %v5652_v2 = vpop.f32.mrb[58].mxu1 }
 0x207   : > { %v1500_v52 = vadd.f32 %v5652_v2, %v6653_v40  ;;  %v1494_v0 = vpop.f32.mrb[59].mxu1 }
 0x208   : > { %v1495_v5 = vadd.f32 %v6653_v40, %v1494_v0  ;;  %5755 = vmatprep.mubr.msk.f32.mxu0 %vm1760_vm5, %v1707_v63 }
 0x209   : > { %5756 = vmatmul.mubr.msk.f32.gmra.mrb[56].mxu0 %vm1760_vm5, %v1708_v3  ;;  %v1710_v8 = vmax.f32 %v1500_v52, 0.0 }
 0x20a   : > { %v1709_v7 = vmax.f32 %v1495_v5, 0.0  ;;  %v5655_v60 = vpop.f32.mrb[60].mxu1 }
 0x20b   : > { %v1510_v9 = vadd.f32 %v5655_v60, %v6653_v40  ;;  %v1504_v10 = vpop.f32.mrb[61].mxu1 }
 0x20c   : > { %v1505_v4 = vadd.f32 %v6653_v40, %v1504_v10  ;;  %5758 = vmatprep.mubr.msk.f32.mxu0 %vm1760_vm5, %v1709_v7 }
 0x20d   : > { %5759 = vmatmul.mubr.msk.f32.gmra.mrb[58].mxu0 %vm1760_vm5, %v1710_v8  ;;  %v1712_v15 = vmax.f32 %v1510_v9, 0.0 }
 0x20e   : > { %v1711_v17 = vmax.f32 %v1505_v4, 0.0  ;;  %v5658_v13 = vpop.f32.mrb[62].mxu1 }
 0x20f   : > { %v1520_v12 = vadd.f32 %v5658_v13, %v6653_v40  ;;  %v1514_v25 = vpop.f32.mrb[63].mxu1 }
 0x210   : > { %v1515_v16 = vadd.f32 %v6653_v40, %v1514_v25  ;;  %5761 = vmatprep.mubr.msk.f32.mxu0 %vm1760_vm5, %v1711_v17 }
 0x211   : > { %5762 = vmatmul.mubr.msk.f32.gmra.mrb[60].mxu0 %vm1760_vm5, %v1712_v15  ;;  %v1714_v33 = vmax.f32 %v1520_v12, 0.0 }
 0x212   : > { %v1713_v19 = vmax.f32 %v1515_v16, 0.0  ;;  %v5661_v21 = vpop.f32.mrb[64].mxu1 }
 0x213   : > { %v1530_v20 = vadd.f32 %v5661_v21, %v6653_v40  ;;  %v1524_v22 = vpop.f32.mrb[65].mxu1 }
 0x214   : > { %v1525_v29 = vadd.f32 %v6653_v40, %v1524_v22  ;;  %5764 = vmatprep.mubr.msk.f32.mxu0 %vm1760_vm5, %v1713_v19 }
 0x215   : > { %5765 = vmatmul.mubr.msk.f32.gmra.mrb[62].mxu0 %vm1760_vm5, %v1714_v33  ;;  %v1716_v26 = vmax.f32 %v1530_v20, 0.0 }
 0x216   : > { %v1715_v43 = vmax.f32 %v1525_v29, 0.0  ;;  %v5664_v24 = vpop.f32.mrb[66].mxu1 }
 0x217   : > { %v1540_v38 = vadd.f32 %v5664_v24, %v6653_v40  ;;  %v1534_v54 = vpop.f32.mrb[67].mxu1 }
 0x218   : > { %v1535_v27 = vadd.f32 %v6653_v40, %v1534_v54  ;;  %5767 = vmatprep.mubr.msk.f32.mxu0 %vm1760_vm5, %v1715_v43 }
 0x219   : > { %5768 = vmatmul.mubr.msk.f32.gmra.mrb[64].mxu0 %vm1760_vm5, %v1716_v26  ;;  %v1718_v1 = vmax.f32 %v1540_v38, 0.0 }
 0x21a   : > { %v1717_v28 = vmax.f32 %v1535_v27, 0.0  ;;  %v5667_v49 = vpop.f32.mrb[68].mxu1 }
 0x21b   : > { %v1550_v31 = vadd.f32 %v5667_v49, %v6653_v40  ;;  %v1544_v32 = vpop.f32.mrb[69].mxu1 }
 0x21c   : > { %v1545_v59 = vadd.f32 %v6653_v40, %v1544_v32  ;;  %5770 = vmatprep.mubr.msk.f32.mxu0 %vm1760_vm5, %v1717_v28 }
 0x21d   : > { %5771 = vmatmul.mubr.msk.f32.gmra.mrb[66].mxu0 %vm1760_vm5, %v1718_v1  ;;  %v1720_v37 = vmax.f32 %v1550_v31, 0.0 }
 0x21e   : > { %v1719_v11 = vmax.f32 %v1545_v59, 0.0  ;;  %v5670_v34 = vpop.f32.mrb[70].mxu1 }
 0x21f   : > { %v1560_v6 = vadd.f32 %v5670_v34, %v6653_v40  ;;  %v1554_v23 = vpop.f32.mrb[71].mxu1 }
 0x220   : > { %v1555_v39 = vadd.f32 %v6653_v40, %v1554_v23  ;;  %5773 = vmatprep.mubr.msk.f32.mxu0 %vm1760_vm5, %v1719_v11 }
 0x221   : > { %5774 = vmatmul.mubr.msk.f32.gmra.mrb[68].mxu0 %vm1760_vm5, %v1720_v37  ;;  %v1722_v36 = vmax.f32 %v1560_v6, 0.0 }
 0x222   : > { %v1721_v41 = vmax.f32 %v1555_v39, 0.0  ;;  %v5673_v18 = vpop.f32.mrb[72].mxu1 }
 0x223   : > { %v1570_v42 = vadd.f32 %v5673_v18, %v6653_v40  ;;  %v1564_v45 = vpop.f32.mrb[73].mxu1 }
 0x224   : > { %v1565_v46 = vadd.f32 %v6653_v40, %v1564_v45  ;;  %5776 = vmatprep.mubr.msk.f32.mxu0 %vm1760_vm5, %v1721_v41 }
 0x225   : > { %5777 = vmatmul.mubr.msk.f32.gmra.mrb[70].mxu0 %vm1760_vm5, %v1722_v36  ;;  %v1724_v50 = vmax.f32 %v1570_v42, 0.0 }
 0x226   : > { %v1723_v30 = vmax.f32 %v1565_v46, 0.0  ;;  %v5676_v47 = vpop.f32.mrb[74].mxu1 }
 0x227   : > { %v1580_v51 = vadd.f32 %v5676_v47, %v6653_v40  ;;  %v1574_v48 = vpop.f32.mrb[75].mxu1 }
 0x228   : > { %v1575_v55 = vadd.f32 %v6653_v40, %v1574_v48  ;;  %5779 = vmatprep.mubr.msk.f32.mxu0 %vm1760_vm5, %v1723_v30 }
 0x229   : > { %5780 = vmatmul.mubr.msk.f32.gmra.mrb[72].mxu0 %vm1760_vm5, %v1724_v50  ;;  %v1726_v57 = vmax.f32 %v1580_v51, 0.0 }
 0x22a   : > { %v1725_v14 = vmax.f32 %v1575_v55, 0.0  ;;  %v5679_v53 = vpop.f32.mrb[76].mxu1  ;;  %v6786_v55 = vld [vmem:[%s9252_s6] ss:$0 sm:$0xff] }
 0x22b   : > { %v1590_v35 = vadd.f32 %v5679_v53, %v6653_v40  ;;  %v1584_v58 = vpop.f32.mrb[77].mxu1 }
 0x22c   : > { %v1585_v61 = vadd.f32 %v6653_v40, %v1584_v58  ;;  %5782 = vmatprep.mubr.msk.f32.mxu0 %vm1760_vm5, %v1725_v14 }
 0x22d   : > { %5783 = vmatmul.mubr.msk.f32.gmra.mrb[74].mxu0 %vm1760_vm5, %v1726_v57  ;;  %v1728_v44 = vmax.f32 %v1590_v35, 0.0  ;;  %v6797_v35 = vld [vmem:[%s9253_s7] ss:$0 sm:$0xff] }
 0x22e   : > { %v1727_v56 = vmax.f32 %v1585_v61, 0.0  ;;  %v5682_v62 = vpop.f32.mrb[78].mxu1 }
 0x22f   : > { %v1600_v63 = vadd.f32 %v5682_v62, %v6653_v40  ;;  %v1594_v2 = vpop.f32.mrb[79].mxu1 }
 0x230   : > { %v1595_v3 = vadd.f32 %v6653_v40, %v1594_v2  ;;  %5785 = vmatprep.mubr.msk.f32.mxu0 %vm1760_vm5, %v1727_v56 }
 0x231   : > { %5786 = vmatmul.mubr.msk.f32.gmra.mrb[76].mxu0 %vm1760_vm5, %v1728_v44  ;;  %v1730_v5 = vmax.f32 %v1600_v63, 0.0 }
 0x232   : > { %v1729_v52 = vmax.f32 %v1595_v3, 0.0  ;;  %v5685_v0 = vpop.f32.mrb[80].mxu1 }
 0x233   : > { %v1610_v7 = vadd.f32 %v5685_v0, %v6653_v40  ;;  %v1604_v60 = vpop.f32.mrb[81].mxu1 }
 0x234   : > { %v1605_v8 = vadd.f32 %v6653_v40, %v1604_v60  ;;  %5788 = vmatprep.mubr.msk.f32.mxu0 %vm1760_vm5, %v1729_v52 }
 0x235   : > { %5789 = vmatmul.mubr.msk.f32.gmra.mrb[78].mxu0 %vm1760_vm5, %v1730_v5  ;;  %v1732_v4 = vmax.f32 %v1610_v7, 0.0 }
 0x236   : > { %v1731_v9 = vmax.f32 %v1605_v8, 0.0  ;;  %v5688_v10 = vpop.f32.mrb[82].mxu1 }
 0x237   : > { %v1620_v17 = vadd.f32 %v5688_v10, %v6653_v40  ;;  %v1614_v13 = vpop.f32.mrb[83].mxu1 }
 0x238   : > { %v1615_v15 = vadd.f32 %v6653_v40, %v1614_v13  ;;  %5791 = vmatprep.mubr.msk.f32.mxu0 %vm1760_vm5, %v1731_v9 }
 0x239   : > { %5792 = vmatmul.mubr.msk.f32.gmra.mrb[80].mxu0 %vm1760_vm5, %v1732_v4  ;;  %v1734_v16 = vmax.f32 %v1620_v17, 0.0 }
 0x23a   : > { %v1733_v12 = vmax.f32 %v1615_v15, 0.0  ;;  %v5691_v25 = vpop.f32.mrb[84].mxu1 }
 0x23b   : > { %v1630_v19 = vadd.f32 %v5691_v25, %v6653_v40  ;;  %v1624_v21 = vpop.f32.mrb[85].mxu1 }
 0x23c   : > { %v1625_v33 = vadd.f32 %v6653_v40, %v1624_v21  ;;  %5794 = vmatprep.mubr.msk.f32.mxu0 %vm1760_vm5, %v1733_v12 }
 0x23d   : > { %5795 = vmatmul.mubr.msk.f32.gmra.mrb[82].mxu0 %vm1760_vm5, %v1734_v16  ;;  %v1736_v29 = vmax.f32 %v1630_v19, 0.0 }
 0x23e   : > { %v1735_v20 = vmax.f32 %v1625_v33, 0.0  ;;  %v5694_v22 = vpop.f32.mrb[86].mxu1 }
 0x23f   : > { %v1640_v43 = vadd.f32 %v5694_v22, %v6653_v40  ;;  %v1634_v24 = vpop.f32.mrb[87].mxu1 }
 0x240   : > { %v1635_v26 = vadd.f32 %v6653_v40, %v1634_v24  ;;  %5797 = vmatprep.mubr.msk.f32.mxu0 %vm1760_vm5, %v1735_v20 }
 0x241   : > { %5798 = vmatmul.mubr.msk.f32.gmra.mrb[84].mxu0 %vm1760_vm5, %v1736_v29  ;;  %v1738_v27 = vmax.f32 %v1640_v43, 0.0 }
 0x242   : > { %v1737_v38 = vmax.f32 %v1635_v26, 0.0  ;;  %v5697_v54 = vpop.f32.mrb[88].mxu1 }
 0x243   : > { %v1650_v28 = vadd.f32 %v5697_v54, %v6653_v40  ;;  %v1644_v49 = vpop.f32.mrb[89].mxu1 }
 0x244   : > { %v1645_v1 = vadd.f32 %v6653_v40, %v1644_v49  ;;  %5800 = vmatprep.mubr.msk.f32.mxu0 %vm1760_vm5, %v1737_v38 }
 0x245   : > { %5801 = vmatmul.mubr.msk.f32.gmra.mrb[86].mxu0 %vm1760_vm5, %v1738_v27  ;;  %v1740_v59 = vmax.f32 %v1650_v28, 0.0 }
 0x246   : > { %v1739_v31 = vmax.f32 %v1645_v1, 0.0  ;;  %v5700_v32 = vpop.f32.mrb[90].mxu1 }
 0x247   : > { %v1660_v11 = vadd.f32 %v5700_v32, %v6653_v40  ;;  %v1654_v34 = vpop.f32.mrb[91].mxu1 }
 0x248   : > { %v1655_v37 = vadd.f32 %v6653_v40, %v1654_v34  ;;  %5803 = vmatprep.mubr.msk.f32.mxu0 %vm1760_vm5, %v1739_v31 }
 0x249   : > { %5804 = vmatmul.mubr.msk.f32.gmra.mrb[88].mxu0 %vm1760_vm5, %v1740_v59  ;;  %v1742_v39 = vmax.f32 %v1660_v11, 0.0 }
 0x24a   : > { %v1741_v6 = vmax.f32 %v1655_v37, 0.0  ;;  %v5703_v23 = vpop.f32.mrb[92].mxu1 }
 0x24b   : > { %v1670_v41 = vadd.f32 %v5703_v23, %v6653_v40  ;;  %v1664_v18 = vpop.f32.mrb[93].mxu1 }
 0x24c   : > { %v1665_v36 = vadd.f32 %v6653_v40, %v1664_v18  ;;  %5806 = vmatprep.mubr.msk.f32.mxu0 %vm1760_vm5, %v1741_v6 }
 0x24d   : > { %5807 = vmatmul.mubr.msk.f32.gmra.mrb[90].mxu0 %vm1760_vm5, %v1742_v39  ;;  %v1744_v46 = vmax.f32 %v1670_v41, 0.0 }
 0x24e   : > { %v1743_v42 = vmax.f32 %v1665_v36, 0.0  ;;  %v5706_v45 = vpop.f32.mrb[94].mxu1 }
 0x24f   : > { %v1680_v30 = vadd.f32 %v5706_v45, %v6653_v40  ;;  %v1674_v47 = vpop.f32.mrb[95].mxu1 }
 0x250   : > { %v1675_v50 = vadd.f32 %v6653_v40, %v1674_v47  ;;  %5809 = vmatprep.mubr.msk.f32.mxu0 %vm1760_vm5, %v1743_v42 }
 0x251   : > { %5810 = vmatmul.mubr.msk.f32.gmra.mrb[92].mxu0 %vm1760_vm5, %v1744_v46  ;;  %v1746_v48 = vmax.f32 %v1680_v30, 0.0 }
 0x252   : > { %v1745_v51 = vmax.f32 %v1675_v50, 0.0 }
 0x254   : > { %5812 = vmatprep.mubr.msk.f32.mxu0 %vm1760_vm5, %v1745_v51  ;;  %v6124_v51 = vmov 0  }
 0x255   : > { %5813 = vmatmul.mubr.msk.f32.gmra.mrb[94].mxu0 %vm1760_vm5, %v1746_v48  ;;  %5895 = vset.pattern.permute.xlu0 %v6124_v51 }
 0x256   : > { %5896 = vset.pattern.permute.xlu1 %v6124_v51 }
 0x2ac   : > { %v5721_v14 = vpop.f32.mrb[32].mxu0 }
 0x2ad   : > { %v6789_v53 = vadd.f32 %v5721_v14, %v6786_v55  ;;  %v2019_v40 = vpop.f32.mrb[33].mxu0 }
 0x2ae   : > { %v6792_v57 = vadd.f32 %v6786_v55, %v2019_v40 }
 0x2af   : > { %9481 = vst [vmem:[#allocation9_spill] sm:$0xff] %v6789_v53  ;;  %v9301_v58 = vmax.f32 %v6789_v53, 0.0 }
 0x2b0   : > { %9482 = vst [vmem:[#allocation10_spill] sm:$0xff] %v6792_v57  ;;  %v9302_v61 = vmax.f32 %v6792_v57, 0.0  ;;  %v5724_v56 = vpop.f32.mrb[34].mxu0 }
 0x2b1   : > { %v6802_v62 = vadd.f32 %v5724_v56, %v6786_v55  ;;  %v2029_v44 = vpop.f32.mrb[35].mxu0  ;;  %v2410_v63 = vmul.f32 %v6797_v35, %v9301_v58 }
 0x2b2   : > { %v6808_v2 = vadd.f32 %v6786_v55, %v2029_v44  ;;  %v2409_v0 = vmul.f32 %v6797_v35, %v9302_v61 }
 0x2b3   : > { %9483 = vst [vmem:[#allocation11_spill] sm:$0xff] %v6802_v62  ;;  %v9297_v3 = vmax.f32 %v6802_v62, 0.0  ;;  %v2477_v52 = vsel %vm2473_vm6, %v2410_v63, 0.0 }
 0x2b4   : > { %9484 = vst [vmem:[#allocation12_spill] sm:$0xff] %v6808_v2  ;;  %v9298_v5 = vmax.f32 %v6808_v2, 0.0  ;;  %2478 = vadd.xlane.f32.xlu0 %v2477_v52  ;;  %v5727_v7 = vpop.f32.mrb[36].mxu0  ;;  %v2474_v13 = vsel %vm2473_vm6, %v2409_v0, 0.0 }
 0x2b5   : > { %v6817_v60 = vadd.f32 %v5727_v7, %v6786_v55  ;;  %v2039_v8 = vpop.f32.mrb[37].mxu0  ;;  %v2412_v9 = vmul.f32 %v6797_v35, %v9297_v3 }
 0x2b6   : > { %v6823_v10 = vadd.f32 %v6786_v55, %v2039_v8  ;;  %v2411_v15 = vmul.f32 %v6797_v35, %v9298_v5 }
 0x2b7   : > { %9485 = vst [vmem:[#allocation13_spill] sm:$0xff] %v6817_v60  ;;  %v9293_v4 = vmax.f32 %v6817_v60, 0.0  ;;  %v2483_v17 = vsel %vm2473_vm6, %v2412_v9, 0.0 }
 0x2b8   : > { %9486 = vst [vmem:[#allocation14_spill] sm:$0xff] %v6823_v10  ;;  %v9294_v12 = vmax.f32 %v6823_v10, 0.0  ;;  %2484 = vadd.xlane.f32.xlu1 %v2483_v17  ;;  %v5730_v25 = vpop.f32.mrb[38].mxu0  ;;  %2475 = vadd.xlane.f32.xlu0 %v2474_v13  ;;  %v2480_v22 = vsel %vm2473_vm6, %v2411_v15, 0.0 }
 0x2b9   : > { %v6833_v16 = vadd.f32 %v5730_v25, %v6786_v55  ;;  %v2049_v19 = vpop.f32.mrb[39].mxu0  ;;  %v2414_v29 = vmul.f32 %v6797_v35, %v9293_v4 }
 0x2ba   : > { %v6836_v21 = vadd.f32 %v6786_v55, %v2049_v19  ;;  %v2413_v33 = vmul.f32 %v6797_v35, %v9294_v12 }
 0x2bb   : > { %9487 = vst [vmem:[#allocation15_spill] sm:$0xff] %v6833_v16  ;;  %v9289_v20 = vmax.f32 %v6833_v16, 0.0  ;;  %v2489_v1 = vsel %vm2473_vm6, %v2414_v29, 0.0  ;;  %v2804_v16 = vlaneseq }
 0x2bc   : > { %9488 = vst [vmem:[#allocation16_spill] sm:$0xff] %v6836_v21  ;;  %v9290_v43 = vmax.f32 %v6836_v21, 0.0  ;;  %v5733_v24 = vpop.f32.mrb[40].mxu0  ;;  %2481 = vadd.xlane.f32.xlu1 %v2480_v22  ;;  %v2486_v26 = vsel %vm2473_vm6, %v2413_v33, 0.0 }
 0x2bd   : > { %v6849_v38 = vadd.f32 %v5733_v24, %v6786_v55  ;;  %v2059_v54 = vpop.f32.mrb[41].mxu0  ;;  %2487 = vadd.xlane.f32.xlu0 %v2486_v26  ;;  %v2416_v31 = vmul.f32 %v6797_v35, %v9289_v20  ;;  %v2805_v60 = vand.u32 127, %v2804_v16  ;;  %v7423_v2 = vshrl.u32 %v2804_v16, 7 }
 0x2be   : > { %v6852_v27 = vadd.f32 %v6786_v55, %v2059_v54  ;;  %v2415_v28 = vmul.f32 %v6797_v35, %v9290_v43 }
 0x2bf   : > { %9489 = vst [vmem:[#allocation17_spill] sm:$0xff] %v6849_v38  ;;  %v9286_v49 = vmax.f32 %v6849_v38, 0.0  ;;  %v2495_v41 = vsel %vm2473_vm6, %v2416_v31, 0.0  ;;  %9564 = vst [vmem:[#allocation85_spill] sm:$0xff] %v7423_v2  ;;  %v2810_v53 = vadd.s32 4294967288, %v2805_v60  ;;  %v2817_v57 = vadd.s32 4294967280, %v2805_v60 }
 0x2c0   : > { %9490 = vst [vmem:[#allocation18_spill] sm:$0xff] %v6852_v27  ;;  %v9285_v32 = vmax.f32 %v6852_v27, 0.0  ;;  %v5736_v59 = vpop.f32.mrb[42].mxu0  ;;  %2490 = vadd.xlane.f32.xlu1 %v2489_v1  ;;  %v2492_v11 = vsel %vm2473_vm6, %v2415_v28, 0.0 }
 0x2c1   : > { %v6865_v34 = vadd.f32 %v5736_v59, %v6786_v55  ;;  %v2069_v37 = vpop.f32.mrb[43].mxu0  ;;  %2493 = vadd.xlane.f32.xlu0 %v2492_v11  ;;  %v2418_v18 = vmul.f32 %v6797_v35, %v9286_v49  ;;  %v7436_v16 = vsub.s32 %v2817_v57, %v7423_v2 }
 0x2c2   : > { %v6868_v6 = vadd.f32 %v6786_v55, %v2069_v37  ;;  %v2417_v23 = vmul.f32 %v6797_v35, %v9285_v32 }
 0x2c3   : > { %9491 = vst [vmem:[#allocation19_spill] sm:$0xff] %v6865_v34  ;;  %v9281_v39 = vmax.f32 %v6865_v34, 0.0  ;;  %v2501_v14 = vsel %vm2473_vm6, %v2418_v18, 0.0  ;;  %9567 = vst [vmem:[#allocation88_spill] sm:$0xff] %v7436_v16 }
 0x2c4   : > { %9492 = vst [vmem:[#allocation20_spill] sm:$0xff] %v6868_v6  ;;  %v9282_v36 = vmax.f32 %v6868_v6, 0.0  ;;  %v5739_v42 = vpop.f32.mrb[44].mxu0  ;;  %2496 = vadd.xlane.f32.xlu1 %v2495_v41  ;;  %v2498_v45 = vsel %vm2473_vm6, %v2417_v23, 0.0 }
 0x2c5   : > { %v6881_v46 = vadd.f32 %v5739_v42, %v6786_v55  ;;  %v2079_v30 = vpop.f32.mrb[45].mxu0  ;;  %2499 = vadd.xlane.f32.xlu0 %v2498_v45  ;;  %v2420_v40 = vmul.f32 %v6797_v35, %v9281_v39 }
 0x2c6   : > { %v6884_v47 = vadd.f32 %v6786_v55, %v2079_v30  ;;  %v2419_v50 = vmul.f32 %v6797_v35, %v9282_v36 }
 0x2c7   : > { %9493 = vst [vmem:[#allocation21_spill] sm:$0xff] %v6881_v46  ;;  %v9274_v48 = vmax.f32 %v6881_v46, 0.0  ;;  %v2507_v17 = vsel %vm2473_vm6, %v2420_v40, 0.0 }
 0x2c8   : > { %9494 = vst [vmem:[#allocation22_spill] sm:$0xff] %v6884_v47  ;;  %v9278_v56 = vmax.f32 %v6884_v47, 0.0  ;;  %v5742_v44 = vpop.f32.mrb[46].mxu0  ;;  %2502 = vadd.xlane.f32.xlu1 %v2501_v14  ;;  %v2504_v63 = vsel %vm2473_vm6, %v2419_v50, 0.0 }
 0x2c9   : > { %v6897_v52 = vadd.f32 %v5742_v44, %v6786_v55  ;;  %v2089_v0 = vpop.f32.mrb[47].mxu0  ;;  %2505 = vadd.xlane.f32.xlu0 %v2504_v63  ;;  %v2422_v13 = vmul.f32 %v6797_v35, %v9274_v48 }
 0x2ca   : > { %v6900_v7 = vadd.f32 %v6786_v55, %v2089_v0  ;;  %v2421_v8 = vmul.f32 %v6797_v35, %v9278_v56 }
 0x2cb   : > { %9495 = vst [vmem:[#allocation23_spill] sm:$0xff] %v6897_v52  ;;  %v9273_v9 = vmax.f32 %v6897_v52, 0.0  ;;  %v2513_v54 = vsel %vm2473_vm6, %v2422_v13, 0.0 }
 0x2cc   : > { %9496 = vst [vmem:[#allocation24_spill] sm:$0xff] %v6900_v7  ;;  %v9277_v15 = vmax.f32 %v6900_v7, 0.0  ;;  %v5745_v25 = vpop.f32.mrb[48].mxu0  ;;  %2508 = vadd.xlane.f32.xlu1 %v2507_v17  ;;  %v2510_v19 = vsel %vm2473_vm6, %v2421_v8, 0.0 }
 0x2cd   : > { %v6913_v33 = vadd.f32 %v5745_v25, %v6786_v55  ;;  %v2099_v22 = vpop.f32.mrb[49].mxu0  ;;  %2511 = vadd.xlane.f32.xlu0 %v2510_v19  ;;  %v2424_v28 = vmul.f32 %v6797_v35, %v9273_v9 }
 0x2ce   : > { %v6916_v29 = vadd.f32 %v6786_v55, %v2099_v22  ;;  %v2423_v24 = vmul.f32 %v6797_v35, %v9277_v15 }
 0x2cf   : > { %9497 = vst [vmem:[#allocation25_spill] sm:$0xff] %v6913_v33  ;;  %v9266_v26 = vmax.f32 %v6913_v33, 0.0  ;;  %v2519_v42 = vsel %vm2473_vm6, %v2424_v28, 0.0 }
 0x2d0   : > { %9498 = vst [vmem:[#allocation26_spill] sm:$0xff] %v6916_v29  ;;  %v9270_v1 = vmax.f32 %v6916_v29, 0.0  ;;  %v5748_v31 = vpop.f32.mrb[50].mxu0  ;;  %2514 = vadd.xlane.f32.xlu1 %v2513_v54  ;;  %v2516_v59 = vsel %vm2473_vm6, %v2423_v24, 0.0 }
 0x2d1   : > { %v6929_v11 = vadd.f32 %v5748_v31, %v6786_v55  ;;  %v2109_v37 = vpop.f32.mrb[51].mxu0  ;;  %2517 = vadd.xlane.f32.xlu0 %v2516_v59  ;;  %v2426_v45 = vmul.f32 %v6797_v35, %v9266_v26 }
 0x2d2   : > { %v6932_v23 = vadd.f32 %v6786_v55, %v2109_v37  ;;  %v2425_v41 = vmul.f32 %v6797_v35, %v9270_v1 }
 0x2d3   : > { %9499 = vst [vmem:[#allocation27_spill] sm:$0xff] %v6929_v11  ;;  %v9262_v18 = vmax.f32 %v6929_v11, 0.0  ;;  %v2525_v8 = vsel %vm2473_vm6, %v2426_v45, 0.0 }
 0x2d4   : > { %9500 = vst [vmem:[#allocation28_spill] sm:$0xff] %v6932_v23  ;;  %v9269_v30 = vmax.f32 %v6932_v23, 0.0  ;;  %v5751_v50 = vpop.f32.mrb[52].mxu0  ;;  %2520 = vadd.xlane.f32.xlu1 %v2519_v42  ;;  %v2522_v51 = vsel %vm2473_vm6, %v2425_v41, 0.0 }
 0x2d5   : > { %v6945_v14 = vadd.f32 %v5751_v50, %v6786_v55  ;;  %v2119_v40 = vpop.f32.mrb[53].mxu0  ;;  %2523 = vadd.xlane.f32.xlu0 %v2522_v51  ;;  %v2428_v17 = vmul.f32 %v6797_v35, %v9262_v18 }
 0x2d6   : > { %v6948_v44 = vadd.f32 %v6786_v55, %v2119_v40  ;;  %v2427_v63 = vmul.f32 %v6797_v35, %v9269_v30 }
 0x2d7   : > { %9501 = vst [vmem:[#allocation29_spill] sm:$0xff] %v6945_v14  ;;  %v9258_v0 = vmax.f32 %v6945_v14, 0.0  ;;  %v2531_v59 = vsel %vm2473_vm6, %v2428_v17, 0.0 }
 0x2d8   : > { %9502 = vst [vmem:[#allocation30_spill] sm:$0xff] %v6948_v44  ;;  %v9265_v13 = vmax.f32 %v6948_v44, 0.0  ;;  %v5754_v25 = vpop.f32.mrb[54].mxu0  ;;  %2526 = vadd.xlane.f32.xlu1 %v2525_v8  ;;  %v2528_v19 = vsel %vm2473_vm6, %v2427_v63, 0.0 }
 0x2d9   : > { %v6961_v22 = vadd.f32 %v5754_v25, %v6786_v55  ;;  %v2129_v24 = vpop.f32.mrb[55].mxu0  ;;  %2529 = vadd.xlane.f32.xlu0 %v2528_v19  ;;  %v2430_v37 = vmul.f32 %v6797_v35, %v9258_v0 }
 0x2da   : > { %v6964_v54 = vadd.f32 %v6786_v55, %v2129_v24  ;;  %v2429_v28 = vmul.f32 %v6797_v35, %v9265_v13 }
 0x2db   : > { %9503 = vst [vmem:[#allocation31_spill] sm:$0xff] %v6961_v22  ;;  %v9257_v31 = vmax.f32 %v6961_v22, 0.0  ;;  %v2537_v17 = vsel %vm2473_vm6, %v2430_v37, 0.0 }
 0x2dc   : > { %9504 = vst [vmem:[#allocation32_spill] sm:$0xff] %v6964_v54  ;;  %v9261_v41 = vmax.f32 %v6964_v54, 0.0  ;;  %v5757_v42 = vpop.f32.mrb[56].mxu0  ;;  %2532 = vadd.xlane.f32.xlu1 %v2531_v59  ;;  %v2534_v45 = vsel %vm2473_vm6, %v2429_v28, 0.0 }
 0x2dd   : > { %v6977_v50 = vadd.f32 %v5757_v42, %v6786_v55  ;;  %v2139_v51 = vpop.f32.mrb[57].mxu0  ;;  %2535 = vadd.xlane.f32.xlu0 %v2534_v45  ;;  %v2432_v25 = vmul.f32 %v6797_v35, %v9257_v31 }
 0x2de   : > { %v6980_v40 = vadd.f32 %v6786_v55, %v2139_v51  ;;  %v2431_v63 = vmul.f32 %v6797_v35, %v9261_v41 }
 0x2df   : > { %9505 = vst [vmem:[#allocation33_spill] sm:$0xff] %v6977_v50  ;;  %v9260_v8 = vmax.f32 %v6977_v50, 0.0  ;;  %v2543_v31 = vsel %vm2473_vm6, %v2432_v25, 0.0 }
 0x2e0   : > { %9506 = vst [vmem:[#allocation34_spill] sm:$0xff] %v6980_v40  ;;  %v9259_v19 = vmax.f32 %v6980_v40, 0.0  ;;  %v5760_v24 = vpop.f32.mrb[58].mxu0  ;;  %2538 = vadd.xlane.f32.xlu1 %v2537_v17  ;;  %v2540_v28 = vsel %vm2473_vm6, %v2431_v63, 0.0 }
 0x2e1   : > { %v6993_v59 = vadd.f32 %v5760_v24, %v6786_v55  ;;  %v2149_v42 = vpop.f32.mrb[59].mxu0  ;;  %2541 = vadd.xlane.f32.xlu0 %v2540_v28  ;;  %v2434_v63 = vmul.f32 %v6797_v35, %v9260_v8 }
 0x2e2   : > { %v6996_v45 = vadd.f32 %v6786_v55, %v2149_v42  ;;  %v2433_v37 = vmul.f32 %v6797_v35, %v9259_v19 }
 0x2e3   : > { %9507 = vst [vmem:[#allocation35_spill] sm:$0xff] %v6993_v59  ;;  %v9264_v51 = vmax.f32 %v6993_v59, 0.0  ;;  %v2549_v41 = vsel %vm2473_vm6, %v2434_v63, 0.0 }
 0x2e4   : > { %9508 = vst [vmem:[#allocation36_spill] sm:$0xff] %v6996_v45  ;;  %v9263_v17 = vmax.f32 %v6996_v45, 0.0  ;;  %v5763_v24 = vpop.f32.mrb[60].mxu0  ;;  %2544 = vadd.xlane.f32.xlu1 %v2543_v31  ;;  %v2546_v28 = vsel %vm2473_vm6, %v2433_v37, 0.0 }
 0x2e5   : > { %v7009_v42 = vadd.f32 %v5763_v24, %v6786_v55  ;;  %v2159_v0 = vpop.f32.mrb[61].mxu0  ;;  %2547 = vadd.xlane.f32.xlu0 %v2546_v28  ;;  %v2436_v31 = vmul.f32 %v6797_v35, %v9264_v51 }
 0x2e6   : > { %v7012_v19 = vadd.f32 %v6786_v55, %v2159_v0  ;;  %v2435_v25 = vmul.f32 %v6797_v35, %v9263_v17 }
 0x2e7   : > { %9509 = vst [vmem:[#allocation37_spill] sm:$0xff] %v7009_v42  ;;  %v9268_v8 = vmax.f32 %v7009_v42, 0.0  ;;  %v2555_v13 = vsel %vm2473_vm6, %v2436_v31, 0.0 }
 0x2e8   : > { %9510 = vst [vmem:[#allocation38_spill] sm:$0xff] %v7012_v19  ;;  %v9267_v37 = vmax.f32 %v7012_v19, 0.0  ;;  %v5766_v24 = vpop.f32.mrb[62].mxu0  ;;  %2550 = vadd.xlane.f32.xlu1 %v2549_v41  ;;  %v2552_v28 = vsel %vm2473_vm6, %v2435_v25, 0.0 }
 0x2e9   : > { %v7025_v0 = vadd.f32 %v5766_v24, %v6786_v55  ;;  %v2169_v18 = vpop.f32.mrb[63].mxu0  ;;  %2553 = vadd.xlane.f32.xlu0 %v2552_v28  ;;  %v2438_v41 = vmul.f32 %v6797_v35, %v9268_v8 }
 0x2ea   : > { %v7028_v17 = vadd.f32 %v6786_v55, %v2169_v18  ;;  %v2437_v63 = vmul.f32 %v6797_v35, %v9267_v37 }
 0x2eb   : > { %9511 = vst [vmem:[#allocation39_spill] sm:$0xff] %v7025_v0  ;;  %v9272_v51 = vmax.f32 %v7025_v0, 0.0  ;;  %v2561_v30 = vsel %vm2473_vm6, %v2438_v41, 0.0 }
 0x2ec   : > { %9512 = vst [vmem:[#allocation40_spill] sm:$0xff] %v7028_v17  ;;  %v9271_v25 = vmax.f32 %v7028_v17, 0.0  ;;  %v5769_v24 = vpop.f32.mrb[64].mxu0  ;;  %2556 = vadd.xlane.f32.xlu1 %v2555_v13  ;;  %v2558_v28 = vsel %vm2473_vm6, %v2437_v63, 0.0 }
 0x2ed   : > { %v7041_v18 = vadd.f32 %v5769_v24, %v6786_v55  ;;  %v2179_v26 = vpop.f32.mrb[65].mxu0  ;;  %2559 = vadd.xlane.f32.xlu0 %v2558_v28  ;;  %v2440_v13 = vmul.f32 %v6797_v35, %v9272_v51 }
 0x2ee   : > { %v7044_v37 = vadd.f32 %v6786_v55, %v2179_v26  ;;  %v2439_v31 = vmul.f32 %v6797_v35, %v9271_v25 }
 0x2ef   : > { %9513 = vst [vmem:[#allocation41_spill] sm:$0xff] %v7041_v18  ;;  %v9276_v8 = vmax.f32 %v7041_v18, 0.0  ;;  %v2567_v9 = vsel %vm2473_vm6, %v2440_v13, 0.0 }
 0x2f0   : > { %9514 = vst [vmem:[#allocation42_spill] sm:$0xff] %v7044_v37  ;;  %v9275_v63 = vmax.f32 %v7044_v37, 0.0  ;;  %v5772_v24 = vpop.f32.mrb[66].mxu0  ;;  %2562 = vadd.xlane.f32.xlu1 %v2561_v30  ;;  %v2564_v28 = vsel %vm2473_vm6, %v2439_v31, 0.0 }
 0x2f1   : > { %v7057_v26 = vadd.f32 %v5772_v24, %v6786_v55  ;;  %v2189_v1 = vpop.f32.mrb[67].mxu0  ;;  %2565 = vadd.xlane.f32.xlu0 %v2564_v28  ;;  %v2442_v30 = vmul.f32 %v6797_v35, %v9276_v8 }
 0x2f2   : > { %v7060_v25 = vadd.f32 %v6786_v55, %v2189_v1  ;;  %v2441_v41 = vmul.f32 %v6797_v35, %v9275_v63 }
 0x2f3   : > { %9515 = vst [vmem:[#allocation43_spill] sm:$0xff] %v7057_v26  ;;  %v9280_v51 = vmax.f32 %v7057_v26, 0.0  ;;  %v2573_v15 = vsel %vm2473_vm6, %v2442_v30, 0.0 }
 0x2f4   : > { %9516 = vst [vmem:[#allocation44_spill] sm:$0xff] %v7060_v25  ;;  %v9279_v31 = vmax.f32 %v7060_v25, 0.0  ;;  %v5775_v24 = vpop.f32.mrb[68].mxu0  ;;  %2568 = vadd.xlane.f32.xlu1 %v2567_v9  ;;  %v2570_v28 = vsel %vm2473_vm6, %v2441_v41, 0.0 }
 0x2f5   : > { %v7073_v1 = vadd.f32 %v5775_v24, %v6786_v55  ;;  %v2199_v48 = vpop.f32.mrb[69].mxu0  ;;  %2571 = vadd.xlane.f32.xlu0 %v2570_v28  ;;  %v2444_v9 = vmul.f32 %v6797_v35, %v9280_v51 }
 0x2f6   : > { %v7076_v63 = vadd.f32 %v6786_v55, %v2199_v48  ;;  %v2443_v13 = vmul.f32 %v6797_v35, %v9279_v31 }
 0x2f7   : > { %9517 = vst [vmem:[#allocation45_spill] sm:$0xff] %v7073_v1  ;;  %v9284_v8 = vmax.f32 %v7073_v1, 0.0  ;;  %v2579_v39 = vsel %vm2473_vm6, %v2444_v9, 0.0 }
 0x2f8   : > { %9518 = vst [vmem:[#allocation46_spill] sm:$0xff] %v7076_v63  ;;  %v9283_v41 = vmax.f32 %v7076_v63, 0.0  ;;  %v5778_v24 = vpop.f32.mrb[70].mxu0  ;;  %2574 = vadd.xlane.f32.xlu1 %v2573_v15  ;;  %v2576_v28 = vsel %vm2473_vm6, %v2443_v13, 0.0 }
 0x2f9   : > { %v7089_v48 = vadd.f32 %v5778_v24, %v6786_v55  ;;  %v2209_v56 = vpop.f32.mrb[71].mxu0  ;;  %2577 = vadd.xlane.f32.xlu0 %v2576_v28  ;;  %v2446_v15 = vmul.f32 %v6797_v35, %v9284_v8 }
 0x2fa   : > { %v7092_v31 = vadd.f32 %v6786_v55, %v2209_v56  ;;  %v2445_v30 = vmul.f32 %v6797_v35, %v9283_v41 }
 0x2fb   : > { %9519 = vst [vmem:[#allocation47_spill] sm:$0xff] %v7089_v48  ;;  %v9288_v51 = vmax.f32 %v7089_v48, 0.0  ;;  %v2585_v32 = vsel %vm2473_vm6, %v2446_v15, 0.0 }
 0x2fc   : > { %9520 = vst [vmem:[#allocation48_spill] sm:$0xff] %v7092_v31  ;;  %v9287_v13 = vmax.f32 %v7092_v31, 0.0  ;;  %v5781_v24 = vpop.f32.mrb[72].mxu0  ;;  %2580 = vadd.xlane.f32.xlu1 %v2579_v39  ;;  %v2582_v28 = vsel %vm2473_vm6, %v2445_v30, 0.0 }
 0x2fd   : > { %v7105_v56 = vadd.f32 %v5781_v24, %v6786_v55  ;;  %v2219_v36 = vpop.f32.mrb[73].mxu0  ;;  %2583 = vadd.xlane.f32.xlu0 %v2582_v28  ;;  %v2448_v39 = vmul.f32 %v6797_v35, %v9288_v51 }
 0x2fe   : > { %v7108_v41 = vadd.f32 %v6786_v55, %v2219_v36  ;;  %v2447_v9 = vmul.f32 %v6797_v35, %v9287_v13 }
 0x2ff   : > { %9521 = vst [vmem:[#allocation49_spill] sm:$0xff] %v7105_v56  ;;  %v9292_v8 = vmax.f32 %v7105_v56, 0.0  ;;  %v2591_v20 = vsel %vm2473_vm6, %v2448_v39, 0.0 }
 0x300   : > { %9522 = vst [vmem:[#allocation50_spill] sm:$0xff] %v7108_v41  ;;  %v9291_v30 = vmax.f32 %v7108_v41, 0.0  ;;  %v5784_v24 = vpop.f32.mrb[74].mxu0  ;;  %2586 = vadd.xlane.f32.xlu1 %v2585_v32  ;;  %v2588_v28 = vsel %vm2473_vm6, %v2447_v9, 0.0 }
 0x301   : > { %v7121_v36 = vadd.f32 %v5784_v24, %v6786_v55  ;;  %v2229_v49 = vpop.f32.mrb[75].mxu0  ;;  %2589 = vadd.xlane.f32.xlu0 %v2588_v28  ;;  %v2450_v32 = vmul.f32 %v6797_v35, %v9292_v8 }
 0x302   : > { %v7124_v13 = vadd.f32 %v6786_v55, %v2229_v49  ;;  %v2449_v15 = vmul.f32 %v6797_v35, %v9291_v30 }
 0x303   : > { %9523 = vst [vmem:[#allocation51_spill] sm:$0xff] %v7121_v36  ;;  %v9296_v51 = vmax.f32 %v7121_v36, 0.0  ;;  %v2597_v4 = vsel %vm2473_vm6, %v2450_v32, 0.0 }
 0x304   : > { %9524 = vst [vmem:[#allocation52_spill] sm:$0xff] %v7124_v13  ;;  %v9295_v9 = vmax.f32 %v7124_v13, 0.0  ;;  %v5787_v24 = vpop.f32.mrb[76].mxu0  ;;  %2592 = vadd.xlane.f32.xlu1 %v2591_v20  ;;  %v2594_v28 = vsel %vm2473_vm6, %v2449_v15, 0.0 }
 0x305   : > { %v7137_v49 = vadd.f32 %v5787_v24, %v6786_v55  ;;  %v2239_v43 = vpop.f32.mrb[77].mxu0  ;;  %2595 = vadd.xlane.f32.xlu0 %v2594_v28  ;;  %v2452_v20 = vmul.f32 %v6797_v35, %v9296_v51 }
 0x306   : > { %v7140_v30 = vadd.f32 %v6786_v55, %v2239_v43  ;;  %v2451_v39 = vmul.f32 %v6797_v35, %v9295_v9 }
 0x307   : > { %9525 = vst [vmem:[#allocation53_spill] sm:$0xff] %v7137_v49  ;;  %v9300_v8 = vmax.f32 %v7137_v49, 0.0  ;;  %v2603_v3 = vsel %vm2473_vm6, %v2452_v20, 0.0 }
 0x308   : > { %9526 = vst [vmem:[#allocation54_spill] sm:$0xff] %v7140_v30  ;;  %v9299_v15 = vmax.f32 %v7140_v30, 0.0  ;;  %v5790_v24 = vpop.f32.mrb[78].mxu0  ;;  %2598 = vadd.xlane.f32.xlu1 %v2597_v4  ;;  %v2600_v28 = vsel %vm2473_vm6, %v2451_v39, 0.0 }
 0x309   : > { %v7153_v43 = vadd.f32 %v5790_v24, %v6786_v55  ;;  %v2249_v12 = vpop.f32.mrb[79].mxu0  ;;  %2601 = vadd.xlane.f32.xlu0 %v2600_v28  ;;  %v2454_v4 = vmul.f32 %v6797_v35, %v9300_v8 }
 0x30a   : > { %v7156_v9 = vadd.f32 %v6786_v55, %v2249_v12  ;;  %v2453_v32 = vmul.f32 %v6797_v35, %v9299_v15 }
 0x30b   : > { %9527 = vst [vmem:[#allocation55_spill] sm:$0xff] %v7153_v43  ;;  %v9304_v51 = vmax.f32 %v7153_v43, 0.0  ;;  %v2609_v58 = vsel %vm2473_vm6, %v2454_v4, 0.0 }
 0x30c   : > { %9528 = vst [vmem:[#allocation56_spill] sm:$0xff] %v7156_v9  ;;  %v9303_v39 = vmax.f32 %v7156_v9, 0.0  ;;  %v5793_v24 = vpop.f32.mrb[80].mxu0  ;;  %2604 = vadd.xlane.f32.xlu1 %v2603_v3  ;;  %v2606_v28 = vsel %vm2473_vm6, %v2453_v32, 0.0 }
 0x30d   : > { %v7169_v12 = vadd.f32 %v5793_v24, %v6786_v55  ;;  %v2259_v5 = vpop.f32.mrb[81].mxu0  ;;  %2607 = vadd.xlane.f32.xlu0 %v2606_v28  ;;  %v2456_v3 = vmul.f32 %v6797_v35, %v9304_v51 }
 0x30e   : > { %v7172_v15 = vadd.f32 %v6786_v55, %v2259_v5  ;;  %v2455_v20 = vmul.f32 %v6797_v35, %v9303_v39 }
 0x30f   : > { %9529 = vst [vmem:[#allocation57_spill] sm:$0xff] %v7169_v12  ;;  %v2615_v8 = vsel %vm2473_vm6, %v2456_v3, 0.0 }
 0x310   : > { %9530 = vst [vmem:[#allocation58_spill] sm:$0xff] %v7172_v15  ;;  %v9307_v32 = vmax.f32 %v7172_v15, 0.0  ;;  %v5796_v24 = vpop.f32.mrb[82].mxu0  ;;  %2610 = vadd.xlane.f32.xlu1 %v2609_v58  ;;  %v2612_v28 = vsel %vm2473_vm6, %v2455_v20, 0.0  ;;  %v9533_v58 = vmax.f32 %v7169_v12, 0.0 }
 0x311   : > { %v7185_v5 = vadd.f32 %v5796_v24, %v6786_v55  ;;  %v2269_v61 = vpop.f32.mrb[83].mxu0  ;;  %2613 = vadd.xlane.f32.xlu0 %v2612_v28 }
 0x312   : > { %v7188_v39 = vadd.f32 %v6786_v55, %v2269_v61  ;;  %v2457_v4 = vmul.f32 %v6797_v35, %v9307_v32  ;;  %v2458_v20 = vmul.f32 %v6797_v35, %v9533_v58 }
 0x313   : > { %9531 = vst [vmem:[#allocation59_spill] sm:$0xff] %v7185_v5 }
 0x314   : > { %9532 = vst [vmem:[#allocation60_spill] sm:$0xff] %v7188_v39  ;;  %v9310_v24 = vmax.f32 %v7188_v39, 0.0  ;;  %v5799_v9 = vpop.f32.mrb[84].mxu0  ;;  %2616 = vadd.xlane.f32.xlu1 %v2615_v8  ;;  %v2618_v28 = vsel %vm2473_vm6, %v2457_v4, 0.0  ;;  %v2621_v51 = vsel %vm2473_vm6, %v2458_v20, 0.0  ;;  %v9536_v8 = vmax.f32 %v7185_v5, 0.0 }
 0x315   : > { %v7201_v61 = vadd.f32 %v5799_v9, %v6786_v55  ;;  %v2279_v30 = vpop.f32.mrb[85].mxu0  ;;  %2619 = vadd.xlane.f32.xlu0 %v2618_v28 }
 0x316   : > { %v7204_v32 = vadd.f32 %v6786_v55, %v2279_v30  ;;  %v2459_v3 = vmul.f32 %v6797_v35, %v9310_v24  ;;  %v2460_v4 = vmul.f32 %v6797_v35, %v9536_v8 }
 0x317   : > { %9534 = vst [vmem:[#allocation61_spill] sm:$0xff] %v7201_v61 }
 0x318   : > { %9535 = vst [vmem:[#allocation62_spill] sm:$0xff] %v7204_v32  ;;  %v9313_v9 = vmax.f32 %v7204_v32, 0.0  ;;  %v5802_v48 = vpop.f32.mrb[86].mxu0  ;;  %2622 = vadd.xlane.f32.xlu1 %v2621_v51  ;;  %v2624_v28 = vsel %vm2473_vm6, %v2459_v3, 0.0  ;;  %v2627_v58 = vsel %vm2473_vm6, %v2460_v4, 0.0  ;;  %v9539_v51 = vmax.f32 %v7201_v61, 0.0 }
 0x319   : > { %v7217_v30 = vadd.f32 %v5802_v48, %v6786_v55  ;;  %v2289_v39 = vpop.f32.mrb[87].mxu0  ;;  %2625 = vadd.xlane.f32.xlu0 %v2624_v28 }
 0x31a   : > { %v7220_v24 = vadd.f32 %v6786_v55, %v2289_v39  ;;  %v2461_v20 = vmul.f32 %v6797_v35, %v9313_v9  ;;  %v2462_v3 = vmul.f32 %v6797_v35, %v9539_v51 }
 0x31b   : > { %9537 = vst [vmem:[#allocation63_spill] sm:$0xff] %v7217_v30 }
 0x31c   : > { %9538 = vst [vmem:[#allocation64_spill] sm:$0xff] %v7220_v24  ;;  %v9316_v48 = vmax.f32 %v7220_v24, 0.0  ;;  %v5805_v43 = vpop.f32.mrb[88].mxu0  ;;  %2628 = vadd.xlane.f32.xlu1 %v2627_v58  ;;  %v2630_v28 = vsel %vm2473_vm6, %v2461_v20, 0.0  ;;  %v2633_v8 = vsel %vm2473_vm6, %v2462_v3, 0.0  ;;  %v9542_v58 = vmax.f32 %v7217_v30, 0.0 }
 0x31d   : > { %v7233_v39 = vadd.f32 %v5805_v43, %v6786_v55  ;;  %v2299_v32 = vpop.f32.mrb[89].mxu0  ;;  %2631 = vadd.xlane.f32.xlu0 %v2630_v28 }
 0x31e   : > { %v7236_v9 = vadd.f32 %v6786_v55, %v2299_v32  ;;  %v2463_v4 = vmul.f32 %v6797_v35, %v9316_v48  ;;  %v2464_v20 = vmul.f32 %v6797_v35, %v9542_v58 }
 0x31f   : > { %9540 = vst [vmem:[#allocation65_spill] sm:$0xff] %v7233_v39 }
 0x320   : > { %9541 = vst [vmem:[#allocation66_spill] sm:$0xff] %v7236_v9  ;;  %v9319_v43 = vmax.f32 %v7236_v9, 0.0  ;;  %v5808_v12 = vpop.f32.mrb[90].mxu0  ;;  %2634 = vadd.xlane.f32.xlu1 %v2633_v8  ;;  %v2636_v28 = vsel %vm2473_vm6, %v2463_v4, 0.0  ;;  %v2639_v51 = vsel %vm2473_vm6, %v2464_v20, 0.0  ;;  %v9545_v8 = vmax.f32 %v7233_v39, 0.0 }
 0x321   : > { %v7249_v32 = vadd.f32 %v5808_v12, %v6786_v55  ;;  %v2309_v24 = vpop.f32.mrb[91].mxu0  ;;  %2637 = vadd.xlane.f32.xlu0 %v2636_v28 }
 0x322   : > { %v7252_v48 = vadd.f32 %v6786_v55, %v2309_v24  ;;  %v2465_v3 = vmul.f32 %v6797_v35, %v9319_v43  ;;  %v2466_v4 = vmul.f32 %v6797_v35, %v9545_v8 }
 0x323   : > { %9543 = vst [vmem:[#allocation67_spill] sm:$0xff] %v7249_v32 }
 0x324   : > { %9544 = vst [vmem:[#allocation68_spill] sm:$0xff] %v7252_v48  ;;  %v9322_v12 = vmax.f32 %v7252_v48, 0.0  ;;  %v5811_v30 = vpop.f32.mrb[92].mxu0  ;;  %2640 = vadd.xlane.f32.xlu1 %v2639_v51  ;;  %v2642_v28 = vsel %vm2473_vm6, %v2465_v3, 0.0  ;;  %v2645_v58 = vsel %vm2473_vm6, %v2466_v4, 0.0  ;;  %v9548_v51 = vmax.f32 %v7249_v32, 0.0 }
 0x325   : > { %v7265_v24 = vadd.f32 %v5811_v30, %v6786_v55  ;;  %v2319_v9 = vpop.f32.mrb[93].mxu0  ;;  %2643 = vadd.xlane.f32.xlu0 %v2642_v28 }
 0x326   : > { %v7268_v43 = vadd.f32 %v6786_v55, %v2319_v9  ;;  %v2467_v20 = vmul.f32 %v6797_v35, %v9322_v12  ;;  %v2468_v3 = vmul.f32 %v6797_v35, %v9548_v51 }
 0x327   : > { %9546 = vst [vmem:[#allocation69_spill] sm:$0xff] %v7265_v24 }
 0x328   : > { %9547 = vst [vmem:[#allocation70_spill] sm:$0xff] %v7268_v43  ;;  %v9323_v30 = vmax.f32 %v7268_v43, 0.0  ;;  %v5814_v61 = vpop.f32.mrb[94].mxu0  ;;  %2646 = vadd.xlane.f32.xlu1 %v2645_v58  ;;  %v2648_v28 = vsel %vm2473_vm6, %v2467_v20, 0.0  ;;  %v2651_v8 = vsel %vm2473_vm6, %v2468_v3, 0.0  ;;  %v9551_v58 = vmax.f32 %v7265_v24, 0.0 }
 0x329   : > { %v7281_v9 = vadd.f32 %v5814_v61, %v6786_v55  ;;  %v2329_v48 = vpop.f32.mrb[95].mxu0  ;;  %2649 = vadd.xlane.f32.xlu0 %v2648_v28 }
 0x32a   : > { %v7284_v12 = vadd.f32 %v6786_v55, %v2329_v48  ;;  %v2469_v4 = vmul.f32 %v6797_v35, %v9323_v30  ;;  %v2470_v20 = vmul.f32 %v6797_v35, %v9551_v58 }
 0x32b   : > { %9549 = vst [vmem:[#allocation71_spill] sm:$0xff] %v7281_v9  ;;  %v9326_v51 = vmax.f32 %v7281_v9, 0.0 }
 0x32c   : > { %9550 = vst [vmem:[#allocation72_spill] sm:$0xff] %v7284_v12  ;;  %v9325_v61 = vmax.f32 %v7284_v12, 0.0  ;;  %2652 = vadd.xlane.f32.xlu1 %v2651_v8  ;;  %v2654_v28 = vsel %vm2473_vm6, %v2469_v4, 0.0  ;;  %v2657_v48 = vsel %vm2473_vm6, %v2470_v20, 0.0  ;;  %v5286_v4 = vld [vmem:[#allocation2] ss:$0 sm:$0xff] }
 0x32d   : > { %2655 = vadd.xlane.f32.xlu0 %v2654_v28  ;;  %v2472_v3 = vmul.f32 %v6797_v35, %v9326_v51 }
 0x32e   : > { %v2471_v55 = vmul.f32 %v6797_v35, %v9325_v61 }
 0x32f   : > { %v2663_v58 = vsel %vm2473_vm6, %v2472_v3, 0.0 }
 0x330   : > { %2658 = vadd.xlane.f32.xlu1 %v2657_v48  ;;  %v2660_v30 = vsel %vm2473_vm6, %v2471_v55, 0.0 }
 0x331   : > { %2661 = vadd.xlane.f32.xlu0 %v2660_v30 }
 0x334   : > { %2664 = vadd.xlane.f32.xlu1 %v2663_v58 }
 0x341   : > { %v7305_v8 = vpop.xlane.xlu0 %2478 }
 0x345   : > { %v7307_v28 = vpop.xlane.xlu1 %2484  ;;  %v7309_v12 = vpop.xlane.xlu0 %2475 }
 0x347   : > { %2673 = vperm.xlu0 %5895, %v5286_v4  }
 0x349   : > { %v7311_v20 = vpop.xlane.xlu1 %2481 }
 0x34a   : > { %v7313_v61 = vpop.xlane.xlu0 %2487 }
 0x34d   : > { %v7315_v35 = vpop.xlane.xlu1 %2490 }
 0x34e   : > { %v7317_v48 = vpop.xlane.xlu0 %2493 }
 0x351   : > { %v7319_v30 = vpop.xlane.xlu1 %2496 }
 0x352   : > { %v7321_v55 = vpop.xlane.xlu0 %2499 }
 0x355   : > { %v7323_v3 = vpop.xlane.xlu1 %2502 }
 0x356   : > { %v7325_v58 = vpop.xlane.xlu0 %2505 }
 0x359   : > { %v7327_v51 = vpop.xlane.xlu1 %2508 }
 0x35a   : > { %v7329_v9 = vpop.xlane.xlu0 %2511 }
 0x35d   : > { %v7331_v4 = vpop.xlane.xlu1 %2514 }
 0x35e   : > { %v7333_v43 = vpop.xlane.xlu0 %2517 }
 0x361   : > { %v7335_v24 = vpop.xlane.xlu1 %2520 }
 0x362   : > { %v7337_v1 = vpop.xlane.xlu0 %2523 }
 0x365   : > { %v7339_v49 = vpop.xlane.xlu1 %2526 }
 0x366   : > { %v7341_v32 = vpop.xlane.xlu0 %2529 }
 0x369   : > { %v7343_v56 = vpop.xlane.xlu1 %2532 }
 0x36a   : > { %v7345_v5 = vpop.xlane.xlu0 %2535 }
 0x36d   : > { %v7347_v36 = vpop.xlane.xlu1 %2538 }
 0x36e   : > { %v7349_v39 = vpop.xlane.xlu0 %2541 }
 0x371   : > { %v7351_v13 = vpop.xlane.xlu1 %2544 }
 0x372   : > { %v7353_v15 = vpop.xlane.xlu0 %2547 }
 0x375   : > { %v7355_v41 = vpop.xlane.xlu1 %2550 }
 0x376   : > { %v7357_v26 = vpop.xlane.xlu0 %2553 }
 0x379   : > { %v7359_v31 = vpop.xlane.xlu1 %2556 }
 0x37a   : > { %v7361_v63 = vpop.xlane.xlu0 %2559 }
 0x37d   : > { %v7363_v25 = vpop.xlane.xlu1 %2562 }
 0x37e   : > { %v7365_v0 = vpop.xlane.xlu0 %2565 }
 0x381   : > { %v7367_v17 = vpop.xlane.xlu1 %2568 }
 0x382   : > { %v7369_v37 = vpop.xlane.xlu0 %2571 }
 0x385   : > { %v7371_v18 = vpop.xlane.xlu1 %2574 }
 0x386   : > { %v7373_v42 = vpop.xlane.xlu0 %2577 }
 0x389   : > { %v7377_v59 = vpop.xlane.xlu1 %2580 }
 0x38a   : > { %v7375_v19 = vpop.xlane.xlu0 %2583 }
 0x38d   : > { %v7381_v40 = vpop.xlane.xlu1 %2586 }
 0x38e   : > { %v7379_v45 = vpop.xlane.xlu0 %2589 }
 0x391   : > { %v7387_v14 = vpop.xlane.xlu1 %2592 }
 0x392   : > { %v7383_v50 = vpop.xlane.xlu0 %2595 }
 0x395   : > { %v7391_v11 = vpop.xlane.xlu1 %2598 }
 0x396   : > { %v7385_v22 = vpop.xlane.xlu0 %2601 }
 0x399   : > { %v7397_v23 = vpop.xlane.xlu1 %2604 }
 0x39a   : > { %v7389_v54 = vpop.xlane.xlu0 %2607 }
 0x39d   : > { %v7401_v52 = vpop.xlane.xlu1 %2610 }
 0x39e   : > { %v7393_v44 = vpop.xlane.xlu0 %2613 }
 0x3a1   : > { %v7407_v47 = vpop.xlane.xlu1 %2616 }
 0x3a2   : > { %v7395_v33 = vpop.xlane.xlu0 %2619  ;;  %9556 = vst [vmem:[#allocation77_spill] sm:$0xff] %v7407_v47 }
 0x3a3   : > { %9552 = vst [vmem:[#allocation73_spill] sm:$0xff] %v7395_v33 }
 0x3a5   : > { %v7411_v6 = vpop.xlane.xlu1 %2622 }
 0x3a6   : > { %v7399_v29 = vpop.xlane.xlu0 %2625  ;;  %9558 = vst [vmem:[#allocation79_spill] sm:$0xff] %v7411_v6  ;;  %v2852_v6 = vadd.s32 4294967240, %v2805_v60 }
 0x3a7   : > { %9553 = vst [vmem:[#allocation74_spill] sm:$0xff] %v7399_v29  ;;  %v2845_v29 = vadd.s32 4294967248, %v2805_v60 }
 0x3a9   : > { %v7415_v38 = vpop.xlane.xlu1 %2628 }
 0x3aa   : > { %v7403_v46 = vpop.xlane.xlu0 %2631  ;;  %9560 = vst [vmem:[#allocation81_spill] sm:$0xff] %v7415_v38  ;;  %v7428_v38 = vsub.s32 %v2805_v60, %v7423_v2 }
 0x3ab   : > { %9554 = vst [vmem:[#allocation75_spill] sm:$0xff] %v7403_v46  ;;  %v2838_v46 = vadd.s32 4294967256, %v2805_v60 }
 0x3ac   : > { %9565 = vst [vmem:[#allocation86_spill] sm:$0xff] %v7428_v38  ;;  %v7452_v38 = vsub.s32 %v2845_v29, %v7423_v2 }
 0x3ad   : > { %v7419_v10 = vpop.xlane.xlu1 %2634 }
 0x3ae   : > { %v7405_v7 = vpop.xlane.xlu0 %2637  ;;  %9562 = vst [vmem:[#allocation83_spill] sm:$0xff] %v7419_v10  ;;  %v7433_v10 = vsub.s32 %v2810_v53, %v7423_v2  ;;  %v7455_v53 = vsub.s32 %v2852_v6, %v7423_v2 }
 0x3af   : > { %9555 = vst [vmem:[#allocation76_spill] sm:$0xff] %v7405_v7  ;;  %v2824_v7 = vadd.s32 4294967272, %v2805_v60 }
 0x3b0   : > { %9566 = vst [vmem:[#allocation87_spill] sm:$0xff] %v7433_v10 }
 0x3b2   : > { %v7409_v34 = vpop.xlane.xlu0 %2643 }
 0x3b3   : > { %9557 = vst [vmem:[#allocation78_spill] sm:$0xff] %v7409_v34  ;;  %v2831_v34 = vadd.s32 4294967264, %v2805_v60  ;;  %v7449_v60 = vsub.s32 %v2838_v46, %v7423_v2 }
 0x3b5   : > { %v7442_v33 = vsub.s32 %v2831_v34, %v7423_v2 }
 0x3b6   : > { %v7413_v27 = vpop.xlane.xlu0 %2649 }
 0x3b7   : > { %9559 = vst [vmem:[#allocation80_spill] sm:$0xff] %v7413_v27 }
 0x3ba   : > { %v7417_v21 = vpop.xlane.xlu0 %2655 }
 0x3bb   : > { %9561 = vst [vmem:[#allocation82_spill] sm:$0xff] %v7417_v21  ;;  %v7430_v21 = vpop.xlane.xlu1 %2640 }
 0x3be   : > { %v7421_v62 = vpop.xlane.xlu0 %2661 }
 0x3bf   : > { %9563 = vst [vmem:[#allocation84_spill] sm:$0xff] %v7421_v62  ;;  %v7439_v62 = vsub.s32 %v2824_v7, %v7423_v2  ;;  %v9591_v2 = vld [vmem:[#allocation77_spill] sm:$0xff] }
 0x3c6   : > { %v7425_v27 = vpop.permute.xlu0 %2673 }
 0x3c7   : > { %v7446_v47 = vadd.f32 %v7425_v27, %v7309_v12  ;;  %v7459_v57 = vadd.f32 %v7425_v27, %v7305_v8  ;;  %v7463_v34 = vadd.f32 %v7425_v27, %v7311_v20  ;;  %v7467_v7 = vadd.f32 %v7425_v27, %v7307_v28 }
 0x3c8   : > { %v7471_v46 = vadd.f32 %v7425_v27, %v7313_v61  ;;  %v7475_v6 = vadd.f32 %v7425_v27, %v7315_v35  ;;  %v7479_v29 = vadd.f32 %v7425_v27, %v7317_v48  ;;  %v7483_v12 = vadd.f32 %v7425_v27, %v7319_v30 }
 0x3c9   : > { %9568 = vst [vmem:[#allocation89_spill] sm:$0xff] %v7446_v47  ;;  %9569 = vst [vmem:[#allocation90_spill] sm:$0xff] %v7459_v57  ;;  %v7487_v8 = vadd.f32 %v7425_v27, %v7321_v55  ;;  %v7491_v61 = vadd.f32 %v7425_v27, %v7323_v3  ;;  %v7495_v28 = vadd.f32 %v7425_v27, %v7325_v58  ;;  %v2647_v3 = vpop.xlane.xlu1 %2646 }
 0x3ca   : > { %9570 = vst [vmem:[#allocation91_spill] sm:$0xff] %v7463_v34  ;;  %9571 = vst [vmem:[#allocation92_spill] sm:$0xff] %v7467_v7  ;;  %v7499_v20 = vadd.f32 %v7425_v27, %v7327_v51  ;;  %v7503_v35 = vadd.f32 %v7425_v27, %v7329_v9  ;;  %v7507_v48 = vadd.f32 %v7425_v27, %v7331_v4 }
 0x3cb   : > { %9572 = vst [vmem:[#allocation93_spill] sm:$0xff] %v7475_v6  ;;  %9573 = vst [vmem:[#allocation94_spill] sm:$0xff] %v7479_v29  ;;  %v7511_v30 = vadd.f32 %v7425_v27, %v7333_v43  ;;  %v7515_v55 = vadd.f32 %v7425_v27, %v7335_v24  ;;  %v7519_v51 = vadd.f32 %v7425_v27, %v7337_v1 }
 0x3cc   : > { %9574 = vst [vmem:[#allocation95_spill] sm:$0xff] %v7487_v8  ;;  %9575 = vst [vmem:[#allocation96_spill] sm:$0xff] %v7491_v61  ;;  %v7523_v9 = vadd.f32 %v7425_v27, %v7339_v49  ;;  %v7527_v58 = vadd.f32 %v7425_v27, %v7341_v32  ;;  %v7531_v43 = vadd.f32 %v7425_v27, %v7343_v56 }
 0x3cd   : > { %9576 = vst [vmem:[#allocation97_spill] sm:$0xff] %v7495_v28  ;;  %9577 = vst [vmem:[#allocation98_spill] sm:$0xff] %v7519_v51  ;;  %v7535_v24 = vadd.f32 %v7425_v27, %v7345_v5  ;;  %v7539_v1 = vadd.f32 %v7425_v27, %v7347_v36  ;;  %v7543_v49 = vadd.f32 %v7425_v27, %v7349_v39 }
 0x3ce   : > { %9578 = vst [vmem:[#allocation99_spill] sm:$0xff] %v7527_v58  ;;  %v7547_v32 = vadd.f32 %v7425_v27, %v7351_v13  ;;  %v7551_v56 = vadd.f32 %v7425_v27, %v7353_v15  ;;  %v7555_v5 = vadd.f32 %v7425_v27, %v7355_v41  ;;  %v7559_v36 = vadd.f32 %v7425_v27, %v7357_v26 }
 0x3cf   : > { %v7563_v39 = vadd.f32 %v7425_v27, %v7359_v31  ;;  %v7567_v13 = vadd.f32 %v7425_v27, %v7361_v63  ;;  %v7571_v15 = vadd.f32 %v7425_v27, %v7363_v25  ;;  %v7575_v41 = vadd.f32 %v7425_v27, %v7365_v0 }
 0x3d0   : > { %9579 = vst [vmem:[#allocation100_spill] sm:$0xff] %v7559_v36  ;;  %v7579_v26 = vadd.f32 %v7425_v27, %v7367_v17  ;;  %v7583_v31 = vadd.f32 %v7425_v27, %v7369_v37  ;;  %v7587_v63 = vadd.f32 %v7425_v27, %v7371_v18  ;;  %v7591_v25 = vadd.f32 %v7425_v27, %v7373_v42 }
 0x3d1   : > { %9580 = vst [vmem:[#allocation101_spill] sm:$0xff] %v7567_v13  ;;  %v7595_v0 = vadd.f32 %v7425_v27, %v7377_v59  ;;  %v7599_v17 = vadd.f32 %v7425_v27, %v7375_v19  ;;  %v7603_v37 = vadd.f32 %v7425_v27, %v7381_v40  ;;  %v7607_v18 = vadd.f32 %v7425_v27, %v7379_v45  ;;  %v2653_v19 = vpop.xlane.xlu1 %2652 }
 0x3d2   : > { %9581 = vst [vmem:[#allocation102_spill] sm:$0xff] %v7583_v31  ;;  %9582 = vst [vmem:[#allocation103_spill] sm:$0xff] %v7591_v25  ;;  %v7611_v42 = vadd.f32 %v7425_v27, %v7387_v14  ;;  %v7615_v59 = vadd.f32 %v7425_v27, %v7383_v50  ;;  %v7619_v4 = vadd.f32 %v7425_v27, %v7391_v11 }
 0x3d3   : > { %9583 = vst [vmem:[#allocation104_spill] sm:$0xff] %v7599_v17  ;;  %9584 = vst [vmem:[#allocation105_spill] sm:$0xff] %v7607_v18  ;;  %v7623_v40 = vadd.f32 %v7425_v27, %v7385_v22  ;;  %v7627_v45 = vadd.f32 %v7425_v27, %v7397_v23  ;;  %v7631_v14 = vadd.f32 %v7425_v27, %v7389_v54  ;;  %v9595_v18 = vld [vmem:[#allocation79_spill] sm:$0xff] }
 0x3d4   : > { %9585 = vst [vmem:[#allocation106_spill] sm:$0xff] %v7611_v42  ;;  %9586 = vst [vmem:[#allocation107_spill] sm:$0xff] %v7615_v59  ;;  %v7635_v50 = vadd.f32 %v7425_v27, %v7401_v52  ;;  %v7639_v11 = vadd.f32 %v7425_v27, %v7393_v44  ;;  %v7643_v22 = vadd.f32 %v7425_v27, %v9591_v2  ;;  %v9593_v42 = vld [vmem:[#allocation73_spill] sm:$0xff] }
 0x3d5   : > { %9587 = vst [vmem:[#allocation108_spill] sm:$0xff] %v7623_v40  ;;  %9588 = vst [vmem:[#allocation109_spill] sm:$0xff] %v7631_v14  ;;  %v7647_v23 = vadd.f32 %v7425_v27, %v9593_v42  ;;  %v7651_v54 = vadd.f32 %v7425_v27, %v9595_v18  ;;  %v9597_v14 = vld [vmem:[#allocation74_spill] sm:$0xff] }
 0x3d6   : > { %9589 = vst [vmem:[#allocation110_spill] sm:$0xff] %v7635_v50  ;;  %9590 = vst [vmem:[#allocation111_spill] sm:$0xff] %v7639_v11  ;;  %v7655_v52 = vadd.f32 %v7425_v27, %v9597_v14  ;;  %v9599_v50 = vld [vmem:[#allocation81_spill] sm:$0xff]  ;;  %v9601_v11 = vld [vmem:[#allocation75_spill] sm:$0xff]  ;;  %v7675_v14 = vadd.f32 %v7425_v27, %v7430_v21 }
 0x3d7   : > { %9592 = vst [vmem:[#allocation77_spill] sm:$0xff] %v7643_v22  ;;  %9594 = vst [vmem:[#allocation73_spill] sm:$0xff] %v7647_v23  ;;  %v7659_v44 = vadd.f32 %v7425_v27, %v9599_v50  ;;  %v7663_v2 = vadd.f32 %v7425_v27, %v9601_v11  ;;  %v9603_v22 = vld [vmem:[#allocation83_spill] sm:$0xff]  ;;  %v9604_v23 = vld [vmem:[#allocation76_spill] sm:$0xff] }
 0x3d8   : > { %9596 = vst [vmem:[#allocation79_spill] sm:$0xff] %v7651_v54  ;;  %9598 = vst [vmem:[#allocation74_spill] sm:$0xff] %v7655_v52  ;;  %v7667_v42 = vadd.f32 %v7425_v27, %v9603_v22  ;;  %v7671_v18 = vadd.f32 %v7425_v27, %v9604_v23  ;;  %v9607_v52 = vld [vmem:[#allocation78_spill] sm:$0xff]  ;;  %v2814_v22 = vrot.slane %v7459_v57, %v7433_v10 }
 0x3d9   : > { %9600 = vst [vmem:[#allocation81_spill] sm:$0xff] %v7659_v44  ;;  %9602 = vst [vmem:[#allocation75_spill] sm:$0xff] %v7663_v2  ;;  %v7679_v50 = vadd.f32 %v7425_v27, %v9607_v52  ;;  %v7682_v44 = vadd.f32 %v7425_v27, %v2647_v3  ;;  %v9610_v11 = vld [vmem:[#allocation86_spill] sm:$0xff]  ;;  %v2821_v23 = vrot.slane %v7463_v34, %v7436_v16 }
 0x3da   : > { %9605 = vst [vmem:[#allocation83_spill] sm:$0xff] %v7671_v18  ;;  %9606 = vst [vmem:[#allocation76_spill] sm:$0xff] %v7675_v14  ;;  %v2809_v2 = vrot.slane %v7446_v47, %v9610_v11  ;;  %v9611_v18 = vld [vmem:[#allocation80_spill] sm:$0xff]  ;;  %v7695_v52 = vadd.f32 %v7425_v27, %v2653_v19  ;;  %v9614_v14 = vld [vmem:[#allocation82_spill] sm:$0xff]  ;;  %v2828_v47 = vrot.slane %v7467_v7, %v7439_v62 }
 0x3db   : > { %9608 = vst [vmem:[#allocation78_spill] sm:$0xff] %v7679_v50  ;;  %9609 = vst [vmem:[#allocation112_spill] sm:$0xff] %v7682_v44  ;;  %v7692_v21 = vadd.f32 %v7425_v27, %v9611_v18  ;;  %v7699_v3 = vadd.f32 %v7425_v27, %v9614_v14  ;;  %v2659_v44 = vpop.xlane.xlu1 %2658  ;;  %v2862_v34 = vrot.slane %v7487_v8, %v9610_v11 }
 0x3dc   : > { %9613 = vst [vmem:[#allocation113_spill] sm:$0xff] %v7695_v52  ;;  %v2816_v57 = vsel %vm2815_vm7, %v2814_v22, %v2809_v2  ;;  %v2866_v18 = vrot.slane %v7491_v61, %v7433_v10  ;;  %v2871_v19 = vrot.slane %v7495_v28, %v7436_v16  ;;  %v2835_v14 = vrot.slane %v7471_v46, %v7442_v33 }
 0x3dd   : > { %9612 = vst [vmem:[#allocation80_spill] sm:$0xff] %v7692_v21  ;;  %v2823_v52 = vsel %vm2822_vm8, %v2821_v23, %v2816_v57  ;;  %v2842_v7 = vrot.slane %v7475_v6, %v7449_v60  ;;  %v2849_v2 = vrot.slane %v7479_v29, %v7452_v38  ;;  %v2876_v61 = vrot.slane %v7499_v20, %v7439_v62 }
 0x3de   : > { %v2830_v22 = vsel %vm2829_vm9, %v2828_v47, %v2823_v52  ;;  %v2867_v8 = vsel %vm2815_vm7, %v2866_v18, %v2862_v34  ;;  %v2881_v28 = vrot.slane %v7503_v35, %v7442_v33  ;;  %v2901_v6 = vrot.slane %v7519_v51, %v9610_v11 }
 0x3df   : > { %v2837_v57 = vsel %vm2836_vm10, %v2835_v14, %v2830_v22  ;;  %v2872_v23 = vsel %vm2822_vm8, %v2871_v19, %v2867_v8  ;;  %v2905_v29 = vrot.slane %v7523_v9, %v7433_v10  ;;  %v2886_v52 = vrot.slane %v7507_v48, %v7449_v60  ;;  %v2665_v51 = vpop.xlane.xlu1 %2664 }
 0x3e0   : > { %v2844_v47 = vsel %vm2843_vm11, %v2842_v7, %v2837_v57  ;;  %v2877_v34 = vsel %vm2829_vm9, %v2876_v61, %v2872_v23  ;;  %v2910_v18 = vrot.slane %v7527_v58, %v7436_v16  ;;  %v7736_v14 = vadd.f32 %v7425_v27, %v2659_v44  ;;  %v9615_v7 = vld [vmem:[#allocation84_spill] sm:$0xff] }
 0x3e1   : > { %v2882_v8 = vsel %vm2836_vm10, %v2881_v28, %v2877_v34  ;;  %v2906_v19 = vsel %vm2815_vm7, %v2905_v29, %v2901_v6  ;;  %v2915_v22 = vrot.slane %v7531_v43, %v7439_v62  ;;  %v7744_v61 = vadd.f32 %v7425_v27, %v9615_v7 }
 0x3e2   : > { %v2851_v57 = vsel %vm2850_vm12, %v2849_v2, %v2844_v47  ;;  %v2887_v23 = vsel %vm2843_vm11, %v2886_v52, %v2882_v8  ;;  %v2911_v58 = vsel %vm2822_vm8, %v2910_v18, %v2906_v19  ;;  %v7750_v44 = vadd.f32 %v7425_v27, %v2665_v51 }
 0x3e3   : > { %v2856_v6 = vrot.slane %v7483_v12, %v7455_v53  ;;  %v2891_v29 = vrot.slane %v7511_v30, %v7452_v38  ;;  %v2916_v28 = vsel %vm2829_vm9, %v2915_v22, %v2911_v58  ;;  %v2896_v34 = vrot.slane %v7515_v55, %v7455_v53 }
 0x3e4   : > { %v2920_v2 = vrot.slane %v7535_v24, %v7442_v33  ;;  %v2940_v47 = vrot.slane %v7551_v56, %v9610_v11  ;;  %v2944_v27 = vrot.slane %v7555_v5, %v7433_v10  ;;  %v2925_v58 = vrot.slane %v7539_v1, %v7449_v60 }
 0x3e5   : > { %v7766_v51 = vsel %vm2857_vm13, %v2856_v6, %v2851_v57  ;;  %v2892_v52 = vsel %vm2850_vm12, %v2891_v29, %v2887_v23  ;;  %v2949_v18 = vrot.slane %v7559_v36, %v7436_v16  ;;  %v2930_v19 = vrot.slane %v7543_v49, %v7452_v38 }
 0x3e6   : > { %v2921_v8 = vsel %vm2836_vm10, %v2920_v2, %v2916_v28  ;;  %v2945_v22 = vsel %vm2815_vm7, %v2944_v27, %v2940_v47  ;;  %v2954_v7 = vrot.slane %v7563_v39, %v7439_v62  ;;  %v2935_v57 = vrot.slane %v7547_v32, %v7455_v53 }
 0x3e7   : > { %v2950_v23 = vsel %vm2822_vm8, %v2949_v18, %v2945_v22  ;;  %v2959_v6 = vrot.slane %v7567_v13, %v7442_v33  ;;  %v2979_v29 = vrot.slane %v7583_v31, %v9610_v11  ;;  %v2964_v2 = vrot.slane %v7571_v15, %v7449_v60 }
 0x3e8   : > { %v2955_v28 = vsel %vm2829_vm9, %v2954_v7, %v2950_v23  ;;  %v2983_v47 = vrot.slane %v7587_v63, %v7433_v10  ;;  %v2988_v27 = vrot.slane %v7591_v25, %v7436_v16  ;;  %v7794_v36 = vsel %vm2857_vm13, %v2896_v34, %v2892_v52 }
 0x3e9   : > { %v2926_v18 = vsel %vm2843_vm11, %v2925_v58, %v2921_v8  ;;  %v2960_v22 = vsel %vm2836_vm10, %v2959_v6, %v2955_v28  ;;  %v2969_v31 = vrot.slane %v7575_v41, %v7452_v38  ;;  %v2993_v13 = vrot.slane %v7595_v0, %v7439_v62 }
 0x3ea   : > { %v2965_v7 = vsel %vm2843_vm11, %v2964_v2, %v2960_v22  ;;  %v2984_v23 = vsel %vm2815_vm7, %v2983_v47, %v2979_v29  ;;  %v3018_v25 = vrot.slane %v7615_v59, %v9610_v11  ;;  %v2998_v52 = vrot.slane %v7599_v17, %v7442_v33 }
 0x3eb   : > { %v2989_v34 = vsel %vm2822_vm8, %v2988_v27, %v2984_v23  ;;  %v3022_v58 = vrot.slane %v7619_v4, %v7433_v10  ;;  %v3027_v8 = vrot.slane %v7623_v40, %v7436_v16  ;;  %v2931_v6 = vsel %vm2850_vm12, %v2930_v19, %v2926_v18  ;;  %v9617_v40 = vld [vmem:[#allocation73_spill] sm:$0xff] }
 0x3ec   : > { %v2974_v29 = vrot.slane %v7579_v26, %v7455_v53  ;;  %v2994_v28 = vsel %vm2829_vm9, %v2993_v13, %v2989_v34  ;;  %v3003_v2 = vrot.slane %v7603_v37, %v7449_v60  ;;  %v2970_v47 = vsel %vm2850_vm12, %v2969_v31, %v2965_v7  ;;  %v9616_v13 = vld [vmem:[#allocation109_spill] sm:$0xff] }
 0x3ed   : > { %v2999_v27 = vsel %vm2836_vm10, %v2998_v52, %v2994_v28  ;;  %v3023_v22 = vsel %vm2815_vm7, %v3022_v58, %v3018_v25  ;;  %v3032_v23 = vrot.slane %v7627_v45, %v7439_v62  ;;  %v3037_v34 = vrot.slane %v9616_v13, %v7442_v33  ;;  %v9618_v31 = vld [vmem:[#allocation105_spill] sm:$0xff]  ;;  %v9619_v58 = vld [vmem:[#allocation74_spill] sm:$0xff] }
 0x3ee   : > { %v3004_v19 = vsel %vm2843_vm11, %v3003_v2, %v2999_v27  ;;  %v3028_v18 = vsel %vm2822_vm8, %v3027_v8, %v3023_v22  ;;  %v3057_v59 = vrot.slane %v9617_v40, %v9610_v11  ;;  %v3008_v7 = vrot.slane %v9618_v31, %v7452_v38  ;;  %v9620_v2 = vld [vmem:[#allocation106_spill] sm:$0xff] }
 0x3ef   : > { %v3033_v25 = vsel %vm2829_vm9, %v3032_v23, %v3028_v18  ;;  %v3061_v52 = vrot.slane %v7651_v54, %v7433_v10  ;;  %v3066_v28 = vrot.slane %v9619_v58, %v7436_v16  ;;  %v2936_v8 = vsel %vm2857_vm13, %v2935_v57, %v2931_v6  ;;  %v9621_v40 = vld [vmem:[#allocation110_spill] sm:$0xff]  ;;  %v9622_v58 = vld [vmem:[#allocation81_spill] sm:$0xff] }
 0x3f0   : > { %v3013_v27 = vrot.slane %v9620_v2, %v7455_v53  ;;  %v3038_v22 = vsel %vm2836_vm10, %v3037_v34, %v3033_v25  ;;  %v3042_v13 = vrot.slane %v9621_v40, %v7449_v60  ;;  %v2975_v23 = vsel %vm2857_vm13, %v2974_v29, %v2970_v47  ;;  %v9623_v34 = vld [vmem:[#allocation75_spill] sm:$0xff] }
 0x3f1   : > { %v3009_v18 = vsel %vm2850_vm12, %v3008_v7, %v3004_v19  ;;  %v3062_v31 = vsel %vm2815_vm7, %v3061_v52, %v3057_v59  ;;  %v3071_v17 = vrot.slane %v9622_v58, %v7439_v62  ;;  %v3076_v25 = vrot.slane %v9623_v34, %v7442_v33  ;;  %v9624_v59 = vld [vmem:[#allocation112_spill] sm:$0xff]  ;;  %v9628_v34 = vld [vmem:[#allocation113_spill] sm:$0xff] }
 0x3f2   : > { %v3043_v57 = vsel %vm2843_vm11, %v3042_v13, %v3038_v22  ;;  %v3067_v6 = vsel %vm2822_vm8, %v3066_v28, %v3062_v31  ;;  %v3096_v54 = vrot.slane %v7679_v50, %v9610_v11  ;;  %v3081_v47 = vrot.slane %v7667_v42, %v7449_v60  ;;  %v9625_v31 = vld [vmem:[#allocation111_spill] sm:$0xff]  ;;  %v9626_v28 = vld [vmem:[#allocation77_spill] sm:$0xff] }
 0x3f3   : > { %v3072_v29 = vsel %vm2829_vm9, %v3071_v17, %v3067_v6  ;;  %v3100_v19 = vrot.slane %v9624_v59, %v7433_v10  ;;  %v3105_v7 = vrot.slane %v7692_v21, %v7436_v16  ;;  %v3014_v13 = vsel %vm2857_vm13, %v3013_v27, %v3009_v18  ;;  %v9627_v6 = vld [vmem:[#allocation83_spill] sm:$0xff] }
 0x3f4   : > { %v3047_v52 = vrot.slane %v9625_v31, %v7452_v38  ;;  %v3052_v22 = vrot.slane %v9626_v28, %v7455_v53  ;;  %v3077_v11 = vsel %vm2836_vm10, %v3076_v25, %v3072_v29  ;;  %v3086_v50 = vrot.slane %v9627_v6, %v7452_v38 }
 0x3f5   : > { %v3082_v17 = vsel %vm2843_vm11, %v3081_v47, %v3077_v11  ;;  %v3101_v10 = vsel %vm2815_vm7, %v3100_v19, %v3096_v54  ;;  %v3110_v16 = vrot.slane %v9628_v34, %v7439_v62  ;;  %v3115_v21 = vrot.slane %v7699_v3, %v7442_v33 }
 0x3f6   : > { %v3048_v27 = vsel %vm2850_vm12, %v3047_v52, %v3043_v57  ;;  %v3106_v18 = vsel %vm2822_vm8, %v3105_v7, %v3101_v10  ;;  %v3133_v25 = vsel %vm3132_vm14, %v7794_v36, %v7766_v51  ;;  %v3087_v11 = vsel %vm2850_vm12, %v3086_v50, %v3082_v17  ;;  %v9629_v57 = vld [vmem:[#allocation76_spill] sm:$0xff] }
 0x3f7   : > { %v3111_v29 = vsel %vm2829_vm9, %v3110_v16, %v3106_v18  ;;  %v3120_v54 = vrot.slane %v7736_v14, %v7449_v60  ;;  %v3135_v47 = vsel %vm3134_vm15, %v2936_v8, %v3133_v25  ;;  %v3091_v19 = vrot.slane %v9629_v57, %v7455_v53 }
 0x3f8   : > { %v3116_v10 = vsel %vm2836_vm10, %v3115_v21, %v3111_v29  ;;  %v3125_v7 = vrot.slane %v7744_v61, %v7452_v38  ;;  %v3137_v52 = vsel %vm3136_vm0, %v2975_v23, %v3135_v47  ;;  %v3053_v36 = vsel %vm2857_vm13, %v3052_v22, %v3048_v27  ;;  %v9630_v27 = vld [vmem:[#allocation85_spill] sm:$0xff] }
 0x3f9   : > { %v3121_v50 = vsel %vm2843_vm11, %v3120_v54, %v3116_v10  ;;  %v3130_v16 = vrot.slane %v7750_v44, %v7455_v53  ;;  %v3139_v51 = vsel %vm3138_vm1, %v3014_v13, %v3137_v52  ;;  %v3092_v8 = vsel %vm2857_vm13, %v3091_v19, %v3087_v11  ;;  %v9631_v10 = vld [vmem:[#allocation89_spill] sm:$0xff]  ;;  %v9632_v52 = vld [vmem:[#allocation96_spill] sm:$0xff] }
 0x3fa   : > { %v3126_v17 = vsel %vm2850_vm12, %v3125_v7, %v3121_v50  ;;  %v3141_v21 = vsel %vm3140_vm2, %v3053_v36, %v3139_v51  ;;  %v9424_v29 = vsub.s32 0, %v9630_v27  ;;  %v9426_v54 = vsub.s32 1, %v9630_v27  ;;  %v9633_v50 = vld [vmem:[#allocation90_spill] sm:$0xff] }
 0x3fb   : > { %v3131_v18 = vsel %vm2857_vm13, %v3130_v16, %v3126_v17  ;;  %v3143_v25 = vsel %vm3142_vm3, %v3092_v8, %v3141_v21 }
 0x3fc   : > { %v3145_v23 = vsel %vm3144_vm4, %v3131_v18, %v3143_v25  ;;  %v9634_v25 = vld [vmem:[#allocation91_spill] sm:$0xff] }
 0x3fd   : > { %v3147_v22 = vsel %vm2473_vm6, %v3145_v23, -inf }
 0x3fe   : > { %3148 = vmax.xlane.f32.xlu1 %v3147_v22 }
 0x48b   : > { %v7905_v13 = vpop.xlane.xlu1 %3148 }
 0x48c   : > { %v3154_v11 = vrot.slane %v7905_v13, %v9424_v29  ;;  %v7913_v47 = vrot.slane %v7905_v13, %v9426_v54 }
 0x48e   : > { %v3198_v19 = vsub.f32 %v7483_v12, %v3154_v11  ;;  %v3191_v7 = vsub.f32 %v9631_v10, %v3154_v11  ;;  %v3200_v36 = vsub.f32 %v9632_v52, %v7913_v47  ;;  %v3192_v16 = vsub.f32 %v9633_v50, %v3154_v11 }
 0x48f   : > { %v3202_v21 = vsub.f32 %v7499_v20, %v7913_v47  ;;  %v3193_v23 = vsub.f32 %v9634_v25, %v3154_v11  ;;  %v9422_v12 = vsub.s32 2, %v9630_v27  ;;  %v3204_v10 = vsub.f32 %v7507_v48, %v7913_v47 }
 0x490   : > { %v3269_v51 = vmul.f32 1.442695, %v3198_v19  ;;  %v3255_v8 = vmul.f32 1.442695, %v3191_v7  ;;  %v3273_v17 = vmul.f32 1.442695, %v3200_v36  ;;  %v3206_v50 = vsub.f32 %v7515_v55, %v7913_v47 }
 0x491   : > { %v3257_v18 = vmul.f32 1.442695, %v3192_v16  ;;  %v3277_v22 = vmul.f32 1.442695, %v3202_v21  ;;  %v3259_v52 = vmul.f32 1.442695, %v3193_v23  ;;  %v7930_v36 = vrot.slane %v7905_v13, %v9422_v12 }
 0x492   : > { %5897 = vpow2.f32 %v3269_v51  ;;  %v9635_v19 = vld [vmem:[#allocation92_spill] sm:$0xff]  ;;  %v3281_v20 = vmul.f32 1.442695, %v3204_v10  ;;  %v3195_v51 = vsub.f32 %v7471_v46, %v3154_v11  ;;  %v9636_v55 = vld [vmem:[#allocation93_spill] sm:$0xff] }
 0x493   : > { %5899 = vpow2.f32 %v3255_v8  ;;  %v3194_v7 = vsub.f32 %v9635_v19, %v3154_v11  ;;  %v3208_v21 = vsub.f32 %v7523_v9, %v7930_v36  ;;  %v3196_v25 = vsub.f32 %v9636_v55, %v3154_v11  ;;  %v9637_v9 = vld [vmem:[#allocation94_spill] sm:$0xff] }
 0x494   : > { %5901 = vpow2.f32 %v3273_v17  ;;  %v3285_v17 = vmul.f32 1.442695, %v3206_v50  ;;  %v3210_v10 = vsub.f32 %v7531_v43, %v7930_v36  ;;  %v3197_v19 = vsub.f32 %v9637_v9, %v3154_v11 }
 0x495   : > { %5903 = vpow2.f32 %v3257_v18  ;;  %v3261_v16 = vmul.f32 1.442695, %v3194_v7  ;;  %v3263_v18 = vmul.f32 1.442695, %v3195_v51  ;;  %v9421_v50 = vsub.s32 3, %v9630_v27 }
 0x496   : > { %5905 = vpow2.f32 %v3277_v22  ;;  %v3289_v22 = vmul.f32 1.442695, %v3208_v21  ;;  %v3212_v51 = vsub.f32 %v7539_v1, %v7930_v36  ;;  %v3267_v43 = vmul.f32 1.442695, %v3197_v19 }
 0x497   : > { %5907 = vpow2.f32 %v3259_v52  ;;  %v3265_v52 = vmul.f32 1.442695, %v3196_v25  ;;  %v7972_v55 = vrot.slane %v7905_v13, %v9421_v50  ;;  %v3214_v25 = vsub.f32 %v7547_v32, %v7930_v36 }
 0x498   : > { %5909 = vpow2.f32 %v3281_v20  ;;  %v3297_v1 = vmul.f32 1.442695, %v3212_v51  ;;  %v3203_v51 = vsub.f32 %v7503_v35, %v7913_v47 }
 0x499   : > { %5911 = vpow2.f32 %v3261_v16  ;;  %v3293_v16 = vmul.f32 1.442695, %v3210_v10  ;;  %v9641_v10 = vld [vmem:[#allocation97_spill] sm:$0xff] }
 0x49a   : > { %5913 = vpow2.f32 %v3285_v17  ;;  %v9639_v17 = vld [vmem:[#allocation95_spill] sm:$0xff] }
 0x49b   : > { %5915 = vpow2.f32 %v3263_v18  ;;  %v3199_v11 = vsub.f32 %v9639_v17, %v7913_v47  ;;  %v3301_v17 = vmul.f32 1.442695, %v3214_v25  ;;  %v3205_v25 = vsub.f32 %v7511_v30, %v7913_v47 }
 0x49c   : > { %v7935_v8 = vpop.eup %5897  ;;  %5917 = vpow2.f32 %v3289_v22 }
 0x49d   : > { %v7937_v48 = vpop.eup %5899  ;;  %3469 = vperm.xlu0 %5895, %v7935_v8   ;;  %5919 = vpow2.f32 %v3265_v52  ;;  %v3271_v22 = vmul.f32 1.442695, %v3199_v11  ;;  %v3201_v52 = vsub.f32 %v9641_v10, %v7913_v47 }
 0x49e   : > { %3448 = vperm.xlu1 %5896, %v7937_v48   ;;  %v7944_v23 = vpop.eup %5901  ;;  %5921 = vpow2.f32 %v3293_v16  ;;  %v3216_v16 = vsub.f32 %v7555_v5, %v7972_v55  ;;  %v3279_v5 = vmul.f32 1.442695, %v3203_v51 }
 0x49f   : > { %v7946_v46 = vpop.eup %5903  ;;  %5923 = vpow2.f32 %v3267_v43  ;;  %v3275_v32 = vmul.f32 1.442695, %v3201_v52  ;;  %v9423_v52 = vsub.s32 4, %v9630_v27 }
 0x4a0   : > { %v7953_v7 = vpop.eup %5905  ;;  %5925 = vpow2.f32 %v3297_v1  ;;  %v3305_v10 = vmul.f32 1.442695, %v3216_v16  ;;  %v3218_v1 = vsub.f32 %v7563_v39, %v7972_v55  ;;  %v3220_v39 = vsub.f32 %v7571_v15, %v7972_v55 }
 0x4a1   : > { %3475 = vperm.xlu0 %5895, %v7944_v23   ;;  %9638 = vst [vmem:[#allocation82_spill] sm:$0xff] %v7953_v7  ;;  %v7955_v20 = vpop.eup %5907  ;;  %5927 = vpow2.f32 %v3271_v22  ;;  %v3283_v16 = vmul.f32 1.442695, %v3205_v25  ;;  %v8018_v50 = vrot.slane %v7905_v13, %v9423_v52 }
 0x4a2   : > { %3451 = vperm.xlu1 %5896, %v7946_v46   ;;  %v7964_v21 = vpop.eup %5909  ;;  %5929 = vpow2.f32 %v3301_v17  ;;  %v3309_v17 = vmul.f32 1.442695, %v3218_v1  ;;  %v3313_v15 = vmul.f32 1.442695, %v3220_v39  ;;  %v3211_v39 = vsub.f32 %v7535_v24, %v7930_v36 }
 0x4a3   : > { %9640 = vst [vmem:[#allocation84_spill] sm:$0xff] %v7964_v21  ;;  %v7966_v18 = vpop.eup %5911  ;;  %5931 = vpow2.f32 %v3275_v32  ;;  %v9645_v32 = vld [vmem:[#allocation98_spill] sm:$0xff] }
 0x4a4   : > { %v7979_v9 = vpop.eup %5913  ;;  %5933 = vpow2.f32 %v3305_v10  ;;  %v3207_v30 = vsub.f32 %v9645_v32, %v7930_v36  ;;  %v3222_v10 = vsub.f32 %v7579_v26, %v7972_v55 }
 0x4a5   : > { %3481 = vperm.xlu0 %5895, %v7953_v7   ;;  %9642 = vst [vmem:[#allocation106_spill] sm:$0xff] %v7979_v9  ;;  %v7981_v19 = vpop.eup %5915  ;;  %5935 = vpow2.f32 %v3279_v5  ;;  %v9647_v5 = vld [vmem:[#allocation99_spill] sm:$0xff] }
 0x4a6   : > { %3454 = vperm.xlu1 %5896, %v7955_v20   ;;  %v7989_v43 = vpop.eup %5917  ;;  %5937 = vpow2.f32 %v3309_v17  ;;  %v3287_v1 = vmul.f32 1.442695, %v3207_v30  ;;  %v3209_v25 = vsub.f32 %v9647_v5, %v7930_v36  ;;  %v3317_v52 = vmul.f32 1.442695, %v3222_v10 }
 0x4a7   : > { %9643 = vst [vmem:[#allocation110_spill] sm:$0xff] %v7989_v43  ;;  %v7991_v11 = vpop.eup %5919  ;;  %5939 = vpow2.f32 %v3283_v16  ;;  %v3224_v17 = vsub.f32 %v7587_v63, %v8018_v50  ;;  %v3295_v63 = vmul.f32 1.442695, %v3211_v39  ;;  %v3213_v10 = vsub.f32 %v7543_v49, %v7930_v36 }
 0x4a8   : > { %v7999_v22 = vpop.eup %5921  ;;  %5941 = vpow2.f32 %v3313_v15  ;;  %v3291_v26 = vmul.f32 1.442695, %v3209_v25  ;;  %v3226_v15 = vsub.f32 %v7595_v0, %v8018_v50  ;;  %v9425_v25 = vsub.s32 5, %v9630_v27 }
 0x4a9   : > { %3487 = vperm.xlu0 %5895, %v7964_v21   ;;  %9644 = vst [vmem:[#allocation81_spill] sm:$0xff] %v7999_v22  ;;  %v8001_v35 = vpop.eup %5923  ;;  %5943 = vpow2.f32 %v3287_v1  ;;  %v3321_v5 = vmul.f32 1.442695, %v3224_v17  ;;  %v3228_v0 = vsub.f32 %v7603_v37, %v8018_v50  ;;  %v3299_v17 = vmul.f32 1.442695, %v3213_v10 }
 0x4aa   : > { %3457 = vperm.xlu1 %5896, %v7966_v18   ;;  %v8010_v47 = vpop.eup %5925  ;;  %5945 = vpow2.f32 %v3317_v52  ;;  %v3325_v52 = vmul.f32 1.442695, %v3226_v15  ;;  %v3215_v49 = vsub.f32 %v7551_v56, %v7972_v55  ;;  %v8064_v39 = vrot.slane %v7905_v13, %v9425_v25  ;;  %v9654_v15 = vld [vmem:[#allocation100_spill] sm:$0xff] }
 0x4ab   : > { %9646 = vst [vmem:[#allocation112_spill] sm:$0xff] %v8010_v47  ;;  %v8012_v51 = vpop.eup %5927  ;;  %5947 = vpow2.f32 %v3291_v26  ;;  %v3329_v37 = vmul.f32 1.442695, %v3228_v0  ;;  %v9656_v0 = vld [vmem:[#allocation101_spill] sm:$0xff] }
 0x4ac   : > { %v8025_v32 = vpop.eup %5929  ;;  %5949 = vpow2.f32 %v3321_v5  ;;  %v3230_v5 = vsub.f32 %v9620_v2, %v8018_v50  ;;  %v3303_v56 = vmul.f32 1.442695, %v3215_v49 }
 0x4ad   : > { %3493 = vperm.xlu0 %5895, %v7979_v9   ;;  %9648 = vst [vmem:[#allocation111_spill] sm:$0xff] %v8025_v32  ;;  %v8027_v12 = vpop.eup %5931  ;;  %5951 = vpow2.f32 %v3295_v63  ;;  %v3217_v63 = vsub.f32 %v9654_v15, %v7972_v55  ;;  %v9705_v9 = vld [vmem:[#allocation88_spill] sm:$0xff] }
 0x4ae   : > { %3460 = vperm.xlu1 %5896, %v7981_v19   ;;  %9649 = vst [vmem:[#allocation77_spill] sm:$0xff] %v8027_v12  ;;  %v8035_v16 = vpop.eup %5933  ;;  %5953 = vpow2.f32 %v3325_v52  ;;  %v3333_v25 = vmul.f32 1.442695, %v3230_v5  ;;  %v3232_v52 = vsub.f32 %v7619_v4, %v8064_v39  ;;  %v3221_v5 = vsub.f32 %v7575_v41, %v7972_v55 }
 0x4af   : > { %9650 = vst [vmem:[#allocation83_spill] sm:$0xff] %v8035_v16  ;;  %v8037_v30 = vpop.eup %5935  ;;  %5955 = vpow2.f32 %v3299_v17  ;;  %v3307_v2 = vmul.f32 1.442695, %v3217_v63  ;;  %v3219_v17 = vsub.f32 %v9656_v0, %v7972_v55  ;;  %v9429_v0 = vsub.s32 6, %v9630_v27 }
 0x4b0   : > { %9651 = vst [vmem:[#allocation113_spill] sm:$0xff] %v8037_v30  ;;  %v8045_v1 = vpop.eup %5937  ;;  %5957 = vpow2.f32 %v3329_v37  ;;  %v3337_v54 = vmul.f32 1.442695, %v3232_v52  ;;  %v3234_v37 = vsub.f32 %v7627_v45, %v8064_v39  ;;  %v3236_v45 = vsub.f32 %v9621_v40, %v8064_v39 }
 0x4b1   : > { %3499 = vperm.xlu0 %5895, %v7989_v43   ;;  %9652 = vst [vmem:[#allocation76_spill] sm:$0xff] %v8045_v1  ;;  %v8047_v24 = vpop.eup %5939  ;;  %5959 = vpow2.f32 %v3303_v56  ;;  %v3311_v4 = vmul.f32 1.442695, %v3219_v17  ;;  %v3315_v52 = vmul.f32 1.442695, %v3221_v5 }
 0x4b2   : > { %3463 = vperm.xlu1 %5896, %v7991_v11   ;;  %v8056_v36 = vpop.eup %5941  ;;  %5961 = vpow2.f32 %v3333_v25  ;;  %v3341_v25 = vmul.f32 1.442695, %v3234_v37  ;;  %v3345_v40 = vmul.f32 1.442695, %v3236_v45 }
 0x4b3   : > { %9653 = vst [vmem:[#allocation85_spill] sm:$0xff] %v8056_v36  ;;  %v8058_v26 = vpop.eup %5943  ;;  %5963 = vpow2.f32 %v3307_v2  ;;  %v9659_v2 = vld [vmem:[#allocation102_spill] sm:$0xff] }
 0x4b4   : > { %v8071_v10 = vpop.eup %5945  ;;  %5965 = vpow2.f32 %v3337_v54  ;;  %v3223_v41 = vsub.f32 %v9659_v2, %v8018_v50  ;;  %v3238_v54 = vsub.f32 %v9626_v28, %v8064_v39 }
 0x4b5   : > { %3505 = vperm.xlu0 %5895, %v7999_v22   ;;  %9655 = vst [vmem:[#allocation89_spill] sm:$0xff] %v8071_v10  ;;  %v8073_v29 = vpop.eup %5947  ;;  %5967 = vpow2.f32 %v3311_v4  ;;  %v9661_v4 = vld [vmem:[#allocation103_spill] sm:$0xff] }
 0x4b6   : > { %3466 = vperm.xlu1 %5896, %v8001_v35   ;;  %v8081_v49 = vpop.eup %5949  ;;  %5969 = vpow2.f32 %v3341_v25  ;;  %v3319_v37 = vmul.f32 1.442695, %v3223_v41  ;;  %v3225_v5 = vsub.f32 %v9661_v4, %v8018_v50  ;;  %v9663_v25 = vld [vmem:[#allocation79_spill] sm:$0xff] }
 0x4b7   : > { %9657 = vst [vmem:[#allocation96_spill] sm:$0xff] %v8081_v49  ;;  %v8083_v15 = vpop.eup %5951  ;;  %5971 = vpow2.f32 %v3315_v52  ;;  %v9664_v52 = vld [vmem:[#allocation104_spill] sm:$0xff] }
 0x4b8   : > { %v8091_v56 = vpop.eup %5953  ;;  %5973 = vpow2.f32 %v3345_v40  ;;  %v3323_v28 = vmul.f32 1.442695, %v3225_v5  ;;  %v3227_v41 = vsub.f32 %v9664_v52, %v8018_v50 }
 0x4b9   : > { %3511 = vperm.xlu0 %5895, %v8010_v47   ;;  %9658 = vst [vmem:[#allocation90_spill] sm:$0xff] %v8091_v56  ;;  %v8093_v63 = vpop.eup %5955  ;;  %5975 = vpow2.f32 %v3319_v37  ;;  %v9666_v37 = vld [vmem:[#allocation105_spill] sm:$0xff]  ;;  %v9703_v47 = vld [vmem:[#allocation86_spill] sm:$0xff] }
 0x4ba   : > { %3472 = vperm.xlu1 %5896, %v8012_v51   ;;  %v8102_v55 = vpop.eup %5957  ;;  %v3229_v5 = vsub.f32 %v9666_v37, %v8018_v50 }
 0x4bb   : > { %9660 = vst [vmem:[#allocation91_spill] sm:$0xff] %v8102_v55  ;;  %v8104_v17 = vpop.eup %5959 }
 0x4bc   : > { %v8117_v2 = vpop.eup %5961 }
 0x4bd   : > { %3517 = vperm.xlu0 %5895, %v8025_v32   ;;  %9662 = vst [vmem:[#allocation92_spill] sm:$0xff] %v8117_v2 }
 0x4be   : > { %3478 = vperm.xlu1 %5896, %v8027_v12  }
 0x4c1   : > { %3523 = vperm.xlu0 %5895, %v8035_v16  }
 0x4c2   : > { %3484 = vperm.xlu1 %5896, %v8037_v30  }
 0x4c5   : > { %3529 = vperm.xlu0 %5895, %v8045_v1  }
 0x4c6   : > { %3490 = vperm.xlu1 %5896, %v8047_v24  }
 0x4c9   : > { %3535 = vperm.xlu0 %5895, %v8056_v36  }
 0x4ca   : > { %3496 = vperm.xlu1 %5896, %v8058_v26  }
 0x4cd   : > { %3541 = vperm.xlu0 %5895, %v8071_v10  }
 0x4ce   : > { %3502 = vperm.xlu1 %5896, %v8073_v29  }
 0x4d1   : > { %3547 = vperm.xlu0 %5895, %v8081_v49  }
 0x4d2   : > { %3508 = vperm.xlu1 %5896, %v8083_v15  }
 0x4d5   : > { %3553 = vperm.xlu0 %5895, %v8091_v56   ;;  %v8110_v56 = vrot.slane %v7905_v13, %v9429_v0  ;;  %v3349_v0 = vmul.f32 1.442695, %v3238_v54  ;;  %v3327_v54 = vmul.f32 1.442695, %v3227_v41 }
 0x4d6   : > { %3514 = vperm.xlu1 %5896, %v8093_v63  }
 0x4d7   : > { %v3240_v45 = vsub.f32 %v9663_v25, %v8110_v56  ;;  %5977 = vpow2.f32 %v3349_v0  ;;  %v3242_v40 = vsub.f32 %v9622_v58, %v8110_v56  ;;  %v3244_v58 = vsub.f32 %v7667_v42, %v8110_v56 }
 0x4d8   : > { %5979 = vpow2.f32 %v3323_v28  ;;  %v9669_v28 = vld [vmem:[#allocation107_spill] sm:$0xff] }
 0x4d9   : > { %3559 = vperm.xlu0 %5895, %v8102_v55   ;;  %v8119_v55 = vpop.eup %5963  ;;  %v3357_v0 = vmul.f32 1.442695, %v3242_v40  ;;  %v3231_v50 = vsub.f32 %v9669_v28, %v8064_v39  ;;  %v3361_v42 = vmul.f32 1.442695, %v3244_v58  ;;  %v9675_v58 = vld [vmem:[#allocation109_spill] sm:$0xff] }
 0x4da   : > { %3520 = vperm.xlu1 %5896, %v8104_v17   ;;  %v8127_v49 = vpop.eup %5965 }
 0x4db   : > { %9665 = vst [vmem:[#allocation93_spill] sm:$0xff] %v8127_v49  ;;  %v8129_v4 = vpop.eup %5967  ;;  %v3335_v40 = vmul.f32 1.442695, %v3231_v50 }
 0x4dc   : > { %v8137_v25 = vpop.eup %5969 }
 0x4dd   : > { %3565 = vperm.xlu0 %5895, %v8117_v2   ;;  %v3353_v2 = vmul.f32 1.442695, %v3240_v45  ;;  %9667 = vst [vmem:[#allocation94_spill] sm:$0xff] %v8137_v25  ;;  %v8139_v52 = vpop.eup %5971  ;;  %v3331_v45 = vmul.f32 1.442695, %v3229_v5 }
 0x4de   : > { %3526 = vperm.xlu1 %5896, %v8119_v55   ;;  %9668 = vst [vmem:[#allocation95_spill] sm:$0xff] %v8139_v52  ;;  %v8148_v41 = vpop.eup %5973 }
 0x4df   : > { %5981 = vpow2.f32 %v3353_v2  ;;  %9670 = vst [vmem:[#allocation97_spill] sm:$0xff] %v8148_v41  ;;  %v8150_v37 = vpop.eup %5975  ;;  %v3246_v2 = vsub.f32 %v9629_v57, %v8110_v56 }
 0x4e0   : > { %5983 = vpow2.f32 %v3327_v54  ;;  %9671 = vst [vmem:[#allocation98_spill] sm:$0xff] %v8150_v37  ;;  %v9672_v54 = vld [vmem:[#allocation108_spill] sm:$0xff] }
 0x4e1   : > { %3571 = vperm.xlu0 %5895, %v8127_v49   ;;  %v9435_v49 = vsub.s32 7, %v9630_v27  ;;  %5985 = vpow2.f32 %v3357_v0  ;;  %v3233_v5 = vsub.f32 %v9672_v54, %v8064_v39  ;;  %v8163_v28 = vpop.eup %5977 }
 0x4e2   : > { %3532 = vperm.xlu1 %5896, %v8129_v4   ;;  %5987 = vpow2.f32 %v3331_v45  ;;  %9673 = vst [vmem:[#allocation99_spill] sm:$0xff] %v8163_v28  ;;  %v3235_v45 = vsub.f32 %v9675_v58, %v8064_v39 }
 0x4e3   : > { %v8156_v10 = vrot.slane %v7905_v13, %v9435_v49  ;;  %5989 = vpow2.f32 %v3361_v42  ;;  %v3365_v13 = vmul.f32 1.442695, %v3246_v2  ;;  %v3339_v57 = vmul.f32 1.442695, %v3233_v5 }
 0x4e4   : > { %5991 = vpow2.f32 %v3335_v40  ;;  %v3237_v2 = vsub.f32 %v9625_v31, %v8064_v39 }
 0x4e5   : > { %3577 = vperm.xlu0 %5895, %v8137_v25   ;;  %v3248_v0 = vsub.f32 %v9624_v59, %v8156_v10  ;;  %5993 = vpow2.f32 %v3365_v13  ;;  %v3250_v42 = vsub.f32 %v9628_v34, %v8156_v10  ;;  %v3343_v59 = vmul.f32 1.442695, %v3235_v45 }
 0x4e6   : > { %3538 = vperm.xlu1 %5896, %v8139_v52   ;;  %5995 = vpow2.f32 %v3339_v57  ;;  %v3252_v13 = vsub.f32 %v7736_v14, %v8156_v10  ;;  %v3347_v34 = vmul.f32 1.442695, %v3237_v2 }
 0x4e7   : > { %v3369_v49 = vmul.f32 1.442695, %v3248_v0  ;;  %v3373_v58 = vmul.f32 1.442695, %v3250_v42  ;;  %v9680_v0 = vld [vmem:[#allocation73_spill] sm:$0xff]  ;;  %v9683_v42 = vld [vmem:[#allocation74_spill] sm:$0xff] }
 0x4e8   : > { %v3239_v57 = vsub.f32 %v9680_v0, %v8110_v56  ;;  %v3377_v39 = vmul.f32 1.442695, %v3252_v13  ;;  %v9686_v13 = vld [vmem:[#allocation75_spill] sm:$0xff] }
 0x4e9   : > { %3583 = vperm.xlu0 %5895, %v8148_v41   ;;  %v8165_v41 = vpop.eup %5979  ;;  %5997 = vpow2.f32 %v3369_v49  ;;  %v3254_v49 = vsub.f32 %v7750_v44, %v8156_v10  ;;  %v3243_v44 = vsub.f32 %v9686_v13, %v8110_v56  ;;  %v9691_v13 = vld [vmem:[#allocation78_spill] sm:$0xff] }
 0x4ea   : > { %3544 = vperm.xlu1 %5896, %v8150_v37   ;;  %9674 = vst [vmem:[#allocation100_spill] sm:$0xff] %v8165_v41  ;;  %v8173_v50 = vpop.eup %5981  ;;  %5999 = vpow2.f32 %v3343_v59  ;;  %v3351_v14 = vmul.f32 1.442695, %v3239_v57  ;;  %v3241_v59 = vsub.f32 %v9683_v42, %v8110_v56 }
 0x4eb   : > { %9676 = vst [vmem:[#allocation101_spill] sm:$0xff] %v8173_v50  ;;  %v8175_v54 = vpop.eup %5983  ;;  %6001 = vpow2.f32 %v3373_v58  ;;  %v3359_v42 = vmul.f32 1.442695, %v3243_v44 }
 0x4ec   : > { %9677 = vst [vmem:[#allocation102_spill] sm:$0xff] %v8175_v54  ;;  %v8183_v40 = vpop.eup %5985  ;;  %6003 = vpow2.f32 %v3347_v34  ;;  %v3355_v58 = vmul.f32 1.442695, %v3241_v59 }
 0x4ed   : > { %3589 = vperm.xlu0 %5895, %v8163_v28   ;;  %9678 = vst [vmem:[#allocation103_spill] sm:$0xff] %v8183_v40  ;;  %v8185_v5 = vpop.eup %5987  ;;  %6005 = vpow2.f32 %v3377_v39  ;;  %v3245_v39 = vsub.f32 %v9627_v6, %v8110_v56  ;;  %v9694_v56 = vld [vmem:[#allocation80_spill] sm:$0xff] }
 0x4ee   : > { %3550 = vperm.xlu1 %5896, %v8165_v41   ;;  %9679 = vst [vmem:[#allocation79_spill] sm:$0xff] %v8185_v5  ;;  %v8193_v45 = vpop.eup %5989  ;;  %6007 = vpow2.f32 %v3351_v14 }
 0x4ef   : > { %9681 = vst [vmem:[#allocation104_spill] sm:$0xff] %v8193_v45  ;;  %v8195_v31 = vpop.eup %5991  ;;  %v3363_v59 = vmul.f32 1.442695, %v3245_v39 }
 0x4f0   : > { %9682 = vst [vmem:[#allocation105_spill] sm:$0xff] %v8195_v31  ;;  %v8203_v2 = vpop.eup %5993 }
 0x4f1   : > { %3595 = vperm.xlu0 %5895, %v8173_v50   ;;  %9684 = vst [vmem:[#allocation107_spill] sm:$0xff] %v8203_v2  ;;  %v8205_v0 = vpop.eup %5995  ;;  %v3381_v50 = vmul.f32 1.442695, %v3254_v49 }
 0x4f2   : > { %3556 = vperm.xlu1 %5896, %v8175_v54   ;;  %9685 = vst [vmem:[#allocation108_spill] sm:$0xff] %v8205_v0 }
 0x4f3   : > { %v8211_v34 = vpop.eup %5997  ;;  %6009 = vpow2.f32 %v3381_v50 }
 0x4f4   : > { %9687 = vst [vmem:[#allocation109_spill] sm:$0xff] %v8211_v34  ;;  %v8213_v57 = vpop.eup %5999  ;;  %6011 = vpow2.f32 %v3355_v58  ;;  %v3249_v58 = vsub.f32 %v9694_v56, %v8156_v10 }
 0x4f5   : > { %3601 = vperm.xlu0 %5895, %v8183_v40   ;;  %9688 = vst [vmem:[#allocation73_spill] sm:$0xff] %v8213_v57  ;;  %v8219_v49 = vpop.eup %6001  ;;  %6013 = vpow2.f32 %v3359_v42 }
 0x4f6   : > { %3562 = vperm.xlu1 %5896, %v8185_v5   ;;  %9689 = vst [vmem:[#allocation74_spill] sm:$0xff] %v8219_v49  ;;  %v8221_v14 = vpop.eup %6003  ;;  %6015 = vpow2.f32 %v3363_v59  ;;  %v3371_v39 = vmul.f32 1.442695, %v3249_v58  ;;  %v3253_v59 = vsub.f32 %v7744_v61, %v8156_v10 }
 0x4f7   : > { %9690 = vst [vmem:[#allocation75_spill] sm:$0xff] %v8221_v14 }
 0x4f9   : > { %3607 = vperm.xlu0 %5895, %v8193_v45  }
 0x4fa   : > { %3568 = vperm.xlu1 %5896, %v8195_v31  }
 0x4fd   : > { %3613 = vperm.xlu0 %5895, %v8203_v2   ;;  %v3247_v2 = vsub.f32 %v9691_v13, %v8156_v10  ;;  %v3251_v13 = vsub.f32 %v7699_v3, %v8156_v10 }
 0x4fe   : > { %3574 = vperm.xlu1 %5896, %v8205_v0  }
 0x4ff   : > { %v3367_v6 = vmul.f32 1.442695, %v3247_v2  ;;  %v3375_v2 = vmul.f32 1.442695, %v3251_v13 }
 0x501   : > { %3619 = vperm.xlu0 %5895, %v8211_v34   ;;  %6017 = vpow2.f32 %v3367_v6 }
 0x502   : > { %3580 = vperm.xlu1 %5896, %v8213_v57   ;;  %v8227_v57 = vpop.eup %6005  ;;  %6019 = vpow2.f32 %v3371_v39 }
 0x503   : > { %9692 = vst [vmem:[#allocation78_spill] sm:$0xff] %v8227_v57  ;;  %v8229_v50 = vpop.eup %6007  ;;  %6021 = vpow2.f32 %v3375_v2 }
 0x504   : > { %9693 = vst [vmem:[#allocation114_spill] sm:$0xff] %v8229_v50  ;;  %v8235_v44 = vpop.eup %6009 }
 0x505   : > { %3625 = vperm.xlu0 %5895, %v8219_v49   ;;  %9695 = vst [vmem:[#allocation80_spill] sm:$0xff] %v8235_v44  ;;  %v8237_v42 = vpop.eup %6011 }
 0x506   : > { %3586 = vperm.xlu1 %5896, %v8221_v14   ;;  %9696 = vst [vmem:[#allocation115_spill] sm:$0xff] %v8237_v42  ;;  %v8243_v14 = vpop.eup %6013 }
 0x507   : > { %9697 = vst [vmem:[#allocation116_spill] sm:$0xff] %v8243_v14  ;;  %v8248_v56 = vpop.eup %6015 }
 0x508   : > { %9698 = vst [vmem:[#allocation117_spill] sm:$0xff] %v8248_v56 }
 0x509   : > { %3631 = vperm.xlu0 %5895, %v8227_v57  }
 0x50a   : > { %3592 = vperm.xlu1 %5896, %v8229_v50   ;;  %v9704_v50 = vld [vmem:[#allocation87_spill] sm:$0xff] }
 0x50b   : > { %v8251_v6 = vpop.eup %6017 }
 0x50c   : > { %9699 = vst [vmem:[#allocation118_spill] sm:$0xff] %v8251_v6  ;;  %v8256_v58 = vpop.eup %6019 }
 0x50d   : > { %3637 = vperm.xlu0 %5895, %v8235_v44   ;;  %v3379_v44 = vmul.f32 1.442695, %v3253_v59  ;;  %9700 = vst [vmem:[#allocation119_spill] sm:$0xff] %v8256_v58  ;;  %v8261_v10 = vpop.eup %6021 }
 0x50e   : > { %3598 = vperm.xlu1 %5896, %v8237_v42   ;;  %9701 = vst [vmem:[#allocation120_spill] sm:$0xff] %v8261_v10 }
 0x50f   : > { %6023 = vpow2.f32 %v3379_v44 }
 0x512   : > { %3604 = vperm.xlu1 %5896, %v8243_v14  }
 0x516   : > { %3610 = vperm.xlu1 %5896, %v8248_v56  }
 0x519   : > { %v8266_v59 = vpop.eup %6023 }
 0x51a   : > { %3616 = vperm.xlu1 %5896, %v8251_v6   ;;  %9702 = vst [vmem:[#allocation121_spill] sm:$0xff] %v8266_v59 }
 0x51c   : > { %v8254_v3 = vpop.permute.xlu0 %3469 }
 0x51d   : > { %v8258_v39 = vpop.permute.xlu1 %3448 }
 0x51e   : > { %3622 = vperm.xlu1 %5896, %v8256_v58  }
 0x520   : > { %v3476_v61 = vpop.permute.xlu0 %3475 }
 0x521   : > { %v8263_v13 = vpop.permute.xlu1 %3451 }
 0x522   : > { %3628 = vperm.xlu1 %5896, %v8261_v10  }
 0x524   : > { %v3482_v2 = vpop.permute.xlu0 %3481 }
 0x525   : > { %v8268_v56 = vpop.permute.xlu1 %3454 }
 0x526   : > { %3634 = vperm.xlu1 %5896, %v8266_v59  }
 0x528   : > { %v8271_v44 = vpop.permute.xlu0 %3487 }
 0x529   : > { %v8273_v14 = vpop.permute.xlu1 %3457 }
 0x52c   : > { %v8275_v42 = vpop.permute.xlu0 %3493 }
 0x52d   : > { %v8277_v58 = vpop.permute.xlu1 %3460 }
 0x530   : > { %v3500_v6 = vpop.permute.xlu0 %3499 }
 0x531   : > { %v8279_v28 = vpop.permute.xlu1 %3463  ;;  %v3724_v43 = vrot.slane %v3500_v6, %v9704_v50 }
 0x534   : > { %v3506_v57 = vpop.permute.xlu0 %3505 }
 0x535   : > { %v8281_v10 = vpop.permute.xlu1 %3466  ;;  %v3734_v41 = vrot.slane %v3506_v57, %v7439_v62 }
 0x538   : > { %v3512_v45 = vpop.permute.xlu0 %3511 }
 0x539   : > { %v3473_v36 = vpop.permute.xlu1 %3472  ;;  %v3744_v6 = vrot.slane %v3512_v45, %v7449_v60 }
 0x53c   : > { %v8283_v49 = vpop.permute.xlu0 %3517 }
 0x53d   : > { %v3479_v1 = vpop.permute.xlu1 %3478 }
 0x540   : > { %v3524_v59 = vpop.permute.xlu0 %3523 }
 0x541   : > { %v3485_v40 = vpop.permute.xlu1 %3484 }
 0x544   : > { %v8285_v16 = vpop.permute.xlu0 %3529 }
 0x545   : > { %v3491_v25 = vpop.permute.xlu1 %3490 }
 0x548   : > { %v8287_v32 = vpop.permute.xlu0 %3535 }
 0x549   : > { %v3497_v34 = vpop.permute.xlu1 %3496 }
 0x54a   : > { %v3720_v0 = vrot.slane %v3497_v34, %v9703_v47 }
 0x54c   : > { %v8290_v22 = vpop.permute.xlu0 %3541  ;;  %v3725_v21 = vsel %vm2815_vm7, %v3724_v43, %v3720_v0  ;;  %v3685_v0 = vrot.slane %v3476_v61, %v9704_v50 }
 0x54d   : > { %v3503_v31 = vpop.permute.xlu1 %3502 }
 0x54e   : > { %v3729_v5 = vrot.slane %v3503_v31, %v9705_v9  ;;  %v3681_v31 = vrot.slane %v3473_v36, %v9703_v47  ;;  %v3700_v36 = vrot.slane %v3485_v40, %v7442_v33  ;;  %v3763_v40 = vrot.slane %v3524_v59, %v9704_v50 }
 0x550   : > { %v3730_v54 = vsel %vm2822_vm8, %v3729_v5, %v3725_v21  ;;  %v8296_v30 = vpop.permute.xlu0 %3547  ;;  %v3690_v21 = vrot.slane %v3479_v1, %v9705_v9  ;;  %v3646_v1 = vrot.slane %v8263_v13, %v9704_v50 }
 0x551   : > { %v3509_v7 = vpop.permute.xlu1 %3508  ;;  %v3735_v34 = vsel %vm2829_vm9, %v3734_v41, %v3730_v54 }
 0x552   : > { %v3739_v37 = vrot.slane %v3509_v7, %v7442_v33 }
 0x554   : > { %v3740_v12 = vsel %vm2836_vm10, %v3739_v37, %v3735_v34  ;;  %v8302_v52 = vpop.permute.xlu0 %3553  ;;  %v3686_v37 = vsel %vm2815_vm7, %v3685_v0, %v3681_v31  ;;  %v3695_v34 = vrot.slane %v3482_v2, %v7439_v62  ;;  %v3642_v31 = vrot.slane %v8258_v39, %v9703_v47 }
 0x555   : > { %v3515_v43 = vpop.permute.xlu1 %3514  ;;  %v3745_v57 = vsel %vm2843_vm11, %v3744_v6, %v3740_v12  ;;  %v3691_v45 = vsel %vm2822_vm8, %v3690_v21, %v3686_v37  ;;  %v3651_v12 = vrot.slane %v8268_v56, %v9705_v9  ;;  %v3661_v2 = vrot.slane %v8277_v58, %v7442_v33 }
 0x556   : > { %v3749_v5 = vrot.slane %v3515_v43, %v7452_v38  ;;  %v3656_v43 = vrot.slane %v8273_v14, %v7439_v62  ;;  %v3696_v21 = vsel %vm2829_vm9, %v3695_v34, %v3691_v45  ;;  %v3710_v56 = vrot.slane %v3491_v25, %v7452_v38 }
 0x557   : > { %v3705_v39 = vrot.slane %v8271_v44, %v7449_v60  ;;  %v3666_v14 = vrot.slane %v8279_v28, %v7449_v60  ;;  %v3671_v58 = vrot.slane %v8281_v10, %v7452_v38  ;;  %v3773_v45 = vrot.slane %v8285_v16, %v7439_v62 }
 0x558   : > { %v3750_v7 = vsel %vm2850_vm12, %v3749_v5, %v3745_v57  ;;  %v8311_v41 = vpop.permute.xlu0 %3559  ;;  %v3701_v5 = vsel %vm2836_vm10, %v3700_v36, %v3696_v21  ;;  %v3647_v57 = vsel %vm2815_vm7, %v3646_v1, %v3642_v31  ;;  %v3715_v10 = vrot.slane %v8275_v42, %v7455_v53 }
 0x559   : > { %v3521_v54 = vpop.permute.xlu1 %3520  ;;  %v3652_v37 = vsel %vm2822_vm8, %v3651_v12, %v3647_v57  ;;  %v3706_v36 = vsel %vm2843_vm11, %v3705_v39, %v3701_v5  ;;  %v3754_v16 = vrot.slane %v8283_v49, %v7455_v53  ;;  %v3676_v21 = vrot.slane %v8254_v3, %v7455_v53 }
 0x55a   : > { %v3759_v61 = vrot.slane %v3521_v54, %v9703_v47  ;;  %v3657_v25 = vsel %vm2829_vm9, %v3656_v43, %v3652_v37  ;;  %v3711_v28 = vsel %vm2850_vm12, %v3710_v56, %v3706_v36  ;;  %v3793_v49 = vrot.slane %v8290_v22, %v7455_v53 }
 0x55b   : > { %v3662_v1 = vsel %vm2836_vm10, %v3661_v2, %v3657_v25  ;;  %v3783_v2 = vrot.slane %v8287_v32, %v7449_v60  ;;  %v3755_v5 = vsel %vm2857_vm13, %v3754_v16, %v3750_v7 }
 0x55c   : > { %v8322_v6 = vpop.permute.xlu0 %3565  ;;  %v3764_v59 = vsel %vm2815_vm7, %v3763_v40, %v3759_v61  ;;  %v3667_v12 = vsel %vm2843_vm11, %v3666_v14, %v3662_v1 }
 0x55d   : > { %v3527_v13 = vpop.permute.xlu1 %3526  ;;  %v3672_v43 = vsel %vm2850_vm12, %v3671_v58, %v3667_v12 }
 0x55e   : > { %v3768_v0 = vrot.slane %v3527_v13, %v9705_v9  ;;  %v3716_v13 = vsel %vm2857_vm13, %v3715_v10, %v3711_v28 }
 0x560   : > { %v3769_v54 = vsel %vm2822_vm8, %v3768_v0, %v3764_v59  ;;  %v3572_v34 = vpop.permute.xlu0 %3571  ;;  %v3677_v0 = vsel %vm2857_vm13, %v3676_v21, %v3672_v43 }
 0x561   : > { %v3533_v44 = vpop.permute.xlu1 %3532  ;;  %v3774_v31 = vsel %vm2829_vm9, %v3773_v45, %v3769_v54  ;;  %v3951_v39 = vsel %vm3132_vm14, %v3716_v13, %v3677_v0 }
 0x562   : > { %v3778_v61 = vrot.slane %v3533_v44, %v7442_v33  ;;  %v3952_v59 = vsel %vm3134_vm15, %v3755_v5, %v3951_v39 }
 0x564   : > { %v3779_v40 = vsel %vm2836_vm10, %v3778_v61, %v3774_v31  ;;  %v3578_v3 = vpop.permute.xlu0 %3577 }
 0x565   : > { %v3539_v42 = vpop.permute.xlu1 %3538  ;;  %v3784_v57 = vsel %vm2843_vm11, %v3783_v2, %v3779_v40 }
 0x566   : > { %v3788_v56 = vrot.slane %v3539_v42, %v7452_v38 }
 0x568   : > { %v3789_v14 = vsel %vm2850_vm12, %v3788_v56, %v3784_v57  ;;  %v8378_v54 = vpop.permute.xlu0 %3583  ;;  %v3802_v56 = vrot.slane %v8296_v30, %v9704_v50  ;;  %v3841_v57 = vrot.slane %v3572_v34, %v9704_v50 }
 0x569   : > { %v3794_v32 = vsel %vm2857_vm13, %v3793_v49, %v3789_v14  ;;  %v3545_v37 = vpop.permute.xlu1 %3544 }
 0x56a   : > { %v8376_v7 = vsel %vm3136_vm0, %v3794_v32, %v3952_v59  ;;  %v3798_v13 = vrot.slane %v3545_v37, %v9703_v47 }
 0x56c   : > { %v8380_v22 = vpop.permute.xlu0 %3589  ;;  %v3803_v14 = vsel %vm2815_vm7, %v3802_v56, %v3798_v13  ;;  %v3851_v13 = vrot.slane %v3578_v3, %v7439_v62 }
 0x56d   : > { %v3551_v58 = vpop.permute.xlu1 %3550 }
 0x56e   : > { %v3807_v2 = vrot.slane %v3551_v58, %v9705_v9 }
 0x570   : > { %v3596_v44 = vpop.permute.xlu0 %3595  ;;  %v3808_v37 = vsel %vm2822_vm8, %v3807_v2, %v3803_v14 }
 0x571   : > { %v3557_v25 = vpop.permute.xlu1 %3556  ;;  %v3880_v59 = vrot.slane %v3596_v44, %v9704_v50 }
 0x572   : > { %v3817_v58 = vrot.slane %v3557_v25, %v7442_v33 }
 0x574   : > { %v3602_v28 = vpop.permute.xlu0 %3601 }
 0x575   : > { %v3563_v45 = vpop.permute.xlu1 %3562 }
 0x578   : > { %v3608_v12 = vpop.permute.xlu0 %3607 }
 0x579   : > { %v3569_v36 = vpop.permute.xlu1 %3568 }
 0x57a   : > { %v3837_v42 = vrot.slane %v3569_v36, %v9703_v47 }
 0x57c   : > { %v8382_v43 = vpop.permute.xlu0 %3613  ;;  %v3842_v36 = vsel %vm2815_vm7, %v3841_v57, %v3837_v42  ;;  %v3822_v42 = vrot.slane %v8311_v41, %v7449_v60 }
 0x57d   : > { %v3575_v1 = vpop.permute.xlu1 %3574 }
 0x57e   : > { %v3846_v0 = vrot.slane %v3575_v1, %v9705_v9  ;;  %v3812_v1 = vrot.slane %v8302_v52, %v7439_v62  ;;  %v3890_v52 = vrot.slane %v3602_v28, %v7439_v62  ;;  %v3861_v28 = vrot.slane %v8378_v54, %v7449_v60 }
 0x57f   : > { %v3832_v54 = vrot.slane %v8322_v6, %v7455_v53 }
 0x580   : > { %v3620_v21 = vpop.permute.xlu0 %3619  ;;  %v3813_v56 = vsel %vm2829_vm9, %v3812_v1, %v3808_v37 }
 0x581   : > { %v3581_v61 = vpop.permute.xlu1 %3580 }
 0x582   : > { %v3856_v34 = vrot.slane %v3581_v61, %v7442_v33  ;;  %v3827_v61 = vrot.slane %v3563_v45, %v7452_v38 }
 0x584   : > { %v3626_v32 = vpop.permute.xlu0 %3625 }
 0x585   : > { %v3587_v10 = vpop.permute.xlu1 %3586  ;;  %v3929_v1 = vrot.slane %v3626_v32, %v7439_v62 }
 0x588   : > { %v3632_v14 = vpop.permute.xlu0 %3631 }
 0x589   : > { %v3593_v31 = vpop.permute.xlu1 %3592 }
 0x58a   : > { %v3876_v49 = vrot.slane %v3593_v31, %v9703_v47  ;;  %v3847_v31 = vsel %vm2822_vm8, %v3846_v0, %v3842_v36  ;;  %v3818_v0 = vsel %vm2836_vm10, %v3817_v58, %v3813_v56  ;;  %v3900_v36 = vrot.slane %v3608_v12, %v7449_v60 }
 0x58b   : > { %v3852_v3 = vsel %vm2829_vm9, %v3851_v13, %v3847_v31  ;;  %v3823_v58 = vsel %vm2843_vm11, %v3822_v42, %v3818_v0  ;;  %v3871_v12 = vrot.slane %v8380_v22, %v7455_v53 }
 0x58c   : > { %v3638_v42 = vpop.permute.xlu0 %3637 }
 0x58d   : > { %v3599_v16 = vpop.permute.xlu1 %3598 }
 0x58e   : > { %v3885_v39 = vrot.slane %v3599_v16, %v9705_v9  ;;  %v3881_v16 = vsel %vm2815_vm7, %v3880_v59, %v3876_v49  ;;  %v3919_v49 = vrot.slane %v3620_v21, %v9704_v50 }
 0x590   : > { %v3886_v44 = vsel %vm2822_vm8, %v3885_v39, %v3881_v16  ;;  %v3866_v39 = vrot.slane %v3587_v10, %v7452_v38 }
 0x591   : > { %v3605_v40 = vpop.permute.xlu1 %3604  ;;  %v3891_v41 = vsel %vm2829_vm9, %v3890_v52, %v3886_v44  ;;  %v3939_v52 = vrot.slane %v3632_v14, %v7449_v60 }
 0x592   : > { %v3895_v2 = vrot.slane %v3605_v40, %v7442_v33  ;;  %v3857_v40 = vsel %vm2836_vm10, %v3856_v34, %v3852_v3 }
 0x593   : > { %v3862_v31 = vsel %vm2843_vm11, %v3861_v28, %v3857_v40 }
 0x594   : > { %v3896_v37 = vsel %vm2836_vm10, %v3895_v2, %v3891_v41 }
 0x595   : > { %v3611_v5 = vpop.permute.xlu1 %3610  ;;  %v3901_v16 = vsel %vm2843_vm11, %v3900_v36, %v3896_v37 }
 0x596   : > { %v3905_v45 = vrot.slane %v3611_v5, %v7452_v38  ;;  %v3867_v5 = vsel %vm2850_vm12, %v3866_v39, %v3862_v31  ;;  %v9708_v31 = vsub.s32 2, %v9630_v27 }
 0x597   : > { %v3872_v56 = vsel %vm2857_vm13, %v3871_v12, %v3867_v5 }
 0x598   : > { %v3906_v44 = vsel %vm2850_vm12, %v3905_v45, %v3901_v16  ;;  %v9706_v45 = vsub.s32 1, %v9630_v27  ;;  %v9709_v16 = vsub.s32 3, %v9630_v27 }
 0x599   : > { %v3617_v30 = vpop.permute.xlu1 %3616 }
 0x59a   : > { %v3915_v25 = vrot.slane %v3617_v30, %v9703_v47  ;;  %v3828_v30 = vsel %vm2850_vm12, %v3827_v61, %v3823_v58 }
 0x59b   : > { %v3833_v32 = vsel %vm2857_vm13, %v3832_v54, %v3828_v30 }
 0x59c   : > { %v3920_v21 = vsel %vm2815_vm7, %v3919_v49, %v3915_v25  ;;  %v3910_v25 = vrot.slane %v8382_v43, %v7455_v53  ;;  %v3949_v49 = vrot.slane %v3638_v42, %v7455_v53 }
 0x59d   : > { %v3623_v57 = vpop.permute.xlu1 %3622 }
 0x59e   : > { %v3924_v59 = vrot.slane %v3623_v57, %v9705_v9  ;;  %v3911_v22 = vsel %vm2857_vm13, %v3910_v25, %v3906_v44  ;;  %v3954_v57 = vsel %vm3138_vm1, %v3833_v32, %v8376_v7 }
 0x59f   : > { %v3955_v40 = vsel %vm3140_vm2, %v3872_v56, %v3954_v57  ;;  %v9720_v57 = vld [vmem:[#allocation106_spill] sm:$0xff] }
 0x5a0   : > { %v3925_v10 = vsel %vm2822_vm8, %v3924_v59, %v3920_v21  ;;  %v3956_v14 = vsel %vm3142_vm3, %v3911_v22, %v3955_v40  ;;  %v9707_v21 = vsub.s32 0, %v9630_v27  ;;  %v9721_v40 = vsub.s32 5, %v9630_v27 }
 0x5a1   : > { %v3629_v34 = vpop.permute.xlu1 %3628  ;;  %v3930_v2 = vsel %vm2829_vm9, %v3929_v1, %v3925_v10 }
 0x5a2   : > { %v3934_v13 = vrot.slane %v3629_v34, %v7442_v33 }
 0x5a4   : > { %v3935_v6 = vsel %vm2836_vm10, %v3934_v13, %v3930_v2  ;;  %v9712_v2 = vsub.s32 4, %v9630_v27 }
 0x5a5   : > { %v3635_v0 = vpop.permute.xlu1 %3634  ;;  %v3940_v3 = vsel %vm2843_vm11, %v3939_v52, %v3935_v6  ;;  %v9716_v6 = vld [vmem:[#allocation113_spill] sm:$0xff]  ;;  %v9717_v52 = vld [vmem:[#allocation102_spill] sm:$0xff] }
 0x5a6   : > { %v3944_v61 = vrot.slane %v3635_v0, %v7452_v38 }
 0x5a8   : > { %v3945_v43 = vsel %vm2850_vm12, %v3944_v61, %v3940_v3  ;;  %v9718_v61 = vld [vmem:[#allocation84_spill] sm:$0xff] }
 0x5a9   : > { %v3950_v39 = vsel %vm2857_vm13, %v3949_v49, %v3945_v43  ;;  %v9719_v49 = vld [vmem:[#allocation79_spill] sm:$0xff] }
 0x5aa   : > { %v3957_v41 = vsel %vm3144_vm4, %v3950_v39, %v3956_v14  ;;  %v9722_v14 = vld [vmem:[#allocation105_spill] sm:$0xff] }
 0x5ab   : > { %v3959_v59 = vsel %vm2473_vm6, %v3957_v41, 0.0 }
 0x5ac   : > { %3960 = vadd.xlane.f32.xlu1 %v3959_v59  ;;  %v9723_v59 = vld [vmem:[#allocation110_spill] sm:$0xff] }
 0x639   : > { %v3961_v28 = vpop.xlane.xlu1 %3960 }
 0x63a   : > { %6025 = vrcp.f32 %v3961_v28 }
 0x644   : > { %v8457_v37 = vpop.eup %6025 }
 0x645   : > { %v3971_v7 = vrot.slane %v8457_v37, %v9706_v45  ;;  %v3967_v58 = vrot.slane %v8457_v37, %v9707_v21  ;;  %v8472_v34 = vrot.slane %v8457_v37, %v9708_v31  ;;  %v8523_v39 = vrot.slane %v8457_v37, %v9721_v40  ;;  %v9728_v31 = vld [vmem:[#allocation112_spill] sm:$0xff] }
 0x646   : > { %v9724_v45 = vsub.s32 6, %v9630_v27 }
 0x647   : > { %v4013_v36 = vmul.f32 %v7944_v23, %v3971_v7  ;;  %v4004_v10 = vmul.f32 %v7937_v48, %v3967_v58  ;;  %v4018_v30 = vmul.f32 %v8047_v24, %v3971_v7  ;;  %v4005_v1 = vmul.f32 %v7946_v46, %v3967_v58 }
 0x648   : > { %v4020_v54 = vmul.f32 %v8058_v26, %v8472_v34  ;;  %v4006_v23 = vmul.f32 %v7955_v20, %v3967_v58  ;;  %v4022_v48 = vmul.f32 %v8073_v29, %v8472_v34  ;;  %v4007_v24 = vmul.f32 %v7966_v18, %v3967_v58 }
 0x649   : > { %4160 = vperm.xlu1 %5896, %v4013_v36   ;;  %4133 = vperm.xlu0 %5895, %v4004_v10   ;;  %v4024_v46 = vmul.f32 %v8083_v15, %v8472_v34  ;;  %v4008_v5 = vmul.f32 %v7981_v19, %v3967_v58  ;;  %v4026_v26 = vmul.f32 %v8093_v63, %v8472_v34  ;;  %v9726_v36 = vld [vmem:[#allocation81_spill] sm:$0xff] }
 0x64a   : > { %v4009_v20 = vmul.f32 %v7991_v11, %v3967_v58  ;;  %v8489_v29 = vrot.slane %v8457_v37, %v9709_v16  ;;  %v4010_v15 = vmul.f32 %v8001_v35, %v3967_v58  ;;  %v4011_v63 = vmul.f32 %v7935_v8, %v3967_v58  ;;  %v9711_v35 = vld [vmem:[#allocation77_spill] sm:$0xff]  ;;  %v9713_v8 = vld [vmem:[#allocation98_spill] sm:$0xff] }
 0x64b   : > { %v4012_v13 = vmul.f32 %v8012_v51, %v3971_v7  ;;  %v4014_v44 = vmul.f32 %v9711_v35, %v3971_v7  ;;  %v9715_v51 = vld [vmem:[#allocation100_spill] sm:$0xff]  ;;  %v4016_v56 = vmul.f32 %v9716_v6, %v3971_v7  ;;  %v4017_v22 = vmul.f32 %v9718_v61, %v3971_v7  ;;  %v9743_v6 = vld [vmem:[#allocation90_spill] sm:$0xff] }
 0x64c   : > { %v4028_v18 = vmul.f32 %v8104_v17, %v8489_v29  ;;  %v4030_v19 = vmul.f32 %v8119_v55, %v8489_v29  ;;  %v4032_v11 = vmul.f32 %v8129_v4, %v8489_v29  ;;  %v9710_v17 = vld [vmem:[#allocation95_spill] sm:$0xff]  ;;  %v8506_v55 = vrot.slane %v8457_v37, %v9712_v2  ;;  %v9714_v4 = vld [vmem:[#allocation82_spill] sm:$0xff] }
 0x64d   : > { %4175 = vperm.xlu1 %5896, %v4018_v30   ;;  %4136 = vperm.xlu0 %5895, %v4005_v1   ;;  %v4034_v12 = vmul.f32 %v9710_v17, %v8489_v29  ;;  %v4015_v25 = vmul.f32 %v9714_v4, %v3971_v7  ;;  %v4019_v43 = vmul.f32 %v9720_v57, %v3971_v7  ;;  %v9725_v7 = vld [vmem:[#allocation114_spill] sm:$0xff]  ;;  %v9727_v30 = vld [vmem:[#allocation108_spill] sm:$0xff] }
 0x64e   : > { %v4036_v32 = vmul.f32 %v9713_v8, %v8506_v55  ;;  %v4038_v42 = vmul.f32 %v9715_v51, %v8506_v55  ;;  %v4040_v0 = vmul.f32 %v9717_v52, %v8506_v55  ;;  %v4042_v3 = vmul.f32 %v9719_v49, %v8506_v55  ;;  %v9740_v8 = vld [vmem:[#allocation104_spill] sm:$0xff]  ;;  %v9742_v51 = vld [vmem:[#allocation78_spill] sm:$0xff] }
 0x64f   : > { %v4044_v41 = vmul.f32 %v9722_v14, %v8523_v39  ;;  %v4021_v28 = vmul.f32 %v9723_v59, %v8472_v34  ;;  %v8532_v21 = vrot.slane %v8457_v37, %v9724_v45  ;;  %v4023_v10 = vmul.f32 %v9726_v36, %v8472_v34  ;;  %v9741_v4 = vld [vmem:[#allocation96_spill] sm:$0xff]  ;;  %v9749_v14 = vld [vmem:[#allocation101_spill] sm:$0xff]  ;;  %v9750_v59 = vld [vmem:[#allocation118_spill] sm:$0xff] }
 0x650   : > { %v4046_v1 = vmul.f32 %v9727_v30, %v8523_v39  ;;  %v9751_v45 = vld [vmem:[#allocation115_spill] sm:$0xff]  ;;  %v9753_v36 = vld [vmem:[#allocation73_spill] sm:$0xff]  ;;  %v9754_v30 = vld [vmem:[#allocation116_spill] sm:$0xff] }
 0x651   : > { %4181 = vperm.xlu1 %5896, %v4020_v54   ;;  %4139 = vperm.xlu0 %5895, %v4006_v23   ;;  %v4052_v58 = vmul.f32 %v9725_v7, %v8532_v21  ;;  %v4025_v54 = vmul.f32 %v9728_v31, %v8472_v34  ;;  %v9729_v23 = vsub.s32 7, %v9630_v27  ;;  %v9734_v27 = vld [vmem:[#allocation103_spill] sm:$0xff]  ;;  %v4054_v7 = vmul.f32 %v9751_v45, %v8532_v21 }
 0x655   : > { %4187 = vperm.xlu1 %5896, %v4022_v48   ;;  %4142 = vperm.xlu0 %5895, %v4007_v24   ;;  %v8545_v48 = vrot.slane %v8457_v37, %v9729_v23  ;;  %v9730_v24 = vld [vmem:[#allocation109_spill] sm:$0xff]  ;;  %v4055_v37 = vmul.f32 %v9734_v27, %v8532_v21  ;;  %v9755_v23 = vld [vmem:[#allocation10_spill] sm:$0xff] }
 0x656   : > { %v9758_v27 = vld [vmem:[#allocation9_spill] sm:$0xff] }
 0x659   : > { %4193 = vperm.xlu1 %5896, %v4024_v46   ;;  %4145 = vperm.xlu0 %5895, %v4008_v5   ;;  %v4061_v46 = vmul.f32 %v9730_v24, %v8545_v48  ;;  %v9731_v5 = vld [vmem:[#allocation111_spill] sm:$0xff]  ;;  %v9756_v24 = vmax.f32 %v9755_v23, 0.0  ;;  %v9770_v23 = vld [vmem:[#allocation13_spill] sm:$0xff] }
 0x65d   : > { %4199 = vperm.xlu1 %5896, %v4026_v26   ;;  %4148 = vperm.xlu0 %5895, %v4009_v20   ;;  %v4027_v26 = vmul.f32 %v9731_v5, %v8472_v34  ;;  %v9732_v20 = vld [vmem:[#allocation94_spill] sm:$0xff]  ;;  %v9757_v5 = vld [vmem:[#allocation120_spill] sm:$0xff] }
 0x65e   : > { %v4047_v16 = vmul.f32 %v9732_v20, %v8523_v39  ;;  %v9736_v34 = vld [vmem:[#allocation74_spill] sm:$0xff] }
 0x661   : > { %4205 = vperm.xlu1 %5896, %v4028_v18   ;;  %4151 = vperm.xlu0 %5895, %v4010_v15   ;;  %v9733_v18 = vld [vmem:[#allocation83_spill] sm:$0xff] }
 0x662   : > { %v4029_v15 = vmul.f32 %v9733_v18, %v8489_v29 }
 0x665   : > { %4211 = vperm.xlu1 %5896, %v4030_v19   ;;  %4154 = vperm.xlu0 %5895, %v4011_v63   ;;  %v9735_v19 = vld [vmem:[#allocation76_spill] sm:$0xff] }
 0x666   : > { %v4031_v63 = vmul.f32 %v9735_v19, %v8489_v29 }
 0x669   : > { %4217 = vperm.xlu1 %5896, %v4032_v11   ;;  %4157 = vperm.xlu0 %5895, %v4012_v13   ;;  %v4063_v11 = vmul.f32 %v9736_v34, %v8545_v48  ;;  %v9737_v13 = vld [vmem:[#allocation85_spill] sm:$0xff] }
 0x66a   : > { %v4033_v17 = vmul.f32 %v9737_v13, %v8489_v29  ;;  %v9760_v13 = vld [vmem:[#allocation75_spill] sm:$0xff] }
 0x66d   : > { %4223 = vperm.xlu1 %5896, %v4034_v12   ;;  %4163 = vperm.xlu0 %5895, %v4014_v44   ;;  %v9738_v12 = vld [vmem:[#allocation97_spill] sm:$0xff] }
 0x66e   : > { %v4049_v35 = vmul.f32 %v9738_v12, %v8523_v39  ;;  %v9739_v44 = vld [vmem:[#allocation89_spill] sm:$0xff] }
 0x66f   : > { %v4035_v2 = vmul.f32 %v9739_v44, %v8489_v29  ;;  %v9744_v29 = vld [vmem:[#allocation99_spill] sm:$0xff] }
 0x670   : > { %v4051_v52 = vmul.f32 %v9744_v29, %v8523_v39 }
 0x671   : > { %4229 = vperm.xlu1 %5896, %v4036_v32   ;;  %4166 = vperm.xlu0 %5895, %v4015_v25   ;;  %v4057_v32 = vmul.f32 %v9740_v8, %v8532_v21  ;;  %v4037_v25 = vmul.f32 %v9741_v4, %v8506_v55  ;;  %v9761_v8 = vld [vmem:[#allocation12_spill] sm:$0xff] }
 0x675   : > { %4235 = vperm.xlu1 %5896, %v4038_v42   ;;  %4169 = vperm.xlu0 %5895, %v4016_v56   ;;  %v4065_v42 = vmul.f32 %v9742_v51, %v8545_v48  ;;  %v4039_v56 = vmul.f32 %v9743_v6, %v8506_v55 }
 0x679   : > { %4241 = vperm.xlu1 %5896, %v4040_v0   ;;  %4172 = vperm.xlu0 %5895, %v4017_v22   ;;  %v9745_v0 = vld [vmem:[#allocation91_spill] sm:$0xff] }
 0x67a   : > { %v4041_v61 = vmul.f32 %v9745_v0, %v8506_v55  ;;  %v9746_v22 = vld [vmem:[#allocation107_spill] sm:$0xff] }
 0x67b   : > { %v4059_v49 = vmul.f32 %v9746_v22, %v8532_v21  ;;  %v9764_v0 = vld [vmem:[#allocation11_spill] sm:$0xff] }
 0x67d   : > { %4247 = vperm.xlu1 %5896, %v4042_v3   ;;  %4178 = vperm.xlu0 %5895, %v4019_v43   ;;  %v9747_v3 = vld [vmem:[#allocation92_spill] sm:$0xff]  ;;  %v9748_v43 = vld [vmem:[#allocation93_spill] sm:$0xff] }
 0x67e   : > { %v4043_v57 = vmul.f32 %v9747_v3, %v8506_v55  ;;  %v4045_v40 = vmul.f32 %v9748_v43, %v8523_v39  ;;  %v9752_v55 = vld [vmem:[#allocation119_spill] sm:$0xff] }
 0x681   : > { %4253 = vperm.xlu1 %5896, %v4044_v41   ;;  %4184 = vperm.xlu0 %5895, %v4021_v28   ;;  %v4053_v41 = vmul.f32 %v9749_v14, %v8532_v21  ;;  %v4060_v28 = vmul.f32 %v9750_v59, %v8545_v48  ;;  %v9767_v59 = vld [vmem:[#allocation14_spill] sm:$0xff] }
 0x685   : > { %4277 = vperm.xlu1 %5896, %v4052_v58   ;;  %4190 = vperm.xlu0 %5895, %v4023_v10   ;;  %v4062_v58 = vmul.f32 %v9752_v55, %v8545_v48  ;;  %v4048_v10 = vmul.f32 %v9753_v36, %v8523_v39 }
 0x689   : > { %4259 = vperm.xlu1 %5896, %v4046_v1   ;;  %4196 = vperm.xlu0 %5895, %v4025_v54   ;;  %v4056_v1 = vmul.f32 %v9754_v30, %v8532_v21 }
 0x68d   : > { %4304 = vperm.xlu1 %5896, %v4061_v46   ;;  %4202 = vperm.xlu0 %5895, %v4027_v26   ;;  %v4064_v26 = vmul.f32 %v9757_v5, %v8545_v48 }
 0x691   : > { %4262 = vperm.xlu1 %5896, %v4047_v16   ;;  %4208 = vperm.xlu0 %5895, %v4029_v15  }
 0x695   : > { %4286 = vperm.xlu1 %5896, %v4055_v37   ;;  %4214 = vperm.xlu0 %5895, %v4031_v63   ;;  %v9759_v37 = vmax.f32 %v9758_v27, 0.0  ;;  %v9772_v27 = vld [vmem:[#allocation16_spill] sm:$0xff] }
 0x699   : > { %4310 = vperm.xlu1 %5896, %v4063_v11   ;;  %4220 = vperm.xlu0 %5895, %v4033_v17   ;;  %v4050_v17 = vmul.f32 %v9760_v13, %v8523_v39 }
 0x69d   : > { %4268 = vperm.xlu1 %5896, %v4049_v35   ;;  %4226 = vperm.xlu0 %5895, %v4035_v2  }
 0x6a1   : > { %4292 = vperm.xlu1 %5896, %v4057_v32   ;;  %4232 = vperm.xlu0 %5895, %v4037_v25   ;;  %v9762_v32 = vmax.f32 %v9761_v8, 0.0 }
 0x6a5   : > { %4316 = vperm.xlu1 %5896, %v4065_v42   ;;  %4238 = vperm.xlu0 %5895, %v4039_v56   ;;  %v9763_v42 = vld [vmem:[#allocation117_spill] sm:$0xff] }
 0x6a6   : > { %v4058_v6 = vmul.f32 %v9763_v42, %v8532_v21 }
 0x6a9   : > { %4274 = vperm.xlu1 %5896, %v4051_v52   ;;  %4244 = vperm.xlu0 %5895, %v4041_v61   ;;  %v9765_v61 = vmax.f32 %v9764_v0, 0.0 }
 0x6ad   : > { %4298 = vperm.xlu1 %5896, %v4059_v49   ;;  %4250 = vperm.xlu0 %5895, %v4043_v57   ;;  %v9766_v57 = vld [vmem:[#allocation121_spill] sm:$0xff] }
 0x6ae   : > { %v4066_v43 = vmul.f32 %v9766_v57, %v8545_v48 }
 0x6b1   : > { %4256 = vperm.xlu0 %5895, %v4045_v40  }
 0x6b5   : > { %4280 = vperm.xlu0 %5895, %v4053_v41  }
 0x6b9   : > { %4301 = vperm.xlu0 %5895, %v4060_v28   ;;  %v9768_v28 = vmax.f32 %v9767_v59, 0.0 }
 0x6bd   : > { %4283 = vperm.xlu0 %5895, %v4054_v7  }
 0x6c1   : > { %4307 = vperm.xlu0 %5895, %v4062_v58   ;;  %v9769_v58 = vld [vmem:[#allocation80_spill] sm:$0xff] }
 0x6c2   : > { %v4067_v36 = vmul.f32 %v9769_v58, %v8545_v48 }
 0x6c5   : > { %4265 = vperm.xlu0 %5895, %v4048_v10  }
 0x6c8   : > { %v8597_v31 = vpop.permute.xlu1 %4160  ;;  %v4134_v54 = vpop.permute.xlu0 %4133 }
 0x6c9   : > { %4289 = vperm.xlu0 %5895, %v4056_v1   ;;  %v4709_v46 = vmul.f32 %v4134_v54, %v9756_v24  ;;  %v4327_v18 = vrot.slane %v4134_v54, %v9703_v47  ;;  %v9771_v24 = vmax.f32 %v9770_v23, 0.0 }
 0x6cb   : > { %v4773_v63 = vsel %vm2473_vm6, %v4709_v46, 0.0 }
 0x6cc   : > { %v8603_v20 = vpop.permute.xlu1 %4175  ;;  %v4137_v16 = vpop.permute.xlu0 %4136 }
 0x6cd   : > { %v4331_v15 = vrot.slane %v4137_v16, %v9704_v50  ;;  %v4710_v19 = vmul.f32 %v4137_v16, %v9759_v37  ;;  %4313 = vperm.xlu0 %5895, %v4064_v26   ;;  %v9773_v37 = vmax.f32 %v9772_v27, 0.0  ;;  %v9784_v27 = vld [vmem:[#allocation22_spill] sm:$0xff] }
 0x6cf   : > { %v4332_v34 = vsel %vm2815_vm7, %v4331_v15, %v4327_v18  ;;  %v4774_v11 = vsel %vm2473_vm6, %v4710_v19, 0.0 }
 0x6d0   : > { %v4775_v12 = vadd.f32 %v4774_v11, %v4773_v63  ;;  %v8614_v35 = vpop.permute.xlu1 %4181  ;;  %v4140_v44 = vpop.permute.xlu0 %4139 }
 0x6d1   : > { %v4336_v2 = vrot.slane %v4140_v44, %v9705_v9  ;;  %v4711_v4 = vmul.f32 %v4140_v44, %v9762_v32  ;;  %4271 = vperm.xlu0 %5895, %v4050_v17   ;;  %v9774_v44 = vld [vmem:[#allocation15_spill] sm:$0xff]  ;;  %v9776_v32 = vld [vmem:[#allocation17_spill] sm:$0xff] }
 0x6d3   : > { %v4337_v25 = vsel %vm2822_vm8, %v4336_v2, %v4332_v34  ;;  %v4776_v51 = vsel %vm2473_vm6, %v4711_v4, 0.0  ;;  %v9775_v2 = vmax.f32 %v9774_v44, 0.0  ;;  %v9777_v4 = vmax.f32 %v9776_v32, 0.0  ;;  %v9786_v44 = vld [vmem:[#allocation24_spill] sm:$0xff] }
 0x6d4   : > { %v4777_v56 = vadd.f32 %v4776_v51, %v4775_v12  ;;  %v8623_v29 = vpop.permute.xlu1 %4187  ;;  %v4143_v39 = vpop.permute.xlu0 %4142 }
 0x6d5   : > { %v4341_v52 = vrot.slane %v4143_v39, %v7439_v62  ;;  %v4712_v22 = vmul.f32 %v4143_v39, %v9765_v61  ;;  %4295 = vperm.xlu0 %5895, %v4058_v6   ;;  %v9778_v61 = vld [vmem:[#allocation18_spill] sm:$0xff] }
 0x6d7   : > { %v4342_v49 = vsel %vm2829_vm9, %v4341_v52, %v4337_v25  ;;  %v4778_v3 = vsel %vm2473_vm6, %v4712_v22, 0.0  ;;  %v4718_v25 = vmul.f32 %v8597_v31, %v9777_v4  ;;  %v4370_v52 = vrot.slane %v8597_v31, %v9704_v50  ;;  %v9788_v4 = vld [vmem:[#allocation21_spill] sm:$0xff] }
 0x6d8   : > { %v4779_v40 = vadd.f32 %v4778_v3, %v4777_v56  ;;  %v8632_v14 = vpop.permute.xlu1 %4193  ;;  %v4146_v21 = vpop.permute.xlu0 %4145  ;;  %v9779_v22 = vmax.f32 %v9778_v61, 0.0 }
 0x6d9   : > { %v4346_v41 = vrot.slane %v4146_v21, %v7442_v33  ;;  %v4713_v45 = vmul.f32 %v4146_v21, %v9768_v28  ;;  %4319 = vperm.xlu0 %5895, %v4066_v43   ;;  %v4795_v3 = vsel %vm2473_vm6, %v4718_v25, 0.0  ;;  %v9780_v28 = vld [vmem:[#allocation20_spill] sm:$0xff]  ;;  %v9789_v25 = vmax.f32 %v9788_v4, 0.0 }
 0x6db   : > { %v4347_v7 = vsel %vm2836_vm10, %v4346_v41, %v4342_v49  ;;  %v4780_v55 = vsel %vm2473_vm6, %v4713_v45, 0.0  ;;  %v9781_v45 = vmax.f32 %v9780_v28, 0.0 }
 0x6dc   : > { %v4781_v10 = vadd.f32 %v4780_v55, %v4779_v40  ;;  %v8641_v30 = vpop.permute.xlu1 %4199  ;;  %v4149_v1 = vpop.permute.xlu0 %4148 }
 0x6dd   : > { %v4351_v54 = vrot.slane %v4149_v1, %v7449_v60  ;;  %v4714_v46 = vmul.f32 %v4149_v1, %v9771_v24  ;;  %4322 = vperm.xlu0 %5895, %v4067_v36  }
 0x6df   : > { %v4352_v5 = vsel %vm2843_vm11, %v4351_v54, %v4347_v7  ;;  %v4782_v26 = vsel %vm2473_vm6, %v4714_v46, 0.0  ;;  %v9782_v54 = vld [vmem:[#allocation19_spill] sm:$0xff] }
 0x6e0   : > { %v4783_v16 = vadd.f32 %v4782_v26, %v4781_v10  ;;  %v8648_v18 = vpop.permute.xlu1 %4205  ;;  %v4152_v15 = vpop.permute.xlu0 %4151  ;;  %v9783_v23 = vmax.f32 %v9782_v54, 0.0 }
 0x6e1   : > { %v4356_v48 = vrot.slane %v4152_v15, %v7452_v38  ;;  %v4715_v19 = vmul.f32 %v4152_v15, %v9773_v37  ;;  %v9785_v37 = vmax.f32 %v9784_v27, 0.0 }
 0x6e3   : > { %v4357_v63 = vsel %vm2850_vm12, %v4356_v48, %v4352_v5  ;;  %v4784_v34 = vsel %vm2473_vm6, %v4715_v19, 0.0 }
 0x6e4   : > { %v4785_v11 = vadd.f32 %v4784_v34, %v4783_v16  ;;  %v8655_v13 = vpop.permute.xlu1 %4211  ;;  %v4155_v17 = vpop.permute.xlu0 %4154 }
 0x6e5   : > { %v4361_v12 = vrot.slane %v4155_v17, %v7455_v53  ;;  %v4716_v8 = vmul.f32 %v4155_v17, %v9775_v2  ;;  %v9787_v2 = vmax.f32 %v9786_v44, 0.0 }
 0x6e7   : > { %v4362_v51 = vsel %vm2857_vm13, %v4361_v12, %v4357_v63  ;;  %v4786_v42 = vsel %vm2473_vm6, %v4716_v8, 0.0  ;;  %v4723_v8 = vmul.f32 %v8603_v20, %v9787_v2 }
 0x6e8   : > { %v4787_v6 = vadd.f32 %v4786_v42, %v4785_v11  ;;  %v8665_v56 = vpop.permute.xlu1 %4217  ;;  %v4158_v39 = vpop.permute.xlu0 %4157 }
 0x6e9   : > { %v4366_v0 = vrot.slane %v4158_v39, %v9703_v47  ;;  %v4717_v49 = vmul.f32 %v4158_v39, %v9779_v22  ;;  %v4395_v39 = vrot.slane %v8603_v20, %v7452_v38  ;;  %v9792_v20 = vld [vmem:[#allocation26_spill] sm:$0xff] }
 0x6ea   : > { %v4788_v11 = vrot.slane %v4787_v6, 4 }
 0x6eb   : > { %v4371_v57 = vsel %vm2815_vm7, %v4370_v52, %v4366_v0  ;;  %v4794_v43 = vsel %vm2473_vm6, %v4717_v49, 0.0 }
 0x6ec   : > { %v4796_v40 = vadd.f32 %v4795_v3, %v4794_v43  ;;  %v8675_v21 = vpop.permute.xlu1 %4223  ;;  %v4164_v41 = vpop.permute.xlu0 %4163  ;;  %v4789_v22 = vadd.f32 %v4788_v11, %v4787_v6  ;;  %v4805_v43 = vsel %vm2473_vm6, %v4723_v8, 0.0 }
 0x6ed   : > { %v4375_v59 = vrot.slane %v4164_v41, %v9705_v9  ;;  %v4719_v31 = vmul.f32 %v4164_v41, %v9781_v45  ;;  %v9790_v41 = vld [vmem:[#allocation23_spill] sm:$0xff] }
 0x6ef   : > { %v4376_v7 = vsel %vm2822_vm8, %v4375_v59, %v4371_v57  ;;  %v4797_v55 = vsel %vm2473_vm6, %v4719_v31, 0.0  ;;  %v9791_v59 = vmax.f32 %v9790_v41, 0.0  ;;  %v9793_v31 = vmax.f32 %v9792_v20, 0.0 }
 0x6f0   : > { %v4798_v58 = vadd.f32 %v4797_v55, %v4796_v40  ;;  %v8682_v36 = vpop.permute.xlu1 %4229  ;;  %v4167_v10 = vpop.permute.xlu0 %4166 }
 0x6f1   : > { %v4380_v1 = vrot.slane %v4167_v10, %v7439_v62  ;;  %v4720_v24 = vmul.f32 %v4167_v10, %v9783_v23 }
 0x6f3   : > { %v4381_v46 = vsel %vm2829_vm9, %v4380_v1, %v4376_v7  ;;  %v4799_v5 = vsel %vm2473_vm6, %v4720_v24, 0.0  ;;  %v4725_v7 = vmul.f32 %v8614_v35, %v9793_v31  ;;  %v4405_v24 = vrot.slane %v8614_v35, %v9703_v47  ;;  %v9802_v31 = vld [vmem:[#allocation32_spill] sm:$0xff] }
 0x6f4   : > { %v4800_v26 = vadd.f32 %v4799_v5, %v4798_v58  ;;  %v8689_v16 = vpop.permute.xlu1 %4235  ;;  %v4170_v15 = vpop.permute.xlu0 %4169  ;;  %v4790_v58 = vrot.slane %v4789_v22, 2 }
 0x6f5   : > { %v4385_v48 = vrot.slane %v4170_v15, %v7442_v33  ;;  %v4721_v19 = vmul.f32 %v4170_v15, %v9785_v37 }
 0x6f6   : > { %v4791_v35 = vadd.f32 %v4790_v58, %v4789_v22 }
 0x6f7   : > { %v4386_v63 = vsel %vm2836_vm10, %v4385_v48, %v4381_v46  ;;  %v4801_v34 = vsel %vm2473_vm6, %v4721_v19, 0.0  ;;  %v9794_v46 = vld [vmem:[#allocation28_spill] sm:$0xff]  ;;  %v9796_v48 = vld [vmem:[#allocation25_spill] sm:$0xff]  ;;  %v4414_v19 = vrot.slane %v8623_v29, %v9705_v9 }
 0x6f8   : > { %v4802_v17 = vadd.f32 %v4801_v34, %v4800_v26  ;;  %v4173_v12 = vpop.permute.xlu0 %4172  ;;  %v8704_v52 = vpop.permute.xlu1 %4241  ;;  %v9795_v5 = vmax.f32 %v9794_v46, 0.0  ;;  %v9797_v27 = vmax.f32 %v9796_v48, 0.0 }
 0x6f9   : > { %v4390_v32 = vrot.slane %v4173_v12, %v7449_v60  ;;  %v4722_v42 = vmul.f32 %v4173_v12, %v9789_v25 }
 0x6fa   : > { %v4727_v26 = vmul.f32 %v8623_v29, %v9795_v5 }
 0x6fb   : > { %v4391_v0 = vsel %vm2843_vm11, %v4390_v32, %v4386_v63  ;;  %v4803_v61 = vsel %vm2473_vm6, %v4722_v42, 0.0  ;;  %v9798_v32 = vld [vmem:[#allocation30_spill] sm:$0xff]  ;;  %v9800_v42 = vld [vmem:[#allocation27_spill] sm:$0xff] }
 0x6fc   : > { %v4804_v49 = vadd.f32 %v4803_v61, %v4802_v17  ;;  %v4396_v3 = vsel %vm2850_vm12, %v4395_v39, %v4391_v0  ;;  %v4179_v57 = vpop.permute.xlu0 %4178  ;;  %v8718_v10 = vpop.permute.xlu1 %4247  ;;  %v4818_v8 = vsel %vm2473_vm6, %v4727_v26, 0.0  ;;  %v9799_v4 = vmax.f32 %v9798_v32, 0.0 }
 0x6fd   : > { %v4400_v40 = vrot.slane %v4179_v57, %v7455_v53  ;;  %v4724_v28 = vmul.f32 %v4179_v57, %v9791_v59  ;;  %v9801_v39 = vmax.f32 %v9800_v42, 0.0  ;;  %v4424_v61 = vrot.slane %v8632_v14, %v7442_v33 }
 0x6fe   : > { %v4806_v45 = vadd.f32 %v4805_v43, %v4804_v49  ;;  %v4729_v25 = vmul.f32 %v8632_v14, %v9799_v4  ;;  %v4453_v42 = vrot.slane %v8655_v13, %v9705_v9 }
 0x6ff   : > { %v4401_v55 = vsel %vm2857_vm13, %v4400_v40, %v4396_v3  ;;  %v4807_v6 = vsel %vm2473_vm6, %v4724_v28, 0.0  ;;  %v4792_v40 = vrot.slane %v4791_v35, 1 }
 0x700   : > { %v4636_v1 = vsel %vm3132_vm14, %v4401_v55, %v4362_v51  ;;  %v4808_v54 = vadd.f32 %v4807_v6, %v4806_v45  ;;  %v4185_v23 = vpop.permute.xlu0 %4184  ;;  %v4815_v51 = vsel %vm2473_vm6, %v4725_v7, 0.0  ;;  %v8744_v49 = vpop.permute.xlu1 %4253  ;;  %v4822_v20 = vsel %vm2473_vm6, %v4729_v25, 0.0  ;;  %v9804_v6 = vld [vmem:[#allocation29_spill] sm:$0xff] }
 0x701   : > { %v4409_v15 = vrot.slane %v4185_v23, %v9704_v50  ;;  %v4726_v37 = vmul.f32 %v4185_v23, %v9797_v27  ;;  %v9803_v7 = vmax.f32 %v9802_v31, 0.0  ;;  %v9805_v58 = vmax.f32 %v9804_v6, 0.0 }
 0x702   : > { %v4809_v63 = vrot.slane %v4808_v54, 4  ;;  %v4434_v23 = vrot.slane %v8641_v30, %v7452_v38  ;;  %v4444_v25 = vrot.slane %v8648_v18, %v9703_v47 }
 0x703   : > { %v4410_v34 = vsel %vm2815_vm7, %v4409_v15, %v4405_v24  ;;  %v4816_v11 = vsel %vm2473_vm6, %v4726_v37, 0.0  ;;  %v4731_v14 = vmul.f32 %v8641_v30, %v9803_v7  ;;  %v4793_v15 = vadd.f32 %v4792_v40, %v4791_v35 }
 0x704   : > { %v4810_v17 = vadd.f32 %v4809_v63, %v4808_v54  ;;  %v4817_v12 = vadd.f32 %v4816_v11, %v4815_v51  ;;  %v4415_v44 = vsel %vm2822_vm8, %v4414_v19, %v4410_v34  ;;  %v4191_v2 = vpop.permute.xlu0 %4190  ;;  %v8760_v27 = vpop.permute.xlu1 %4277  ;;  %v9806_v11 = vld [vmem:[#allocation31_spill] sm:$0xff] }
 0x705   : > { %v4419_v29 = vrot.slane %v4191_v2, %v7439_v62  ;;  %v4728_v0 = vmul.f32 %v4191_v2, %v9801_v39  ;;  %v4826_v51 = vsel %vm2473_vm6, %v4731_v14, 0.0  ;;  %v9807_v30 = vmax.f32 %v9806_v11, 0.0 }
 0x706   : > { %v4811_v22 = vrot.slane %v4810_v17, 2  ;;  %v4819_v3 = vadd.f32 %v4818_v8, %v4817_v12 }
 0x707   : > { %v4420_v57 = vsel %vm2829_vm9, %v4419_v29, %v4415_v44  ;;  %v4820_v43 = vsel %vm2473_vm6, %v4728_v0, 0.0 }
 0x708   : > { %v4812_v41 = vadd.f32 %v4811_v22, %v4810_v17  ;;  %v4821_v59 = vadd.f32 %v4820_v43, %v4819_v3  ;;  %v4425_v28 = vsel %vm2836_vm10, %v4424_v61, %v4420_v57  ;;  %v4197_v45 = vpop.permute.xlu0 %4196  ;;  %v8776_v39 = vpop.permute.xlu1 %4259 }
 0x709   : > { %v4429_v55 = vrot.slane %v4197_v45, %v7449_v60  ;;  %v4730_v54 = vmul.f32 %v4197_v45, %v9805_v58  ;;  %v9808_v58 = vld [vmem:[#allocation33_spill] sm:$0xff] }
 0x70a   : > { %v4813_v24 = vrot.slane %v4812_v41, 1  ;;  %v4823_v46 = vadd.f32 %v4822_v20, %v4821_v59 }
 0x70b   : > { %v4430_v5 = vsel %vm2843_vm11, %v4429_v55, %v4425_v28  ;;  %v4824_v26 = vsel %vm2473_vm6, %v4730_v54, 0.0  ;;  %v4473_v55 = vrot.slane %v8675_v21, %v7452_v38  ;;  %v9809_v54 = vmax.f32 %v9808_v58, 0.0  ;;  %v9822_v58 = vld [vmem:[#allocation42_spill] sm:$0xff] }
 0x70c   : > { %v4814_v48 = vadd.f32 %v4813_v24, %v4812_v41  ;;  %v4825_v37 = vadd.f32 %v4824_v26, %v4823_v46  ;;  %v4435_v19 = vsel %vm2850_vm12, %v4434_v23, %v4430_v5  ;;  %v4203_v63 = vpop.permute.xlu0 %4202  ;;  %v4463_v41 = vrot.slane %v8665_v56, %v7442_v33  ;;  %v8784_v59 = vpop.permute.xlu1 %4304  ;;  %v9810_v5 = vld [vmem:[#allocation34_spill] sm:$0xff] }
 0x70d   : > { %v4439_v34 = vrot.slane %v4203_v63, %v7455_v53  ;;  %v4732_v17 = vmul.f32 %v4203_v63, %v9807_v30  ;;  %v9811_v26 = vmax.f32 %v9810_v5, 0.0 }
 0x70e   : > { %v4949_v12 = vsel %vm3132_vm14, %v4814_v48, %v4793_v15  ;;  %v4827_v44 = vadd.f32 %v4826_v51, %v4825_v37 }
 0x70f   : > { %v4440_v2 = vsel %vm2857_vm13, %v4439_v34, %v4435_v19  ;;  %v4828_v35 = vsel %vm2473_vm6, %v4732_v17, 0.0  ;;  %v4733_v15 = vmul.f32 %v8648_v18, %v9811_v26  ;;  %v9812_v17 = vld [vmem:[#allocation36_spill] sm:$0xff] }
 0x710   : > { %v4637_v8 = vsel %vm3134_vm15, %v4440_v2, %v4636_v1  ;;  %v4829_v32 = vadd.f32 %v4828_v35, %v4827_v44  ;;  %v4209_v4 = vpop.permute.xlu0 %4208  ;;  %v8800_v37 = vpop.permute.xlu1 %4262  ;;  %v9813_v18 = vmax.f32 %v9812_v17, 0.0  ;;  %v9814_v35 = vld [vmem:[#allocation35_spill] sm:$0xff] }
 0x711   : > { %v4448_v29 = vrot.slane %v4209_v4, %v9704_v50  ;;  %v4734_v23 = vmul.f32 %v4209_v4, %v9809_v54  ;;  %v4836_v30 = vsel %vm2473_vm6, %v4733_v15, 0.0  ;;  %v9823_v54 = vmax.f32 %v9822_v58, 0.0 }
 0x712   : > { %v4830_v0 = vrot.slane %v4829_v32, 4  ;;  %v4502_v58 = vrot.slane %v8704_v52, %v7442_v33 }
 0x713   : > { %v4449_v61 = vsel %vm2815_vm7, %v4448_v29, %v4444_v25  ;;  %v4837_v51 = vsel %vm2473_vm6, %v4734_v23, 0.0  ;;  %v4741_v23 = vmul.f32 %v8682_v36, %v9823_v54 }
 0x714   : > { %v4831_v22 = vadd.f32 %v4830_v0, %v4829_v32  ;;  %v4454_v3 = vsel %vm2822_vm8, %v4453_v42, %v4449_v61  ;;  %v4215_v57 = vpop.permute.xlu0 %4214  ;;  %v4838_v44 = vadd.f32 %v4837_v51, %v4836_v30  ;;  %v8814_v2 = vpop.permute.xlu1 %4286  ;;  %v9815_v32 = vmax.f32 %v9814_v35, 0.0  ;;  %v9816_v61 = vld [vmem:[#allocation38_spill] sm:$0xff] }
 0x715   : > { %v4458_v1 = vrot.slane %v4215_v57, %v7439_v62  ;;  %v4857_v17 = vsel %vm2473_vm6, %v4741_v23, 0.0  ;;  %v9830_v35 = vld [vmem:[#allocation46_spill] sm:$0xff] }
 0x716   : > { %v4832_v43 = vrot.slane %v4831_v22, 2  ;;  %v4736_v4 = vmul.f32 %v4215_v57, %v9815_v32  ;;  %v9831_v32 = vmax.f32 %v9830_v35, 0.0  ;;  %v9838_v23 = vld [vmem:[#allocation58_spill] sm:$0xff] }
 0x717   : > { %v4459_v40 = vsel %vm2829_vm9, %v4458_v1, %v4454_v3 }
 0x718   : > { %v4833_v28 = vadd.f32 %v4832_v43, %v4831_v22  ;;  %v4221_v45 = vpop.permute.xlu0 %4220  ;;  %v4464_v7 = vsel %vm2836_vm10, %v4463_v41, %v4459_v40  ;;  %v4841_v42 = vsel %vm2473_vm6, %v4736_v4, 0.0  ;;  %v9817_v22 = vmax.f32 %v9816_v61, 0.0  ;;  %v9818_v43 = vld [vmem:[#allocation37_spill] sm:$0xff] }
 0x719   : > { %v4468_v20 = vrot.slane %v4221_v45, %v7449_v60  ;;  %v9819_v40 = vmax.f32 %v9818_v43, 0.0  ;;  %v4745_v4 = vmul.f32 %v8704_v52, %v9831_v32 }
 0x71a   : > { %v4834_v31 = vrot.slane %v4833_v28, 1  ;;  %v4737_v3 = vmul.f32 %v8665_v56, %v9817_v22 }
 0x71b   : > { %v4469_v14 = vsel %vm2843_vm11, %v4468_v20, %v4464_v7  ;;  %v4738_v41 = vmul.f32 %v4221_v45, %v9819_v40  ;;  %v9824_v45 = vld [vmem:[#allocation40_spill] sm:$0xff]  ;;  %v4483_v40 = vrot.slane %v8682_v36, %v9703_v47  ;;  %v4864_v54 = vsel %vm2473_vm6, %v4745_v4, 0.0  ;;  %v9844_v4 = vld [vmem:[#allocation51_spill] sm:$0xff] }
 0x71c   : > { %v4835_v6 = vadd.f32 %v4834_v31, %v4833_v28  ;;  %v4227_v24 = vpop.permute.xlu0 %4226  ;;  %v4474_v19 = vsel %vm2850_vm12, %v4473_v55, %v4469_v14  ;;  %v4843_v28 = vsel %vm2473_vm6, %v4737_v3, 0.0  ;;  %v9820_v31 = vld [vmem:[#allocation41_spill] sm:$0xff]  ;;  %v9834_v3 = vld [vmem:[#allocation43_spill] sm:$0xff]  ;;  %v9839_v36 = vmax.f32 %v9838_v23, 0.0 }
 0x71d   : > { %v4478_v46 = vrot.slane %v4227_v24, %v7455_v53  ;;  %v9821_v7 = vmax.f32 %v9820_v31, 0.0  ;;  %v4845_v55 = vsel %vm2473_vm6, %v4738_v41, 0.0  ;;  %v4492_v41 = vrot.slane %v8689_v16, %v9705_v9 }
 0x71e   : > { %v8798_v48 = vsel %vm3134_vm15, %v4835_v6, %v4949_v12  ;;  %v4735_v12 = vmul.f32 %v8655_v13, %v9813_v18  ;;  %v8827_v13 = vpop.permute.xlu1 %4310  ;;  %v9828_v18 = vld [vmem:[#allocation44_spill] sm:$0xff] }
 0x71f   : > { %v4479_v63 = vsel %vm2857_vm13, %v4478_v46, %v4474_v19  ;;  %v9825_v46 = vmax.f32 %v9824_v45, 0.0  ;;  %v9826_v19 = vld [vmem:[#allocation39_spill] sm:$0xff]  ;;  %v4757_v45 = vmul.f32 %v8760_v27, %v9839_v36 }
 0x720   : > { %v8806_v34 = vsel %vm3136_vm0, %v4479_v63, %v4637_v8  ;;  %v8808_v11 = vpop.permute.xlu0 %4232  ;;  %v4839_v29 = vsel %vm2473_vm6, %v4735_v12, 0.0  ;;  %v9827_v63 = vmax.f32 %v9826_v19, 0.0  ;;  %v9829_v12 = vmax.f32 %v9828_v18, 0.0  ;;  %v9850_v36 = vld [vmem:[#allocation67_spill] sm:$0xff] }
 0x721   : > { %v4840_v8 = vadd.f32 %v4839_v29, %v4838_v44  ;;  %v4742_v14 = vmul.f32 %v8808_v11, %v9821_v7  ;;  %v4739_v5 = vmul.f32 %v8675_v21, %v9825_v46  ;;  %v9832_v29 = vld [vmem:[#allocation48_spill] sm:$0xff] }
 0x722   : > { %v8838_v6 = vpop.permute.xlu1 %4268  ;;  %v4740_v51 = vmul.f32 %v4227_v24, %v9827_v63  ;;  %v4743_v44 = vmul.f32 %v8689_v16, %v9829_v12  ;;  %v4512_v16 = vrot.slane %v8718_v10, %v7452_v38  ;;  %v4522_v63 = vrot.slane %v8744_v49, %v9703_v47 }
 0x723   : > { %v4842_v1 = vadd.f32 %v4841_v42, %v4840_v8  ;;  %v4858_v15 = vsel %vm2473_vm6, %v4742_v14, 0.0  ;;  %v4847_v21 = vsel %vm2473_vm6, %v4739_v5, 0.0  ;;  %v9833_v8 = vmax.f32 %v9832_v29, 0.0  ;;  %v9840_v5 = vld [vmem:[#allocation52_spill] sm:$0xff] }
 0x724   : > { %v8818_v25 = vpop.permute.xlu0 %4238  ;;  %v4859_v24 = vadd.f32 %v4858_v15, %v4857_v17  ;;  %v4849_v7 = vsel %vm2473_vm6, %v4740_v51, 0.0  ;;  %v9842_v51 = vld [vmem:[#allocation65_spill] sm:$0xff] }
 0x725   : > { %v4844_v20 = vadd.f32 %v4843_v28, %v4842_v1  ;;  %v4747_v42 = vmul.f32 %v8718_v10, %v9833_v8  ;;  %v9835_v1 = vmax.f32 %v9834_v3, 0.0  ;;  %v9836_v28 = vld [vmem:[#allocation50_spill] sm:$0xff]  ;;  %v9843_v17 = vmax.f32 %v9842_v51, 0.0  ;;  %v9846_v8 = vld [vmem:[#allocation59_spill] sm:$0xff] }
 0x726   : > { %v8864_v61 = vpop.permute.xlu1 %4292 }
 0x727   : > { %v4846_v26 = vadd.f32 %v4845_v55, %v4844_v20  ;;  %v4744_v43 = vmul.f32 %v8818_v25, %v9835_v1  ;;  %v9837_v20 = vmax.f32 %v9836_v28, 0.0  ;;  %v4860_v55 = vsel %vm2473_vm6, %v4743_v44, 0.0 }
 0x728   : > { %v8822_v0 = vpop.permute.xlu0 %4244  ;;  %v8889_v46 = vsel %vm2473_vm6, %v4747_v42, 0.0  ;;  %v4861_v19 = vadd.f32 %v4860_v55, %v4859_v24  ;;  %v4766_v18 = vmul.f32 %v8784_v59, %v9843_v17  ;;  %v9847_v42 = vmax.f32 %v9846_v8, 0.0  ;;  %v9852_v17 = vld [vmem:[#allocation53_spill] sm:$0xff] }
 0x729   : > { %v4848_v22 = vadd.f32 %v4847_v21, %v4846_v26  ;;  %v4749_v31 = vmul.f32 %v8744_v49, %v9837_v20  ;;  %v9841_v26 = vmax.f32 %v9840_v5, 0.0  ;;  %v4862_v44 = vsel %vm2473_vm6, %v4744_v43, 0.0  ;;  %v9848_v20 = vld [vmem:[#allocation49_spill] sm:$0xff]  ;;  %v9864_v43 = vld [vmem:[#allocation60_spill] sm:$0xff] }
 0x72a   : > { %v9845_v21 = vmax.f32 %v9844_v4, 0.0  ;;  %v4760_v24 = vmul.f32 %v8814_v2, %v9847_v42  ;;  %v8909_v3 = vpop.permute.xlu1 %4316  ;;  %v4487_v28 = vrot.slane %v8808_v11, %v9704_v50  ;;  %v9851_v5 = vmax.f32 %v9850_v36, 0.0  ;;  %v9854_v8 = vld [vmem:[#allocation45_spill] sm:$0xff] }
 0x72b   : > { %v4751_v15 = vmul.f32 %v8776_v39, %v9841_v26  ;;  %v4850_v12 = vadd.f32 %v4849_v7, %v4848_v22  ;;  %v4878_v35 = vsel %vm2473_vm6, %v4749_v31, 0.0  ;;  %v4899_v22 = vsel %vm2473_vm6, %v4757_v45, 0.0 }
 0x72c   : > { %v8831_v57 = vpop.permute.xlu0 %4250  ;;  %v4752_v29 = vmul.f32 %v8800_v37, %v9845_v21  ;;  %v9849_v31 = vmax.f32 %v9848_v20, 0.0  ;;  %v4768_v26 = vmul.f32 %v8827_v13, %v9851_v5  ;;  %v4863_v45 = vadd.f32 %v4862_v44, %v4861_v19 }
 0x72d   : > { %v4881_v55 = vsel %vm2473_vm6, %v4751_v15, 0.0  ;;  %v8928_v51 = vsel %vm2473_vm6, %v4766_v18, 0.0  ;;  %v9853_v4 = vmax.f32 %v9852_v17, 0.0  ;;  %v4851_v21 = vrot.slane %v4850_v12, 4 }
 0x72e   : > { %v9855_v42 = vmax.f32 %v9854_v8, 0.0  ;;  %v8942_v18 = vsel %vm2473_vm6, %v4760_v24, 0.0  ;;  %v4488_v5 = vsel %vm2815_vm7, %v4487_v28, %v4483_v40  ;;  %v4497_v17 = vrot.slane %v8818_v25, %v7439_v62  ;;  %v9856_v24 = vld [vmem:[#allocation61_spill] sm:$0xff]  ;;  %v8960_v20 = vpop.permute.xlu1 %4274 }
 0x72f   : > { %v4754_v11 = vmul.f32 %v8838_v6, %v9853_v4  ;;  %v4865_v36 = vadd.f32 %v4864_v54, %v4863_v45  ;;  %v8965_v28 = vadd.f32 %v4851_v21, %v4850_v12  ;;  %v4493_v54 = vsel %vm2822_vm8, %v4492_v41, %v4488_v5  ;;  %v9862_v21 = vld [vmem:[#allocation55_spill] sm:$0xff] }
 0x730   : > { %v8840_v56 = vpop.permute.xlu0 %4256  ;;  %v4746_v15 = vmul.f32 %v8822_v0, %v9855_v42  ;;  %v9857_v42 = vmax.f32 %v9856_v24, 0.0  ;;  %v9860_v24 = vld [vmem:[#allocation69_spill] sm:$0xff]  ;;  %v4498_v12 = vsel %vm2829_vm9, %v4497_v17, %v4493_v54  ;;  %v9865_v8 = vmax.f32 %v9864_v43, 0.0  ;;  %v9866_v5 = vld [vmem:[#allocation47_spill] sm:$0xff] }
 0x731   : > { %v4750_v7 = vmul.f32 %v8840_v56, %v9849_v31  ;;  %v4883_v31 = vsel %vm2473_vm6, %v4752_v29, 0.0  ;;  %v8953_v29 = vsel %vm2473_vm6, %v4768_v26, 0.0  ;;  %v8963_v40 = vsel %vm2473_vm6, %v4754_v11, 0.0 }
 0x732   : > { %v4762_v19 = vmul.f32 %v8864_v61, %v9857_v42  ;;  %v4866_v25 = vsel %vm2473_vm6, %v4746_v15, 0.0  ;;  %v9861_v32 = vmax.f32 %v9860_v24, 0.0  ;;  %v9863_v15 = vmax.f32 %v9862_v21, 0.0  ;;  %v9868_v21 = vld [vmem:[#allocation54_spill] sm:$0xff]  ;;  %v9018_v54 = vpop.permute.xlu1 %4298 }
 0x733   : > { %v4879_v4 = vsel %vm2473_vm6, %v4750_v7, 0.0  ;;  %v9858_v7 = vld [vmem:[#allocation57_spill] sm:$0xff]  ;;  %v9867_v17 = vmax.f32 %v9866_v5, 0.0  ;;  %v9870_v5 = vld [vmem:[#allocation66_spill] sm:$0xff]  ;;  %v4595_v49 = vrot.slane %v9018_v54, %v7455_v53 }
 0x734   : > { %v8851_v30 = vpop.permute.xlu0 %4280  ;;  %v9859_v26 = vmax.f32 %v9858_v7, 0.0  ;;  %v4770_v42 = vmul.f32 %v8909_v3, %v9861_v32  ;;  %v4880_v45 = vadd.f32 %v4879_v4, %v4878_v35  ;;  %v4756_v7 = vmul.f32 %v8960_v20, %v9863_v15 }
 0x735   : > { %v8989_v32 = vsel %vm2473_vm6, %v4762_v19, 0.0  ;;  %v4867_v35 = vadd.f32 %v4866_v25, %v4865_v36  ;;  %v4748_v4 = vmul.f32 %v8831_v57, %v9867_v17  ;;  %v4503_v36 = vsel %vm2836_vm10, %v4502_v58, %v4498_v12 }
 0x736   : > { %v4758_v23 = vmul.f32 %v8851_v30, %v9859_v26  ;;  %v4507_v26 = vrot.slane %v8822_v0, %v7449_v60  ;;  %v4526_v0 = vrot.slane %v8840_v56, %v9704_v50  ;;  %v9004_v15 = vsel %vm2473_vm6, %v4770_v42, 0.0 }
 0x737   : > { %v4882_v25 = vadd.f32 %v4881_v55, %v4880_v45  ;;  %v9871_v17 = vmax.f32 %v9870_v5, 0.0  ;;  %v4869_v52 = vadd.f32 %v8889_v46, %v4867_v35  ;;  %v4870_v58 = vsel %vm2473_vm6, %v4748_v4, 0.0 }
 0x738   : > { %v8877_v14 = vpop.permute.xlu0 %4301  ;;  %v4900_v43 = vsel %vm2473_vm6, %v4758_v23, 0.0  ;;  %v4556_v23 = vrot.slane %v8960_v20, %v7455_v53  ;;  %v4565_v55 = vrot.slane %v8851_v30, %v9704_v50  ;;  %v4527_v12 = vsel %vm2815_vm7, %v4526_v0, %v4522_v63  ;;  %v9876_v63 = vld [vmem:[#allocation63_spill] sm:$0xff] }
 0x739   : > { %v4765_v41 = vmul.f32 %v8877_v14, %v9871_v17  ;;  %v4901_v45 = vadd.f32 %v4900_v43, %v4899_v22  ;;  %v4884_v4 = vadd.f32 %v4883_v31, %v4882_v25  ;;  %v9877_v0 = vmax.f32 %v9876_v63, 0.0 }
 0x73a   : > { %v9879_v25 = vrot.slane %v8760_v27, %v9703_v47  ;;  %v4600_v10 = vrot.slane %v8877_v14, %v9703_v47  ;;  %v9880_v14 = vld [vmem:[#allocation70_spill] sm:$0xff] }
 0x73b   : > { %v4920_v35 = vsel %vm2473_vm6, %v4765_v41, 0.0  ;;  %v4517_v41 = vrot.slane %v8831_v57, %v7455_v53 }
 0x73c   : > { %v8911_v1 = vpop.permute.xlu0 %4283 }
 0x73d   : > { %v4759_v24 = vmul.f32 %v8911_v1, %v9865_v8  ;;  %v9869_v8 = vmax.f32 %v9868_v21, 0.0  ;;  %v4891_v21 = vsel %vm2473_vm6, %v4756_v7, 0.0  ;;  %v9872_v7 = vld [vmem:[#allocation68_spill] sm:$0xff]  ;;  %v4570_v30 = vrot.slane %v8911_v1, %v9705_v9 }
 0x73e   : > { %v9873_v5 = vmax.f32 %v9872_v7, 0.0  ;;  %v4764_v7 = vmul.f32 %v9018_v54, %v9877_v0  ;;  %v9878_v1 = vrot.slane %v8776_v39, %v9705_v9 }
 0x73f   : > { %v4902_v42 = vsel %vm2473_vm6, %v4759_v24, 0.0 }
 0x740   : > { %v8944_v44 = vpop.permute.xlu0 %4307  ;;  %v4903_v22 = vadd.f32 %v4902_v42, %v4901_v45  ;;  %v4532_v31 = vsel %vm2822_vm8, %v9878_v1, %v4527_v12  ;;  %v4566_v42 = vsel %vm2815_vm7, %v4565_v55, %v9879_v25  ;;  %v4912_v12 = vsel %vm2473_vm6, %v4764_v7, 0.0  ;;  %v9887_v25 = vld [vmem:[#allocation64_spill] sm:$0xff] }
 0x741   : > { %v4609_v47 = vrot.slane %v8944_v44, %v9705_v9  ;;  %v9885_v9 = vrot.slane %v8800_v37, %v7439_v62 }
 0x744   : > { %v8977_v11 = vpop.permute.xlu0 %4265 }
 0x745   : > { %v4753_v19 = vmul.f32 %v8977_v11, %v9869_v8  ;;  %v4508_v8 = vsel %vm2843_vm11, %v4507_v26, %v4503_v36  ;;  %v4767_v26 = vmul.f32 %v8944_v44, %v9873_v5  ;;  %v9874_v36 = vld [vmem:[#allocation62_spill] sm:$0xff]  ;;  %v4871_v5 = vadd.f32 %v4870_v58, %v4869_v52 }
 0x746   : > { %v9875_v17 = vmax.f32 %v9874_v36, 0.0  ;;  %v4571_v52 = vsel %vm2822_vm8, %v4570_v30, %v4566_v42  ;;  %v4541_v39 = vrot.slane %v8977_v11, %v7442_v33  ;;  %v4905_v58 = vadd.f32 %v8942_v18, %v4903_v22 }
 0x747   : > { %v4885_v24 = vsel %vm2473_vm6, %v4753_v19, 0.0  ;;  %v4513_v19 = vsel %vm2850_vm12, %v4512_v16, %v4508_v8  ;;  %v4922_v16 = vadd.f32 %v8928_v51, %v4920_v35  ;;  %v4923_v8 = vsel %vm2473_vm6, %v4767_v26, 0.0 }
 0x748   : > { %v4290_v56 = vpop.permute.xlu0 %4289  ;;  %v4886_v45 = vadd.f32 %v4885_v24, %v4884_v4  ;;  %v9881_v51 = vmax.f32 %v9880_v14, 0.0  ;;  %v9882_v24 = vld [vmem:[#allocation56_spill] sm:$0xff]  ;;  %v4537_v44 = vsel %vm2829_vm9, %v9885_v9, %v4532_v31  ;;  %v9886_v22 = vrot.slane %v8814_v2, %v7439_v62 }
 0x749   : > { %v4761_v46 = vmul.f32 %v4290_v56, %v9875_v17  ;;  %v4580_v27 = vrot.slane %v4290_v56, %v7442_v33  ;;  %v9883_v36 = vmax.f32 %v9882_v24, 0.0  ;;  %v4924_v35 = vadd.f32 %v4923_v8, %v4922_v16  ;;  %v9892_v14 = vld [vmem:[#allocation72_spill] sm:$0xff] }
 0x74a   : > { %v4888_v18 = vadd.f32 %v8963_v40, %v4886_v45  ;;  %v9884_v56 = vrot.slane %v8784_v59, %v9704_v50  ;;  %v4576_v4 = vsel %vm2829_vm9, %v9886_v22, %v4571_v52  ;;  %v4542_v0 = vsel %vm2836_vm10, %v4541_v39, %v4537_v44 }
 0x74b   : > { %v4906_v57 = vsel %vm2473_vm6, %v4761_v46, 0.0  ;;  %v4872_v46 = vrot.slane %v4871_v5, 4  ;;  %v4581_v40 = vsel %vm2836_vm10, %v4580_v27, %v4576_v4  ;;  %v9888_v2 = vmax.f32 %v9887_v25, 0.0 }
 0x74c   : > { %v4314_v43 = vpop.permute.xlu0 %4313  ;;  %v4907_v11 = vadd.f32 %v4906_v57, %v4905_v58  ;;  %v4605_v30 = vsel %vm2815_vm7, %v9884_v56, %v4600_v10  ;;  %v4926_v45 = vadd.f32 %v8953_v29, %v4924_v35  ;;  %v9889_v52 = vrot.slane %v8838_v6, %v7449_v60 }
 0x74d   : > { %v4769_v26 = vmul.f32 %v4314_v43, %v9881_v51  ;;  %v4610_v1 = vsel %vm2822_vm8, %v4609_v47, %v4605_v30  ;;  %v4619_v10 = vrot.slane %v4314_v43, %v7442_v33  ;;  %v4873_v57 = vadd.f32 %v4872_v46, %v4871_v5 }
 0x74e   : > { %v4909_v8 = vadd.f32 %v8989_v32, %v4907_v11  ;;  %v4547_v39 = vsel %vm2843_vm11, %v9889_v52, %v4542_v0  ;;  %v9890_v58 = vrot.slane %v8864_v61, %v7449_v60  ;;  %v4518_v32 = vsel %vm2857_vm13, %v4517_v41, %v4513_v19 }
 0x74f   : > { %v4927_v37 = vsel %vm2473_vm6, %v4769_v26, 0.0  ;;  %v9891_v6 = vrot.slane %v8827_v13, %v7439_v62  ;;  %v9893_v51 = vmax.f32 %v9892_v14, 0.0  ;;  %v9894_v19 = vrot.slane %v8965_v28, 2 }
 0x750   : > { %v4272_v55 = vpop.permute.xlu0 %4271  ;;  %v4586_v27 = vsel %vm2843_vm11, %v9890_v58, %v4581_v40  ;;  %v4928_v47 = vadd.f32 %v4927_v37, %v4926_v45  ;;  %v4874_v62 = vrot.slane %v4873_v57, 2  ;;  %v4639_v20 = vsel %vm3138_vm1, %v4518_v32, %v8806_v34 }
 0x751   : > { %v4755_v17 = vmul.f32 %v4272_v55, %v9883_v36  ;;  %v4551_v50 = vrot.slane %v4272_v55, %v7452_v38  ;;  %v4615_v5 = vsel %vm2829_vm9, %v9891_v6, %v4610_v1  ;;  %v9125_v41 = vadd.f32 %v9894_v19, %v8965_v28 }
 0x752   : > { %v4620_v24 = vsel %vm2836_vm10, %v4619_v10, %v4615_v5  ;;  %v9895_v28 = vrot.slane %v8909_v3, %v7449_v60 }
 0x753   : > { %v4889_v63 = vsel %vm2473_vm6, %v4755_v17, 0.0  ;;  %v4552_v29 = vsel %vm2850_vm12, %v4551_v50, %v4547_v39 }
 0x754   : > { %v4890_v59 = vadd.f32 %v4889_v63, %v4888_v18  ;;  %v4296_v7 = vpop.permute.xlu0 %4295  ;;  %v4557_v13 = vsel %vm2857_vm13, %v4556_v23, %v4552_v29  ;;  %v4930_v18 = vadd.f32 %v9004_v15, %v4928_v47  ;;  %v4625_v23 = vsel %vm2843_vm11, %v9895_v28, %v4620_v24 }
 0x755   : > { %v4590_v31 = vrot.slane %v4296_v7, %v7452_v38  ;;  %v4763_v42 = vmul.f32 %v4296_v7, %v9888_v2  ;;  %v4640_v4 = vsel %vm3140_vm2, %v4557_v13, %v4639_v20  ;;  %v4875_v63 = vadd.f32 %v4874_v62, %v4873_v57 }
 0x756   : > { %v4892_v16 = vadd.f32 %v4891_v21, %v4890_v59  ;;  %v4855_v59 = vrot.slane %v9125_v41, 1 }
 0x757   : > { %v4910_v55 = vsel %vm2473_vm6, %v4763_v42, 0.0  ;;  %v4591_v61 = vsel %vm2850_vm12, %v4590_v31, %v4586_v27 }
 0x758   : > { %v4893_v33 = vrot.slane %v4892_v16, 4  ;;  %v4911_v21 = vadd.f32 %v4910_v55, %v4909_v8  ;;  %v4320_v43 = vpop.permute.xlu0 %4319 }
 0x759   : > { %v4771_v26 = vmul.f32 %v4320_v43, %v9893_v51  ;;  %v4629_v46 = vrot.slane %v4320_v43, %v7452_v38 }
 0x75a   : > { %v4894_v36 = vadd.f32 %v4893_v33, %v4892_v16  ;;  %v4913_v17 = vadd.f32 %v4912_v12, %v4911_v21  ;;  %v4596_v12 = vsel %vm2857_vm13, %v4595_v49, %v4591_v61  ;;  %v9896_v49 = vld [vmem:[#allocation71_spill] sm:$0xff] }
 0x75b   : > { %v4931_v35 = vsel %vm2473_vm6, %v4771_v26, 0.0  ;;  %v9897_v30 = vmax.f32 %v9896_v49, 0.0  ;;  %v4630_v44 = vsel %vm2850_vm12, %v4629_v46, %v4625_v23  ;;  %v4641_v3 = vsel %vm3142_vm3, %v4596_v12, %v4640_v4 }
 0x75c   : > { %v4895_v11 = vrot.slane %v4894_v36, 2  ;;  %v4914_v38 = vrot.slane %v4913_v17, 4  ;;  %v4323_v56 = vpop.permute.xlu0 %4322  ;;  %v4932_v22 = vadd.f32 %v4931_v35, %v4930_v18 }
 0x75d   : > { %v4634_v54 = vrot.slane %v4323_v56, %v7455_v53  ;;  %v4772_v9 = vmul.f32 %v4323_v56, %v9897_v30 }
 0x75e   : > { %v4915_v15 = vadd.f32 %v4914_v38, %v4913_v17  ;;  %v4896_v53 = vadd.f32 %v4895_v11, %v4894_v36 }
 0x75f   : > { %v4635_v34 = vsel %vm2857_vm13, %v4634_v54, %v4630_v44  ;;  %v4933_v60 = vsel %vm2473_vm6, %v4772_v9, 0.0 }
 0x760   : > { %v4916_v0 = vrot.slane %v4915_v15, 2  ;;  %v4934_v40 = vadd.f32 %v4933_v60, %v4932_v22  ;;  %v4642_v50 = vsel %vm3144_vm4, %v4635_v34, %v4641_v3 }
 0x761   : > { %4644 = vst.msk [vmem:[%s366_s14] sm:$0xff] %vm2473_vm6, %v4642_v50 }
 0x762   : > { %v4917_v7 = vadd.f32 %v4916_v0, %v4915_v15  ;;  %v4935_v1 = vrot.slane %v4934_v40, 4 }
 0x763   : > { %6040 = shalt.err (!%p6037_p3)
}
 0x764   : > { %s6041_s14 = scalar_lea.hbm %s9159_s26, 128  ;;  %s6045_s29 = scalar_lea.hbm %s9256_s10, 384 }
 0x765   : > { %p6042_p4 = scmp.ne.s32.totalorder %s9159_s26, %s6041_s14  ;;  %p6046_p9 = scmp.lt.u32.totalorder %s9159_s26, %s9256_s10 }
 0x766   : > { %p6047_p10 = scmp.lt.u32.totalorder %s6045_s29, %s6041_s14  ;;  %p6049_p12 = scmp.lt.u32.totalorder %s6041_s14, %s9159_s26 }
 0x767   : > { %p6043_p7 = pnand %p6042_p4, %p6223_p5 }
 0x768   : > { %p6048_p11 = por %p6047_p10, %p6046_p9 }
 0x769   : > { %p6044_p8 = pneg %p6043_p7 }
 0x76a   : > { %p6050_p13 = por %p6049_p12, %p6048_p11 }
 0x76c   : > { %p6051_p0 = pnand %p6050_p13, %p6044_p8 }
 0x76e   : > { %6054 = shalt.err (!%p6051_p0)
}
 0x76f   : > { %5850 = dma.vmem_to_hbm [thread:$0]  (%p6223_p5), %s9161_s19, 128, %s9159_s26, %s4964_s27   ;;  %v4876_v37 = vrot.slane %v4875_v63, 1  ;;  %v4897_v31 = vrot.slane %v4896_v53, 1  ;;  %v4936_v25 = vadd.f32 %v4935_v1, %v4934_v40  ;;  %v4918_v2 = vrot.slane %v4917_v7, 1 }
 0x770   : > { %v4856_v42 = vadd.f32 %v4855_v59, %v9125_v41  ;;  %s9898_s12 = sshll.u32 %s9096_s11, 3  ;;  %s9899_s26 = sshll.u32 %s6206_s8, 7 }
 0x771   : > { %v4937_v45 = vrot.slane %v4936_v25, 2  ;;  %v4877_v10 = vadd.f32 %v4876_v37, %v4875_v63  ;;  %v4898_v16 = vadd.f32 %v4897_v31, %v4896_v53  ;;  %v4919_v57 = vadd.f32 %v4918_v2, %v4917_v7  ;;  %s359_s13 = scalar_lea.vmem [#allocation3], %s9898_s12  ;;  %s9201_s21 = scalar_lea.hbm %s9255_s9, %s9899_s26 }
 0x772   : > { %v4951_v39 = vsel %vm3136_vm0, %v4856_v42, %v8798_v48  ;;  %s4977_s19 = sshll.u32 %s359_s13, 4  ;;  %s4959_s14 = scalar_lea.sflag [#allocation4], %s9096_s11  ;;  %s9203_s19 = int_to_ptr.vmem [resolvable:$true] %s4977_s19 }
 0x773   : > { %v4938_v8 = vadd.f32 %v4937_v45, %v4936_v25  ;;  %v4952_v58 = vsel %vm3138_vm1, %v4877_v10, %v4951_v39  ;;  %s6055_s22 = scalar_lea.vmem %s9203_s19, 128  ;;  %s6126_s8 = smov [#allocation3]  }
 0x774   : > { %v4953_v55 = vsel %vm3140_vm2, %v4898_v16, %v4952_v58  ;;  %p6056_p1 = scmp.ne.s32.totalorder %s9203_s19, %s6055_s22  ;;  %s6059_s29 = sshll.u32 %s6126_s8, 4  ;;  %s6060_s29 = int_to_ptr.vmem [resolvable:$false] %s6059_s29 }
 0x775   : > { %v4939_v52 = vrot.slane %v4938_v8, 1  ;;  %v4954_v47 = vsel %vm3142_vm3, %v4919_v57, %v4953_v55  ;;  %s6061_s30 = scalar_lea.vmem %s6060_s29, 256  ;;  %p6062_p4 = scmp.lt.s32.totalorder %s9203_s19, %s6060_s29 }
 0x776   : > { %p6057_p2 = pnand %p6056_p1, %p6223_p5  ;;  %p6063_p7 = scmp.lt.s32.totalorder %s6061_s30, %s6055_s22 }
 0x777   : > { %v4940_v27 = vadd.f32 %v4939_v52, %v4938_v8 }
 0x778   : > { %p6058_p3 = pneg %p6057_p2  ;;  %p6064_p8 = por %p6063_p7, %p6062_p4 }
 0x779   : > { %v4955_v48 = vsel %vm3144_vm4, %v4940_v27, %v4954_v47 }
 0x77a   : > { %4957 = vst.msk [vmem:[%s359_s13] sm:$0xff] %vm2473_vm6, %v4955_v48  ;;  %p6065_p9 = pnand %p6064_p8, %p6058_p3 }
 0x77c   : > { %6068 = shalt.err (!%p6065_p9)
}
 0x77d   : > { %s6069_s11 = scalar_lea.hbm %s9201_s21, 128  ;;  %s6073_s26 = scalar_lea.hbm %s9255_s9, 384 }
 0x77e   : > { %p6070_p10 = scmp.ne.s32.totalorder %s9201_s21, %s6069_s11  ;;  %p6074_p13 = scmp.lt.u32.totalorder %s9201_s21, %s9255_s9 }
 0x77f   : > { %p6075_p0 = scmp.lt.u32.totalorder %s6073_s26, %s6069_s11  ;;  %p6077_p2 = scmp.lt.u32.totalorder %s6069_s11, %s9201_s21 }
 0x780   : > { %p6071_p11 = pnand %p6070_p10, %p6223_p5 }
 0x781   : > { %p6076_p1 = por %p6075_p0, %p6074_p13 }
 0x782   : > { %p6072_p12 = pneg %p6071_p11 }
 0x783   : > { %p6078_p3 = por %p6077_p2, %p6076_p1 }
 0x785   : > { %p6079_p4 = pnand %p6078_p3, %p6072_p12 }
 0x787   : > { %6082 = shalt.err (!%p6079_p4)
}
 0x788   : > { %5849 = dma.vmem_to_hbm [thread:$0]  (%p6223_p5), %s9203_s19, 128, %s9201_s21, %s4959_s14  }
 0x789 PF: > { %p5860_p7 = scmp.ge.s32.totalorder %s6121_s18, 2  ;;  %s5002_s22 = sand.u32 1, %s6109_s15  }
 0x78a   : > { %s5003_s8 = scalar_lea.sflag [#allocation4], %s5002_s22 }
 0x78b   : > { %p5854_p8 = pnand %p5860_p7, %p6227_p6 }
 0x78d   : > { %6100 = dma.done.wait (!%p5854_p8), %s5003_s8, 128  }
 0x78e   : > { %6102 = vsyncadd (!%p5854_p8), %s5003_s8, 4294967168  ;;  %s5012_s29 = scalar_lea.sflag [#allocation6], %s5002_s22 }
 0x78f   : > { %6104 = dma.done.wait (!%p5854_p8), %s5012_s29, 128  }
 0x790   : > { %6106 = vsyncadd (!%p5854_p8), %s5012_s29, 4294967168  ;;  %p26_p5 = scmp.ge.s32.totalorder %s6210_s20, 5   ;;  %s9900_s15 = smov %s6113_s16 }
 0x791   : > { %s9901_s16 = smov %s6117_s17  ;;  %s9902_s17 = smov %s6221_s23 }
 0x792   : > { %s9903_s18 = smov %s6210_s20  ;;  %28 = sbr.rel (!%p26_p5) target bundleno = 8 (0x8), region = 108 }
 0x799   :  { %5017 = vsyncpa [#allocation4], 1 }
 0x79a   :  { %5019 = vsyncpa [#allocation4 + $0x1], 1 }
 0x79b   :  { %5020 = vsyncpa [#allocation6], 1 }
 0x79c   :  { %5022 = vsyncpa [#allocation6 + $0x1], 1 }

</bundles_post_ra>
